<compile_context>
chip_gen: v7x
topology: tpu7x:2x2x1
jax: 0.10.0
libtpu: 0.0.40
codegen_flags: <defaults>
</compile_context>

<pallas_src>
import functools

import jax
import jax.numpy as jnp
from jax.experimental import pallas as pl
from jax.experimental.pallas import tpu as pltpu


# --------------------------------------------------------------------------- #
# Fused forward kernel (one batch element per grid step)                       #
# --------------------------------------------------------------------------- #
def _forward_kernel(dims, last_hw, final_dim, *refs):
    """dims: tuple of (H, W, Cin, Cout) per conv3x3 block; last_hw: (h, w) before 1x1 conv."""
    n_blocks = len(dims)
    idx = 0
    x_ref = refs[idx]; idx += 1
    block_refs = []
    for _ in range(n_blocks):
        block_refs.append(refs[idx:idx + 3]); idx += 3           # (w, scale, shift)
    wl_ref, bl_ref, wfc_ref, fcb_ref = refs[idx:idx + 4]; idx += 4
    o_ref = refs[idx]; idx += 1
    scr = refs[idx:]
    pad_scr = [scr[2 * l] for l in range(n_blocks)]              # halo-padded inputs
    conv_scr = [scr[2 * l + 1] for l in range(n_blocks)]         # conv outputs (for pooling)
    last_scr = scr[2 * n_blocks]                                 # input to the 1x1 conv
    pady_scr = scr[2 * n_blocks + 1]                             # padded 1x1-conv output

    h_last, w_last = last_hw
    wp = w_last + 2

    # Stage the unpadded NHWC input into the first halo scratch (padding=1 in VMEM).
    H0, W0 = dims[0][0], dims[0][1]
    pad_scr[0][...] = jnp.zeros_like(pad_scr[0])
    pad_scr[0][1:H0 + 1, 1:W0 + 1, :] = x_ref[0]

    for l, (H, W, Cin, Cout) in enumerate(dims):
        w_ref, s_ref, t_ref = block_refs[l]
        pref = pad_scr[l]

        # im2col: 9 shifted (H, W, Cin) windows concatenated on the channel (lane) axis.
        taps = [pref[dy:dy + H, dx:dx + W, :] for dy in range(3) for dx in range(3)]
        patches = jnp.concatenate(taps, axis=-1).reshape(H * W, 9 * Cin)

        # One MXU matmul per layer + folded eval-BatchNorm (conv bias absorbed) + ReLU.
        y = jnp.dot(patches, w_ref[...], preferred_element_type=jnp.float32)
        y = jnp.maximum(y * s_ref[...] + t_ref[...], 0.0)        # (H*W, Cout)

        # MaxPool2d(2, 2):
        #  - W direction: even-w / odd-w pixels are the even / odd rows of the (H*W, Cout)
        #    matrix (W is even), pooled with stride-2 row loads from VMEM scratch.
        conv_scr[l][...] = y
        hw2 = (H * W) // 2
        yw = jnp.maximum(conv_scr[l][pl.ds(0, hw2, stride=2), :],
                         conv_scr[l][pl.ds(1, hw2, stride=2), :])   # rows = h*(W/2)+j
        #  - H direction: max of adjacent (W/2)-row blocks; pooled rows are written
        #    straight into the next layer's halo scratch (or the 1x1-conv staging buffer).
        W2 = W // 2
        is_last = (l == n_blocks - 1)
        if not is_last:
            pad_scr[l + 1][...] = jnp.zeros_like(pad_scr[l + 1])
        for i in range(H // 2):
            blk = jnp.maximum(yw[(2 * i) * W2:(2 * i + 1) * W2, :],
                              yw[(2 * i + 1) * W2:(2 * i + 2) * W2, :])   # (W/2, Cout)
            if is_last:
                last_scr[i * W2:(i + 1) * W2, :] = blk
            else:
                pad_scr[l + 1][1 + i, 1:W2 + 1, :] = blk

    # Conv2d(kernel_size=1, padding=1): interior is one pointwise GEMM over all pixels;
    # the padded border of the output is bias-only.
    x_last = last_scr[...]                                               # (h*w, C)
    interior = (jnp.dot(x_last, wl_ref[...], preferred_element_type=jnp.float32)
                + bl_ref[...])                                           # (h*w, last_out)
    pady_scr[...] = jnp.zeros_like(pady_scr) + bl_ref[...]               # bias-filled map
    for i in range(h_last):
        r0 = (i + 1) * wp + 1
        pady_scr[r0:r0 + w_last, :] = interior[i * w_last:(i + 1) * w_last, :]

    # Flatten + Linear.  fc weight is pre-permuted host-side to
    # (final_dim, (h+2)*(w+2), last_out), so the contraction runs directly on the NHWC
    # padded map (torch's NCHW flatten order is exactly reproduced, with no runtime
    # transpose and no in-kernel flatten):
    #   out[d] = sum_{p,c} Y[p, c] * Wfc[d, p, c] + b[d]
    yf = pady_scr[...]                                                   # (P, last_out)
    cols = [jnp.sum(yf * wfc_ref[d], axis=1, keepdims=True)              # (P, 1)
            for d in range(final_dim)]
    contrib = jnp.concatenate(cols, axis=-1)                             # (P, final_dim)
    out = jnp.sum(contrib, axis=0, keepdims=True) + fcb_ref[...]         # (1, final_dim)
    o_ref[0] = out.astype(o_ref.dtype)


# --------------------------------------------------------------------------- #
# Wrapper: build the single fused pallas_call for a given static config        #
# --------------------------------------------------------------------------- #
def build_forward_fn(batch, in_ch, spatial, features, last_out, final_dim):
    dims = []
    H = W = spatial
    c = in_ch
    for f in features:
        assert H % 2 == 0 and W % 2 == 0, "MaxPool2d(2,2) blocks need even spatial dims"
        dims.append((H, W, c, f))
        H //= 2
        W //= 2
        c = f
    dims = tuple(dims)
    h_last, w_last, c_last = H, W, c
    hp, wpad = h_last + 2, w_last + 2
    P = hp * wpad
    n_blocks = len(features)

    kernel = functools.partial(_forward_kernel, dims, (h_last, w_last), final_dim)

    in_specs = [pl.BlockSpec((1, spatial, spatial, in_ch), lambda n: (n, 0, 0, 0))]
    for (_, _, ci, co) in dims:
        in_specs.append(pl.BlockSpec((9 * ci, co), lambda n: (0, 0)))
        in_specs.append(pl.BlockSpec((1, co), lambda n: (0, 0)))
        in_specs.append(pl.BlockSpec((1, co), lambda n: (0, 0)))
    in_specs += [
        pl.BlockSpec((c_last, last_out), lambda n: (0, 0)),
        pl.BlockSpec((1, last_out), lambda n: (0, 0)),
        pl.BlockSpec((final_dim, P, last_out), lambda n: (0, 0, 0)),
        pl.BlockSpec((1, final_dim), lambda n: (0, 0)),
    ]

    scratch = []
    for (Hl, Wl, ci, co) in dims:
        scratch.append(pltpu.VMEM((Hl + 2, Wl + 2, ci), jnp.float32))   # halo-padded input
        scratch.append(pltpu.VMEM((Hl * Wl, co), jnp.float32))          # conv output
    scratch.append(pltpu.VMEM((h_last * w_last, c_last), jnp.float32))  # 1x1-conv input
    scratch.append(pltpu.VMEM((P, last_out), jnp.float32))              # padded 1x1 output

    grid_spec = pltpu.PrefetchScalarGridSpec(
        num_scalar_prefetch=0,
        grid=(batch,),
        in_specs=in_specs,
        out_specs=pl.BlockSpec((1, 1, final_dim), lambda n: (n, 0, 0)),
        scratch_shapes=scratch,
    )

    call = pl.pallas_call(
        kernel,
        grid_spec=grid_spec,
        out_shape=jax.ShapeDtypeStruct((batch, 1, final_dim), jnp.float32),
        compiler_params=pltpu.CompilerParams(dimension_semantics=("parallel",)),
    )

    def forward(x_nchw, kparams):
        x = jnp.transpose(x_nchw, (0, 2, 3, 1))                  # NCHW -> NHWC (input only)
        args = [x]
        for (w9, s, t) in kparams["blocks"]:
            args += [w9, s, t]
        args += [kparams["last_w"], kparams["last_b"], kparams["fc_w_r"], kparams["fc_b"]]
        out = call(*args)
        return out.reshape(batch, final_dim)

    return forward


# --------------------------------------------------------------------------- #
# Parameters: synthetic init (torch-like layout) + host-side kernel prep       #
# --------------------------------------------------------------------------- #
def init_params(key, in_ch, features, last_out, spatial, final_dim):
    """Synthetic params matching the module: conv w (3,3,Cin,Cout); eval-mode BatchNorm
    folded into per-channel (scale, shift) absorbing the conv bias; fc_w rows in torch's
    NCHW flatten order."""
    params = {"blocks": []}
    H = W = spatial
    c = in_ch
    for f in features:
        key, k1, k2, k3, k4, k5, k6 = jax.random.split(key, 7)
        w = jax.random.normal(k1, (3, 3, c, f), jnp.float32) / jnp.sqrt(9.0 * c)
        b = 0.05 * jax.random.normal(k2, (f,), jnp.float32)
        gamma = 1.0 + 0.1 * jax.random.normal(k3, (f,), jnp.float32)
        beta = 0.05 * jax.random.normal(k4, (f,), jnp.float32)
        rmean = 0.05 * jax.random.normal(k5, (f,), jnp.float32)
        rvar = 1.0 + 0.1 * jnp.abs(jax.random.normal(k6, (f,), jnp.float32))
        scale = gamma / jnp.sqrt(rvar + 1e-5)
        shift = scale * (b - rmean) + beta
        params["blocks"].append((w, scale, shift))
        c = f
        H //= 2
        W //= 2
    key, k1, k2 = jax.random.split(key, 3)
    params["last_w"] = jax.random.normal(k1, (c, last_out), jnp.float32) / jnp.sqrt(float(c))
    params["last_b"] = 0.05 * jax.random.normal(k2, (last_out,), jnp.float32)
    flat_dim = last_out * (H + 2) * (W + 2)        # padding=1 on the 1x1 conv grows H,W by 2
    key, k1, k2 = jax.random.split(key, 3)
    params["fc_w"] = (jax.random.normal(k1, (flat_dim, final_dim), jnp.float32)
                      / jnp.sqrt(float(flat_dim)))
    params["fc_b"] = 0.05 * jax.random.normal(k2, (final_dim,), jnp.float32)
    return params


def prepare_kernel_params(params, in_ch, features, last_out, spatial, final_dim):
    """One-time host-side folds: im2col weight layout + NCHW-flatten permutation of fc_w."""
    H = W = spatial
    blocks = []
    for (w, scale, shift) in params["blocks"]:
        cin, cout = w.shape[2], w.shape[3]
        blocks.append((w.reshape(9 * cin, cout),
                       scale.reshape(1, cout).astype(jnp.float32),
                       shift.reshape(1, cout).astype(jnp.float32)))
        H //= 2
        W //= 2
    P = (H + 2) * (W + 2)
    # fc_w rows are NCHW-ordered (c, p); kernel wants (d, p, c) against the NHWC map.
    fc_w_r = jnp.transpose(params["fc_w"].reshape(last_out, P, final_dim), (2, 1, 0))
    return {
        "blocks": blocks,
        "last_w": params["last_w"],
        "last_b": params["last_b"].reshape(1, last_out),
        "fc_w_r": fc_w_r,
        "fc_b": params["fc_b"].reshape(1, final_dim),
    }


# --------------------------------------------------------------------------- #
# Pure-JAX reference (same math, torch-like params, no Pallas)                 #
# --------------------------------------------------------------------------- #
def reference_forward(x_nchw, params):
    prec = jax.lax.Precision.HIGHEST
    x = jnp.transpose(x_nchw, (0, 2, 3, 1))
    for (w, scale, shift) in params["blocks"]:
        N, H, W, Cin = x.shape
        Cout = w.shape[-1]
        xp = jnp.pad(x, ((0, 0), (1, 1), (1, 1), (0, 0)))
        acc = jnp.zeros((N, H, W, Cout), jnp.float32)
        for dy in range(3):
            for dx in range(3):
                acc = acc + jnp.einsum("nhwc,cd->nhwd",
                                       xp[:, dy:dy + H, dx:dx + W, :], w[dy, dx],
                                       precision=prec)
        y = jnp.maximum(acc * scale + shift, 0.0)
        x = jnp.max(y.reshape(N, H // 2, 2, W // 2, 2, Cout), axis=(2, 4))
    N = x.shape[0]
    xp = jnp.pad(x, ((0, 0), (1, 1), (1, 1), (0, 0)))
    y = jnp.einsum("nhwc,cd->nhwd", xp, params["last_w"], precision=prec) + params["last_b"]
    flat = jnp.transpose(y, (0, 3, 1, 2)).reshape(N, -1)     # torch's NCHW x.view(N, -1)
    return jnp.dot(flat, params["fc_w"], precision=prec) + params["fc_b"]


if __name__ == "__main__":
    # Small config consistent with the module topology:
    #   [conv3x3(pad=1) -> BN(eval) -> ReLU -> maxpool2x2] per feature,
    #   conv1x1(padding=1), NCHW flatten, Linear(flatten_dim, final_dim).
    N, C, S = 2, 4, 16
    features = [8, 16]
    last_out = 32
    final_dim = 8

    key = jax.random.PRNGKey(0)
    key, kx = jax.random.split(key)
    x = jax.random.normal(kx, (N, C, S, S), jnp.float32)     # NCHW, like the PyTorch module
    params = init_params(key, C, features, last_out, S, final_dim)
    kparams = prepare_kernel_params(params, C, features, last_out, S, final_dim)

    forward = jax.jit(build_forward_fn(N, C, S, features, last_out, final_dim))
    out = jax.block_until_ready(forward(x, kparams))
    assert out.shape == (N, final_dim)

    ref = reference_forward(x, params)
    assert bool(jnp.all(jnp.isfinite(out)))
    scale = float(jnp.max(jnp.abs(ref))) + 1e-6
    err = float(jnp.max(jnp.abs(out - ref)))
    if err > 1e-4 * scale:
        raise AssertionError(f"kernel/reference mismatch: max abs err {err}, ref scale {scale}")

    print("KERNEL_OK")
</pallas_src>

<mosaic_0001>
module attributes {stable_mosaic.version = 11 : i64} {
  func.func @_forward_kernel(%arg0: i32, %arg1: memref<1x16x16x4xf32, #tpu.memory_space<vmem>>, %arg2: memref<36x8xf32, #tpu.memory_space<vmem>>, %arg3: memref<1x8xf32, #tpu.memory_space<vmem>>, %arg4: memref<1x8xf32, #tpu.memory_space<vmem>>, %arg5: memref<72x16xf32, #tpu.memory_space<vmem>>, %arg6: memref<1x16xf32, #tpu.memory_space<vmem>>, %arg7: memref<1x16xf32, #tpu.memory_space<vmem>>, %arg8: memref<16x32xf32, #tpu.memory_space<vmem>>, %arg9: memref<1x32xf32, #tpu.memory_space<vmem>>, %arg10: memref<8x36x32xf32, #tpu.memory_space<vmem>>, %arg11: memref<1x8xf32, #tpu.memory_space<vmem>>, %arg12: memref<1x1x8xf32, #tpu.memory_space<vmem>>, %arg13: memref<18x18x4xf32, #tpu.memory_space<vmem>>, %arg14: memref<256x8xf32, #tpu.memory_space<vmem>>, %arg15: memref<10x10x8xf32, #tpu.memory_space<vmem>>, %arg16: memref<64x16xf32, #tpu.memory_space<vmem>>, %arg17: memref<16x16xf32, #tpu.memory_space<vmem>>, %arg18: memref<36x32xf32, #tpu.memory_space<vmem>>) attributes {dimension_semantics = [#tpu.dimension_semantics<parallel>], iteration_bounds = array<i64: 2>, scalar_prefetch = 0 : i64, scratch_operands = 6 : i64, tpu.core_type = #tpu.core_type<tc>, window_params = [{transform_indices = @transform_0, window_bounds = array<i64: 1, 16, 16, 4>}, {pipeline_mode = #tpu.pipeline_mode<synchronous>, transform_indices = @transform_1, window_bounds = array<i64: 36, 8>}, {pipeline_mode = #tpu.pipeline_mode<synchronous>, transform_indices = @transform_2, window_bounds = array<i64: 1, 8>}, {pipeline_mode = #tpu.pipeline_mode<synchronous>, transform_indices = @transform_3, window_bounds = array<i64: 1, 8>}, {pipeline_mode = #tpu.pipeline_mode<synchronous>, transform_indices = @transform_4, window_bounds = array<i64: 72, 16>}, {pipeline_mode = #tpu.pipeline_mode<synchronous>, transform_indices = @transform_5, window_bounds = array<i64: 1, 16>}, {pipeline_mode = #tpu.pipeline_mode<synchronous>, transform_indices = @transform_6, window_bounds = array<i64: 1, 16>}, {pipeline_mode = #tpu.pipeline_mode<synchronous>, transform_indices = @transform_7, window_bounds = array<i64: 16, 32>}, {pipeline_mode = #tpu.pipeline_mode<synchronous>, transform_indices = @transform_8, window_bounds = array<i64: 1, 32>}, {pipeline_mode = #tpu.pipeline_mode<synchronous>, transform_indices = @transform_9, window_bounds = array<i64: 8, 36, 32>}, {pipeline_mode = #tpu.pipeline_mode<synchronous>, transform_indices = @transform_10, window_bounds = array<i64: 1, 8>}, {transform_indices = @transform_11, window_bounds = array<i64: 1, 1, 8>}]} {
    %cst = arith.constant 0.000000e+00 : f32
    %0 = vector.broadcast %cst : f32 to vector<18x18x4xf32>
    %c0 = arith.constant 0 : index
    %c0_0 = arith.constant 0 : index
    %c0_1 = arith.constant 0 : index
    %1 = vector.load %arg13[%c0, %c0_0, %c0_1] : memref<18x18x4xf32, #tpu.memory_space<vmem>>, vector<18x18x4xf32>
    tpu.vector_store %arg13[%c0, %c0_0, %c0_1], %0 {strides = array<i32>} : memref<18x18x4xf32, #tpu.memory_space<vmem>>, vector<18x18x4xf32>,
    %c0_2 = arith.constant 0 : index
    %c0_3 = arith.constant 0 : index
    %c0_4 = arith.constant 0 : index
    %c0_5 = arith.constant 0 : index
    %2 = vector.load %arg1[%c0_2, %c0_3, %c0_4, %c0_5] : memref<1x16x16x4xf32, #tpu.memory_space<vmem>>, vector<1x16x16x4xf32>
    %3 = vector.shape_cast %2 : vector<1x16x16x4xf32> to vector<16x16x4xf32>
    %c1 = arith.constant 1 : index
    %c1_6 = arith.constant 1 : index
    %c0_7 = arith.constant 0 : index
    %4 = vector.load %arg13[%c1, %c1_6, %c0_7] : memref<18x18x4xf32, #tpu.memory_space<vmem>>, vector<16x16x4xf32>
    tpu.vector_store %arg13[%c1, %c1_6, %c0_7], %3 {strides = array<i32>} : memref<18x18x4xf32, #tpu.memory_space<vmem>>, vector<16x16x4xf32>,
    %c0_8 = arith.constant 0 : index
    %c0_9 = arith.constant 0 : index
    %c0_10 = arith.constant 0 : index
    %5 = vector.load %arg13[%c0_8, %c0_9, %c0_10] : memref<18x18x4xf32, #tpu.memory_space<vmem>>, vector<16x16x4xf32>
    %c0_11 = arith.constant 0 : index
    %c1_12 = arith.constant 1 : index
    %c0_13 = arith.constant 0 : index
    %6 = vector.load %arg13[%c0_11, %c1_12, %c0_13] : memref<18x18x4xf32, #tpu.memory_space<vmem>>, vector<16x16x4xf32>
    %c0_14 = arith.constant 0 : index
    %c2 = arith.constant 2 : index
    %c0_15 = arith.constant 0 : index
    %7 = vector.load %arg13[%c0_14, %c2, %c0_15] : memref<18x18x4xf32, #tpu.memory_space<vmem>>, vector<16x16x4xf32>
    %c1_16 = arith.constant 1 : index
    %c0_17 = arith.constant 0 : index
    %c0_18 = arith.constant 0 : index
    %8 = vector.load %arg13[%c1_16, %c0_17, %c0_18] : memref<18x18x4xf32, #tpu.memory_space<vmem>>, vector<16x16x4xf32>
    %c1_19 = arith.constant 1 : index
    %c1_20 = arith.constant 1 : index
    %c0_21 = arith.constant 0 : index
    %9 = vector.load %arg13[%c1_19, %c1_20, %c0_21] : memref<18x18x4xf32, #tpu.memory_space<vmem>>, vector<16x16x4xf32>
    %c1_22 = arith.constant 1 : index
    %c2_23 = arith.constant 2 : index
    %c0_24 = arith.constant 0 : index
    %10 = vector.load %arg13[%c1_22, %c2_23, %c0_24] : memref<18x18x4xf32, #tpu.memory_space<vmem>>, vector<16x16x4xf32>
    %c2_25 = arith.constant 2 : index
    %c0_26 = arith.constant 0 : index
    %c0_27 = arith.constant 0 : index
    %11 = vector.load %arg13[%c2_25, %c0_26, %c0_27] : memref<18x18x4xf32, #tpu.memory_space<vmem>>, vector<16x16x4xf32>
    %c2_28 = arith.constant 2 : index
    %c1_29 = arith.constant 1 : index
    %c0_30 = arith.constant 0 : index
    %12 = vector.load %arg13[%c2_28, %c1_29, %c0_30] : memref<18x18x4xf32, #tpu.memory_space<vmem>>, vector<16x16x4xf32>
    %c2_31 = arith.constant 2 : index
    %c2_32 = arith.constant 2 : index
    %c0_33 = arith.constant 0 : index
    %13 = vector.load %arg13[%c2_31, %c2_32, %c0_33] : memref<18x18x4xf32, #tpu.memory_space<vmem>>, vector<16x16x4xf32>
    %14 = tpu.concatenate %5, %6, %7, %8, %9, %10, %11, %12, %13 in 2 : vector<16x16x4xf32>, vector<16x16x4xf32>, vector<16x16x4xf32>, vector<16x16x4xf32>, vector<16x16x4xf32>, vector<16x16x4xf32>, vector<16x16x4xf32>, vector<16x16x4xf32>, vector<16x16x4xf32> -> vector<16x16x36xf32>
    %15 = vector.shape_cast %14 : vector<16x16x36xf32> to vector<256x36xf32>
    %c0_34 = arith.constant 0 : index
    %c0_35 = arith.constant 0 : index
    %16 = vector.load %arg2[%c0_34, %c0_35] : memref<36x8xf32, #tpu.memory_space<vmem>>, vector<36x8xf32>
    %cst_36 = arith.constant dense<0.000000e+00> : vector<256x8xf32>
    %17 = tpu.matmul %15, %16, %cst_36 {dimension_numbers = #tpu.dot_dimension_numbers<[1], [0], [0], [1], [0, 0, 1, 1], [], []>} : vector<256x36xf32>, vector<36x8xf32>, vector<256x8xf32> -> vector<256x8xf32>
    %c0_37 = arith.constant 0 : index
    %c0_38 = arith.constant 0 : index
    %18 = vector.load %arg3[%c0_37, %c0_38] : memref<1x8xf32, #tpu.memory_space<vmem>>, vector<1x8xf32>
    %19 = vector.broadcast %18 : vector<1x8xf32> to vector<256x8xf32>
    %20 = arith.mulf %17, %19 : vector<256x8xf32>
    %c0_39 = arith.constant 0 : index
    %c0_40 = arith.constant 0 : index
    %21 = vector.load %arg4[%c0_39, %c0_40] : memref<1x8xf32, #tpu.memory_space<vmem>>, vector<1x8xf32>
    %22 = vector.broadcast %21 : vector<1x8xf32> to vector<256x8xf32>
    %23 = arith.addf %20, %22 : vector<256x8xf32>
    %cst_41 = arith.constant 0.000000e+00 : f32
    %24 = vector.broadcast %cst_41 : f32 to vector<256x8xf32>
    %25 = arith.maximumf %23, %24 : vector<256x8xf32>
    %c0_42 = arith.constant 0 : index
    %c0_43 = arith.constant 0 : index
    %26 = vector.load %arg14[%c0_42, %c0_43] : memref<256x8xf32, #tpu.memory_space<vmem>>, vector<256x8xf32>
    tpu.vector_store %arg14[%c0_42, %c0_43], %25 {strides = array<i32>} : memref<256x8xf32, #tpu.memory_space<vmem>>, vector<256x8xf32>,
    %c0_44 = arith.constant 0 : index
    %c0_45 = arith.constant 0 : index
    %27 = tpu.strided_load %arg14[%c0_44, %c0_45] {strides = array<i32: 2, 1>} : memref<256x8xf32, #tpu.memory_space<vmem>>, vector<128x8xf32>
    %c1_46 = arith.constant 1 : index
    %c0_47 = arith.constant 0 : index
    %28 = tpu.strided_load %arg14[%c1_46, %c0_47] {strides = array<i32: 2, 1>} : memref<256x8xf32, #tpu.memory_space<vmem>>, vector<128x8xf32>
    %29 = arith.maximumf %27, %28 : vector<128x8xf32>
    %cst_48 = arith.constant 0.000000e+00 : f32
    %30 = vector.broadcast %cst_48 : f32 to vector<10x10x8xf32>
    %c0_49 = arith.constant 0 : index
    %c0_50 = arith.constant 0 : index
    %c0_51 = arith.constant 0 : index
    %31 = vector.load %arg15[%c0_49, %c0_50, %c0_51] : memref<10x10x8xf32, #tpu.memory_space<vmem>>, vector<10x10x8xf32>
    tpu.vector_store %arg15[%c0_49, %c0_50, %c0_51], %30 {strides = array<i32>} : memref<10x10x8xf32, #tpu.memory_space<vmem>>, vector<10x10x8xf32>,
    %32 = vector.extract_strided_slice %29 {offsets = [0, 0], sizes = [8, 8], strides = [1, 1]} : vector<128x8xf32> to vector<8x8xf32>
    %33 = vector.extract_strided_slice %29 {offsets = [8, 0], sizes = [8, 8], strides = [1, 1]} : vector<128x8xf32> to vector<8x8xf32>
    %34 = arith.maximumf %32, %33 : vector<8x8xf32>
    %c1_52 = arith.constant 1 : index
    %c1_53 = arith.constant 1 : index
    %c0_54 = arith.constant 0 : index
    %35 = vector.load %arg15[%c1_52, %c1_53, %c0_54] : memref<10x10x8xf32, #tpu.memory_space<vmem>>, vector<1x8x8xf32>
    %36 = vector.shape_cast %35 : vector<1x8x8xf32> to vector<8x8xf32>
    %37 = vector.shape_cast %34 : vector<8x8xf32> to vector<1x8x8xf32>
    tpu.vector_store %arg15[%c1_52, %c1_53, %c0_54], %37 {strides = array<i32>} : memref<10x10x8xf32, #tpu.memory_space<vmem>>, vector<1x8x8xf32>,
    %38 = vector.extract_strided_slice %29 {offsets = [16, 0], sizes = [8, 8], strides = [1, 1]} : vector<128x8xf32> to vector<8x8xf32>
    %39 = vector.extract_strided_slice %29 {offsets = [24, 0], sizes = [8, 8], strides = [1, 1]} : vector<128x8xf32> to vector<8x8xf32>
    %40 = arith.maximumf %38, %39 : vector<8x8xf32>
    %c2_55 = arith.constant 2 : index
    %c1_56 = arith.constant 1 : index
    %c0_57 = arith.constant 0 : index
    %41 = vector.load %arg15[%c2_55, %c1_56, %c0_57] : memref<10x10x8xf32, #tpu.memory_space<vmem>>, vector<1x8x8xf32>
    %42 = vector.shape_cast %41 : vector<1x8x8xf32> to vector<8x8xf32>
    %43 = vector.shape_cast %40 : vector<8x8xf32> to vector<1x8x8xf32>
    tpu.vector_store %arg15[%c2_55, %c1_56, %c0_57], %43 {strides = array<i32>} : memref<10x10x8xf32, #tpu.memory_space<vmem>>, vector<1x8x8xf32>,
    %44 = vector.extract_strided_slice %29 {offsets = [32, 0], sizes = [8, 8], strides = [1, 1]} : vector<128x8xf32> to vector<8x8xf32>
    %45 = vector.extract_strided_slice %29 {offsets = [40, 0], sizes = [8, 8], strides = [1, 1]} : vector<128x8xf32> to vector<8x8xf32>
    %46 = arith.maximumf %44, %45 : vector<8x8xf32>
    %c3 = arith.constant 3 : index
    %c1_58 = arith.constant 1 : index
    %c0_59 = arith.constant 0 : index
    %47 = vector.load %arg15[%c3, %c1_58, %c0_59] : memref<10x10x8xf32, #tpu.memory_space<vmem>>, vector<1x8x8xf32>
    %48 = vector.shape_cast %47 : vector<1x8x8xf32> to vector<8x8xf32>
    %49 = vector.shape_cast %46 : vector<8x8xf32> to vector<1x8x8xf32>
    tpu.vector_store %arg15[%c3, %c1_58, %c0_59], %49 {strides = array<i32>} : memref<10x10x8xf32, #tpu.memory_space<vmem>>, vector<1x8x8xf32>,
    %50 = vector.extract_strided_slice %29 {offsets = [48, 0], sizes = [8, 8], strides = [1, 1]} : vector<128x8xf32> to vector<8x8xf32>
    %51 = vector.extract_strided_slice %29 {offsets = [56, 0], sizes = [8, 8], strides = [1, 1]} : vector<128x8xf32> to vector<8x8xf32>
    %52 = arith.maximumf %50, %51 : vector<8x8xf32>
    %c4 = arith.constant 4 : index
    %c1_60 = arith.constant 1 : index
    %c0_61 = arith.constant 0 : index
    %53 = vector.load %arg15[%c4, %c1_60, %c0_61] : memref<10x10x8xf32, #tpu.memory_space<vmem>>, vector<1x8x8xf32>
    %54 = vector.shape_cast %53 : vector<1x8x8xf32> to vector<8x8xf32>
    %55 = vector.shape_cast %52 : vector<8x8xf32> to vector<1x8x8xf32>
    tpu.vector_store %arg15[%c4, %c1_60, %c0_61], %55 {strides = array<i32>} : memref<10x10x8xf32, #tpu.memory_space<vmem>>, vector<1x8x8xf32>,
    %56 = vector.extract_strided_slice %29 {offsets = [64, 0], sizes = [8, 8], strides = [1, 1]} : vector<128x8xf32> to vector<8x8xf32>
    %57 = vector.extract_strided_slice %29 {offsets = [72, 0], sizes = [8, 8], strides = [1, 1]} : vector<128x8xf32> to vector<8x8xf32>
    %58 = arith.maximumf %56, %57 : vector<8x8xf32>
    %c5 = arith.constant 5 : index
    %c1_62 = arith.constant 1 : index
    %c0_63 = arith.constant 0 : index
    %59 = vector.load %arg15[%c5, %c1_62, %c0_63] : memref<10x10x8xf32, #tpu.memory_space<vmem>>, vector<1x8x8xf32>
    %60 = vector.shape_cast %59 : vector<1x8x8xf32> to vector<8x8xf32>
    %61 = vector.shape_cast %58 : vector<8x8xf32> to vector<1x8x8xf32>
    tpu.vector_store %arg15[%c5, %c1_62, %c0_63], %61 {strides = array<i32>} : memref<10x10x8xf32, #tpu.memory_space<vmem>>, vector<1x8x8xf32>,
    %62 = vector.extract_strided_slice %29 {offsets = [80, 0], sizes = [8, 8], strides = [1, 1]} : vector<128x8xf32> to vector<8x8xf32>
    %63 = vector.extract_strided_slice %29 {offsets = [88, 0], sizes = [8, 8], strides = [1, 1]} : vector<128x8xf32> to vector<8x8xf32>
    %64 = arith.maximumf %62, %63 : vector<8x8xf32>
    %c6 = arith.constant 6 : index
    %c1_64 = arith.constant 1 : index
    %c0_65 = arith.constant 0 : index
    %65 = vector.load %arg15[%c6, %c1_64, %c0_65] : memref<10x10x8xf32, #tpu.memory_space<vmem>>, vector<1x8x8xf32>
    %66 = vector.shape_cast %65 : vector<1x8x8xf32> to vector<8x8xf32>
    %67 = vector.shape_cast %64 : vector<8x8xf32> to vector<1x8x8xf32>
    tpu.vector_store %arg15[%c6, %c1_64, %c0_65], %67 {strides = array<i32>} : memref<10x10x8xf32, #tpu.memory_space<vmem>>, vector<1x8x8xf32>,
    %68 = vector.extract_strided_slice %29 {offsets = [96, 0], sizes = [8, 8], strides = [1, 1]} : vector<128x8xf32> to vector<8x8xf32>
    %69 = vector.extract_strided_slice %29 {offsets = [104, 0], sizes = [8, 8], strides = [1, 1]} : vector<128x8xf32> to vector<8x8xf32>
    %70 = arith.maximumf %68, %69 : vector<8x8xf32>
    %c7 = arith.constant 7 : index
    %c1_66 = arith.constant 1 : index
    %c0_67 = arith.constant 0 : index
    %71 = vector.load %arg15[%c7, %c1_66, %c0_67] : memref<10x10x8xf32, #tpu.memory_space<vmem>>, vector<1x8x8xf32>
    %72 = vector.shape_cast %71 : vector<1x8x8xf32> to vector<8x8xf32>
    %73 = vector.shape_cast %70 : vector<8x8xf32> to vector<1x8x8xf32>
    tpu.vector_store %arg15[%c7, %c1_66, %c0_67], %73 {strides = array<i32>} : memref<10x10x8xf32, #tpu.memory_space<vmem>>, vector<1x8x8xf32>,
    %74 = vector.extract_strided_slice %29 {offsets = [112, 0], sizes = [8, 8], strides = [1, 1]} : vector<128x8xf32> to vector<8x8xf32>
    %75 = vector.extract_strided_slice %29 {offsets = [120, 0], sizes = [8, 8], strides = [1, 1]} : vector<128x8xf32> to vector<8x8xf32>
    %76 = arith.maximumf %74, %75 : vector<8x8xf32>
    %c8 = arith.constant 8 : index
    %c1_68 = arith.constant 1 : index
    %c0_69 = arith.constant 0 : index
    %77 = vector.load %arg15[%c8, %c1_68, %c0_69] : memref<10x10x8xf32, #tpu.memory_space<vmem>>, vector<1x8x8xf32>
    %78 = vector.shape_cast %77 : vector<1x8x8xf32> to vector<8x8xf32>
    %79 = vector.shape_cast %76 : vector<8x8xf32> to vector<1x8x8xf32>
    tpu.vector_store %arg15[%c8, %c1_68, %c0_69], %79 {strides = array<i32>} : memref<10x10x8xf32, #tpu.memory_space<vmem>>, vector<1x8x8xf32>,
    %c0_70 = arith.constant 0 : index
    %c0_71 = arith.constant 0 : index
    %c0_72 = arith.constant 0 : index
    %80 = vector.load %arg15[%c0_70, %c0_71, %c0_72] : memref<10x10x8xf32, #tpu.memory_space<vmem>>, vector<8x8x8xf32>
    %c0_73 = arith.constant 0 : index
    %c1_74 = arith.constant 1 : index
    %c0_75 = arith.constant 0 : index
    %81 = vector.load %arg15[%c0_73, %c1_74, %c0_75] : memref<10x10x8xf32, #tpu.memory_space<vmem>>, vector<8x8x8xf32>
    %c0_76 = arith.constant 0 : index
    %c2_77 = arith.constant 2 : index
    %c0_78 = arith.constant 0 : index
    %82 = vector.load %arg15[%c0_76, %c2_77, %c0_78] : memref<10x10x8xf32, #tpu.memory_space<vmem>>, vector<8x8x8xf32>
    %c1_79 = arith.constant 1 : index
    %c0_80 = arith.constant 0 : index
    %c0_81 = arith.constant 0 : index
    %83 = vector.load %arg15[%c1_79, %c0_80, %c0_81] : memref<10x10x8xf32, #tpu.memory_space<vmem>>, vector<8x8x8xf32>
    %c1_82 = arith.constant 1 : index
    %c1_83 = arith.constant 1 : index
    %c0_84 = arith.constant 0 : index
    %84 = vector.load %arg15[%c1_82, %c1_83, %c0_84] : memref<10x10x8xf32, #tpu.memory_space<vmem>>, vector<8x8x8xf32>
    %c1_85 = arith.constant 1 : index
    %c2_86 = arith.constant 2 : index
    %c0_87 = arith.constant 0 : index
    %85 = vector.load %arg15[%c1_85, %c2_86, %c0_87] : memref<10x10x8xf32, #tpu.memory_space<vmem>>, vector<8x8x8xf32>
    %c2_88 = arith.constant 2 : index
    %c0_89 = arith.constant 0 : index
    %c0_90 = arith.constant 0 : index
    %86 = vector.load %arg15[%c2_88, %c0_89, %c0_90] : memref<10x10x8xf32, #tpu.memory_space<vmem>>, vector<8x8x8xf32>
    %c2_91 = arith.constant 2 : index
    %c1_92 = arith.constant 1 : index
    %c0_93 = arith.constant 0 : index
    %87 = vector.load %arg15[%c2_91, %c1_92, %c0_93] : memref<10x10x8xf32, #tpu.memory_space<vmem>>, vector<8x8x8xf32>
    %c2_94 = arith.constant 2 : index
    %c2_95 = arith.constant 2 : index
    %c0_96 = arith.constant 0 : index
    %88 = vector.load %arg15[%c2_94, %c2_95, %c0_96] : memref<10x10x8xf32, #tpu.memory_space<vmem>>, vector<8x8x8xf32>
    %89 = tpu.concatenate %80, %81, %82, %83, %84, %85, %86, %87, %88 in 2 : vector<8x8x8xf32>, vector<8x8x8xf32>, vector<8x8x8xf32>, vector<8x8x8xf32>, vector<8x8x8xf32>, vector<8x8x8xf32>, vector<8x8x8xf32>, vector<8x8x8xf32>, vector<8x8x8xf32> -> vector<8x8x72xf32>
    %90 = vector.shape_cast %89 : vector<8x8x72xf32> to vector<64x72xf32>
    %c0_97 = arith.constant 0 : index
    %c0_98 = arith.constant 0 : index
    %91 = vector.load %arg5[%c0_97, %c0_98] : memref<72x16xf32, #tpu.memory_space<vmem>>, vector<72x16xf32>
    %cst_99 = arith.constant dense<0.000000e+00> : vector<64x16xf32>
    %92 = tpu.matmul %90, %91, %cst_99 {dimension_numbers = #tpu.dot_dimension_numbers<[1], [0], [0], [1], [0, 0, 1, 1], [], []>} : vector<64x72xf32>, vector<72x16xf32>, vector<64x16xf32> -> vector<64x16xf32>
    %c0_100 = arith.constant 0 : index
    %c0_101 = arith.constant 0 : index
    %93 = vector.load %arg6[%c0_100, %c0_101] : memref<1x16xf32, #tpu.memory_space<vmem>>, vector<1x16xf32>
    %94 = vector.broadcast %93 : vector<1x16xf32> to vector<64x16xf32>
    %95 = arith.mulf %92, %94 : vector<64x16xf32>
    %c0_102 = arith.constant 0 : index
    %c0_103 = arith.constant 0 : index
    %96 = vector.load %arg7[%c0_102, %c0_103] : memref<1x16xf32, #tpu.memory_space<vmem>>, vector<1x16xf32>
    %97 = vector.broadcast %96 : vector<1x16xf32> to vector<64x16xf32>
    %98 = arith.addf %95, %97 : vector<64x16xf32>
    %cst_104 = arith.constant 0.000000e+00 : f32
    %99 = vector.broadcast %cst_104 : f32 to vector<64x16xf32>
    %100 = arith.maximumf %98, %99 : vector<64x16xf32>
    %c0_105 = arith.constant 0 : index
    %c0_106 = arith.constant 0 : index
    %101 = vector.load %arg16[%c0_105, %c0_106] : memref<64x16xf32, #tpu.memory_space<vmem>>, vector<64x16xf32>
    tpu.vector_store %arg16[%c0_105, %c0_106], %100 {strides = array<i32>} : memref<64x16xf32, #tpu.memory_space<vmem>>, vector<64x16xf32>,
    %c0_107 = arith.constant 0 : index
    %c0_108 = arith.constant 0 : index
    %102 = tpu.strided_load %arg16[%c0_107, %c0_108] {strides = array<i32: 2, 1>} : memref<64x16xf32, #tpu.memory_space<vmem>>, vector<32x16xf32>
    %c1_109 = arith.constant 1 : index
    %c0_110 = arith.constant 0 : index
    %103 = tpu.strided_load %arg16[%c1_109, %c0_110] {strides = array<i32: 2, 1>} : memref<64x16xf32, #tpu.memory_space<vmem>>, vector<32x16xf32>
    %104 = arith.maximumf %102, %103 : vector<32x16xf32>
    %105 = vector.extract_strided_slice %104 {offsets = [0, 0], sizes = [4, 16], strides = [1, 1]} : vector<32x16xf32> to vector<4x16xf32>
    %106 = vector.extract_strided_slice %104 {offsets = [4, 0], sizes = [4, 16], strides = [1, 1]} : vector<32x16xf32> to vector<4x16xf32>
    %107 = arith.maximumf %105, %106 : vector<4x16xf32>
    %c0_111 = arith.constant 0 : index
    %c0_112 = arith.constant 0 : index
    %108 = vector.load %arg17[%c0_111, %c0_112] : memref<16x16xf32, #tpu.memory_space<vmem>>, vector<4x16xf32>
    tpu.vector_store %arg17[%c0_111, %c0_112], %107 {strides = array<i32>} : memref<16x16xf32, #tpu.memory_space<vmem>>, vector<4x16xf32>,
    %109 = vector.extract_strided_slice %104 {offsets = [8, 0], sizes = [4, 16], strides = [1, 1]} : vector<32x16xf32> to vector<4x16xf32>
    %110 = vector.extract_strided_slice %104 {offsets = [12, 0], sizes = [4, 16], strides = [1, 1]} : vector<32x16xf32> to vector<4x16xf32>
    %111 = arith.maximumf %109, %110 : vector<4x16xf32>
    %c4_113 = arith.constant 4 : index
    %c0_114 = arith.constant 0 : index
    %112 = vector.load %arg17[%c4_113, %c0_114] : memref<16x16xf32, #tpu.memory_space<vmem>>, vector<4x16xf32>
    tpu.vector_store %arg17[%c4_113, %c0_114], %111 {strides = array<i32>} : memref<16x16xf32, #tpu.memory_space<vmem>>, vector<4x16xf32>,
    %113 = vector.extract_strided_slice %104 {offsets = [16, 0], sizes = [4, 16], strides = [1, 1]} : vector<32x16xf32> to vector<4x16xf32>
    %114 = vector.extract_strided_slice %104 {offsets = [20, 0], sizes = [4, 16], strides = [1, 1]} : vector<32x16xf32> to vector<4x16xf32>
    %115 = arith.maximumf %113, %114 : vector<4x16xf32>
    %c8_115 = arith.constant 8 : index
    %c0_116 = arith.constant 0 : index
    %116 = vector.load %arg17[%c8_115, %c0_116] : memref<16x16xf32, #tpu.memory_space<vmem>>, vector<4x16xf32>
    tpu.vector_store %arg17[%c8_115, %c0_116], %115 {strides = array<i32>} : memref<16x16xf32, #tpu.memory_space<vmem>>, vector<4x16xf32>,
    %117 = vector.extract_strided_slice %104 {offsets = [24, 0], sizes = [4, 16], strides = [1, 1]} : vector<32x16xf32> to vector<4x16xf32>
    %118 = vector.extract_strided_slice %104 {offsets = [28, 0], sizes = [4, 16], strides = [1, 1]} : vector<32x16xf32> to vector<4x16xf32>
    %119 = arith.maximumf %117, %118 : vector<4x16xf32>
    %c12 = arith.constant 12 : index
    %c0_117 = arith.constant 0 : index
    %120 = vector.load %arg17[%c12, %c0_117] : memref<16x16xf32, #tpu.memory_space<vmem>>, vector<4x16xf32>
    tpu.vector_store %arg17[%c12, %c0_117], %119 {strides = array<i32>} : memref<16x16xf32, #tpu.memory_space<vmem>>, vector<4x16xf32>,
    %c0_118 = arith.constant 0 : index
    %c0_119 = arith.constant 0 : index
    %121 = vector.load %arg17[%c0_118, %c0_119] : memref<16x16xf32, #tpu.memory_space<vmem>>, vector<16x16xf32>
    %c0_120 = arith.constant 0 : index
    %c0_121 = arith.constant 0 : index
    %122 = vector.load %arg8[%c0_120, %c0_121] : memref<16x32xf32, #tpu.memory_space<vmem>>, vector<16x32xf32>
    %cst_122 = arith.constant dense<0.000000e+00> : vector<16x32xf32>
    %123 = tpu.matmul %121, %122, %cst_122 {dimension_numbers = #tpu.dot_dimension_numbers<[1], [0], [0], [1], [0, 0, 1, 1], [], []>} : vector<16x16xf32>, vector<16x32xf32>, vector<16x32xf32> -> vector<16x32xf32>
    %c0_123 = arith.constant 0 : index
    %c0_124 = arith.constant 0 : index
    %124 = vector.load %arg9[%c0_123, %c0_124] : memref<1x32xf32, #tpu.memory_space<vmem>>, vector<1x32xf32>
    %125 = vector.broadcast %124 : vector<1x32xf32> to vector<16x32xf32>
    %126 = arith.addf %123, %125 : vector<16x32xf32>
    %cst_125 = arith.constant 0.000000e+00 : f32
    %127 = vector.broadcast %cst_125 : f32 to vector<36x32xf32>
    %c0_126 = arith.constant 0 : index
    %c0_127 = arith.constant 0 : index
    %128 = vector.load %arg9[%c0_126, %c0_127] : memref<1x32xf32, #tpu.memory_space<vmem>>, vector<1x32xf32>
    %129 = vector.broadcast %128 : vector<1x32xf32> to vector<36x32xf32>
    %130 = arith.addf %127, %129 : vector<36x32xf32>
    %c0_128 = arith.constant 0 : index
    %c0_129 = arith.constant 0 : index
    %131 = vector.load %arg18[%c0_128, %c0_129] : memref<36x32xf32, #tpu.memory_space<vmem>>, vector<36x32xf32>
    tpu.vector_store %arg18[%c0_128, %c0_129], %130 {strides = array<i32>} : memref<36x32xf32, #tpu.memory_space<vmem>>, vector<36x32xf32>,
    %132 = vector.extract_strided_slice %126 {offsets = [0, 0], sizes = [4, 32], strides = [1, 1]} : vector<16x32xf32> to vector<4x32xf32>
    %c7_130 = arith.constant 7 : index
    %c0_131 = arith.constant 0 : index
    %133 = vector.load %arg18[%c7_130, %c0_131] : memref<36x32xf32, #tpu.memory_space<vmem>>, vector<4x32xf32>
    tpu.vector_store %arg18[%c7_130, %c0_131], %132 {strides = array<i32>} : memref<36x32xf32, #tpu.memory_space<vmem>>, vector<4x32xf32>,
    %134 = vector.extract_strided_slice %126 {offsets = [4, 0], sizes = [4, 32], strides = [1, 1]} : vector<16x32xf32> to vector<4x32xf32>
    %c13 = arith.constant 13 : index
    %c0_132 = arith.constant 0 : index
    %135 = vector.load %arg18[%c13, %c0_132] : memref<36x32xf32, #tpu.memory_space<vmem>>, vector<4x32xf32>
    tpu.vector_store %arg18[%c13, %c0_132], %134 {strides = array<i32>} : memref<36x32xf32, #tpu.memory_space<vmem>>, vector<4x32xf32>,
    %136 = vector.extract_strided_slice %126 {offsets = [8, 0], sizes = [4, 32], strides = [1, 1]} : vector<16x32xf32> to vector<4x32xf32>
    %c19 = arith.constant 19 : index
    %c0_133 = arith.constant 0 : index
    %137 = vector.load %arg18[%c19, %c0_133] : memref<36x32xf32, #tpu.memory_space<vmem>>, vector<4x32xf32>
    tpu.vector_store %arg18[%c19, %c0_133], %136 {strides = array<i32>} : memref<36x32xf32, #tpu.memory_space<vmem>>, vector<4x32xf32>,
    %138 = vector.extract_strided_slice %126 {offsets = [12, 0], sizes = [4, 32], strides = [1, 1]} : vector<16x32xf32> to vector<4x32xf32>
    %c25 = arith.constant 25 : index
    %c0_134 = arith.constant 0 : index
    %139 = vector.load %arg18[%c25, %c0_134] : memref<36x32xf32, #tpu.memory_space<vmem>>, vector<4x32xf32>
    tpu.vector_store %arg18[%c25, %c0_134], %138 {strides = array<i32>} : memref<36x32xf32, #tpu.memory_space<vmem>>, vector<4x32xf32>,
    %c0_135 = arith.constant 0 : index
    %c0_136 = arith.constant 0 : index
    %140 = vector.load %arg18[%c0_135, %c0_136] : memref<36x32xf32, #tpu.memory_space<vmem>>, vector<36x32xf32>
    %c0_137 = arith.constant 0 : index
    %c0_138 = arith.constant 0 : index
    %c0_139 = arith.constant 0 : index
    %141 = vector.load %arg10[%c0_137, %c0_138, %c0_139] : memref<8x36x32xf32, #tpu.memory_space<vmem>>, vector<1x36x32xf32>
    %142 = vector.shape_cast %141 : vector<1x36x32xf32> to vector<36x32xf32>
    %143 = arith.mulf %140, %142 : vector<36x32xf32>
    %cst_140 = arith.constant dense<0.000000e+00> : vector<36xf32>
    %144 = vector.multi_reduction <add>, %143, %cst_140 [1] : vector<36x32xf32> to vector<36xf32>
    %145 = vector.shape_cast %144 : vector<36xf32> to vector<36x1xf32>
    %c1_141 = arith.constant 1 : index
    %c0_142 = arith.constant 0 : index
    %c0_143 = arith.constant 0 : index
    %146 = vector.load %arg10[%c1_141, %c0_142, %c0_143] : memref<8x36x32xf32, #tpu.memory_space<vmem>>, vector<1x36x32xf32>
    %147 = vector.shape_cast %146 : vector<1x36x32xf32> to vector<36x32xf32>
    %148 = arith.mulf %140, %147 : vector<36x32xf32>
    %cst_144 = arith.constant dense<0.000000e+00> : vector<36xf32>
    %149 = vector.multi_reduction <add>, %148, %cst_144 [1] : vector<36x32xf32> to vector<36xf32>
    %150 = vector.shape_cast %149 : vector<36xf32> to vector<36x1xf32>
    %c2_145 = arith.constant 2 : index
    %c0_146 = arith.constant 0 : index
    %c0_147 = arith.constant 0 : index
    %151 = vector.load %arg10[%c2_145, %c0_146, %c0_147] : memref<8x36x32xf32, #tpu.memory_space<vmem>>, vector<1x36x32xf32>
    %152 = vector.shape_cast %151 : vector<1x36x32xf32> to vector<36x32xf32>
    %153 = arith.mulf %140, %152 : vector<36x32xf32>
    %cst_148 = arith.constant dense<0.000000e+00> : vector<36xf32>
    %154 = vector.multi_reduction <add>, %153, %cst_148 [1] : vector<36x32xf32> to vector<36xf32>
    %155 = vector.shape_cast %154 : vector<36xf32> to vector<36x1xf32>
    %c3_149 = arith.constant 3 : index
    %c0_150 = arith.constant 0 : index
    %c0_151 = arith.constant 0 : index
    %156 = vector.load %arg10[%c3_149, %c0_150, %c0_151] : memref<8x36x32xf32, #tpu.memory_space<vmem>>, vector<1x36x32xf32>
    %157 = vector.shape_cast %156 : vector<1x36x32xf32> to vector<36x32xf32>
    %158 = arith.mulf %140, %157 : vector<36x32xf32>
    %cst_152 = arith.constant dense<0.000000e+00> : vector<36xf32>
    %159 = vector.multi_reduction <add>, %158, %cst_152 [1] : vector<36x32xf32> to vector<36xf32>
    %160 = vector.shape_cast %159 : vector<36xf32> to vector<36x1xf32>
    %c4_153 = arith.constant 4 : index
    %c0_154 = arith.constant 0 : index
    %c0_155 = arith.constant 0 : index
    %161 = vector.load %arg10[%c4_153, %c0_154, %c0_155] : memref<8x36x32xf32, #tpu.memory_space<vmem>>, vector<1x36x32xf32>
    %162 = vector.shape_cast %161 : vector<1x36x32xf32> to vector<36x32xf32>
    %163 = arith.mulf %140, %162 : vector<36x32xf32>
    %cst_156 = arith.constant dense<0.000000e+00> : vector<36xf32>
    %164 = vector.multi_reduction <add>, %163, %cst_156 [1] : vector<36x32xf32> to vector<36xf32>
    %165 = vector.shape_cast %164 : vector<36xf32> to vector<36x1xf32>
    %c5_157 = arith.constant 5 : index
    %c0_158 = arith.constant 0 : index
    %c0_159 = arith.constant 0 : index
    %166 = vector.load %arg10[%c5_157, %c0_158, %c0_159] : memref<8x36x32xf32, #tpu.memory_space<vmem>>, vector<1x36x32xf32>
    %167 = vector.shape_cast %166 : vector<1x36x32xf32> to vector<36x32xf32>
    %168 = arith.mulf %140, %167 : vector<36x32xf32>
    %cst_160 = arith.constant dense<0.000000e+00> : vector<36xf32>
    %169 = vector.multi_reduction <add>, %168, %cst_160 [1] : vector<36x32xf32> to vector<36xf32>
    %170 = vector.shape_cast %169 : vector<36xf32> to vector<36x1xf32>
    %c6_161 = arith.constant 6 : index
    %c0_162 = arith.constant 0 : index
    %c0_163 = arith.constant 0 : index
    %171 = vector.load %arg10[%c6_161, %c0_162, %c0_163] : memref<8x36x32xf32, #tpu.memory_space<vmem>>, vector<1x36x32xf32>
    %172 = vector.shape_cast %171 : vector<1x36x32xf32> to vector<36x32xf32>
    %173 = arith.mulf %140, %172 : vector<36x32xf32>
    %cst_164 = arith.constant dense<0.000000e+00> : vector<36xf32>
    %174 = vector.multi_reduction <add>, %173, %cst_164 [1] : vector<36x32xf32> to vector<36xf32>
    %175 = vector.shape_cast %174 : vector<36xf32> to vector<36x1xf32>
    %c7_165 = arith.constant 7 : index
    %c0_166 = arith.constant 0 : index
    %c0_167 = arith.constant 0 : index
    %176 = vector.load %arg10[%c7_165, %c0_166, %c0_167] : memref<8x36x32xf32, #tpu.memory_space<vmem>>, vector<1x36x32xf32>
    %177 = vector.shape_cast %176 : vector<1x36x32xf32> to vector<36x32xf32>
    %178 = arith.mulf %140, %177 : vector<36x32xf32>
    %cst_168 = arith.constant dense<0.000000e+00> : vector<36xf32>
    %179 = vector.multi_reduction <add>, %178, %cst_168 [1] : vector<36x32xf32> to vector<36xf32>
    %180 = vector.shape_cast %179 : vector<36xf32> to vector<36x1xf32>
    %181 = tpu.concatenate %145, %150, %155, %160, %165, %170, %175, %180 in 1 : vector<36x1xf32>, vector<36x1xf32>, vector<36x1xf32>, vector<36x1xf32>, vector<36x1xf32>, vector<36x1xf32>, vector<36x1xf32>, vector<36x1xf32> -> vector<36x8xf32>
    %cst_169 = arith.constant dense<0.000000e+00> : vector<8xf32>
    %182 = vector.multi_reduction <add>, %181, %cst_169 [0] : vector<36x8xf32> to vector<8xf32>
    %183 = vector.shape_cast %182 : vector<8xf32> to vector<1x8xf32>
    %c0_170 = arith.constant 0 : index
    %c0_171 = arith.constant 0 : index
    %184 = vector.load %arg11[%c0_170, %c0_171] : memref<1x8xf32, #tpu.memory_space<vmem>>, vector<1x8xf32>
    %185 = arith.addf %183, %184 : vector<1x8xf32>
    %c0_172 = arith.constant 0 : index
    %c0_173 = arith.constant 0 : index
    %c0_174 = arith.constant 0 : index
    %186 = vector.load %arg12[%c0_172, %c0_173, %c0_174] : memref<1x1x8xf32, #tpu.memory_space<vmem>>, vector<1x1x8xf32>
    %187 = vector.shape_cast %186 : vector<1x1x8xf32> to vector<1x8xf32>
    %188 = vector.shape_cast %185 : vector<1x8xf32> to vector<1x1x8xf32>
    tpu.vector_store %arg12[%c0_172, %c0_173, %c0_174], %188 {strides = array<i32>} : memref<1x1x8xf32, #tpu.memory_space<vmem>>, vector<1x1x8xf32>,
    return
  }
  func.func @transform_0(%arg0: i32) -> (i32, i32, i32, i32) {
    %c0_i32 = arith.constant 0 : i32
    %c0_i32_0 = arith.constant 0 : i32
    %c0_i32_1 = arith.constant 0 : i32
    %c0_i32_2 = arith.constant 0 : i32
    return %arg0, %c0_i32, %c0_i32_0, %c0_i32_1 : i32, i32, i32, i32
  }
  func.func @transform_1(%arg0: i32) -> (i32, i32) {
    %c0_i32 = arith.constant 0 : i32
    %c0_i32_0 = arith.constant 0 : i32
    %c0_i32_1 = arith.constant 0 : i32
    return %c0_i32, %c0_i32_0 : i32, i32
  }
  func.func @transform_2(%arg0: i32) -> (i32, i32) {
    %c0_i32 = arith.constant 0 : i32
    %c0_i32_0 = arith.constant 0 : i32
    %c0_i32_1 = arith.constant 0 : i32
    return %c0_i32, %c0_i32_0 : i32, i32
  }
  func.func @transform_3(%arg0: i32) -> (i32, i32) {
    %c0_i32 = arith.constant 0 : i32
    %c0_i32_0 = arith.constant 0 : i32
    %c0_i32_1 = arith.constant 0 : i32
    return %c0_i32, %c0_i32_0 : i32, i32
  }
  func.func @transform_4(%arg0: i32) -> (i32, i32) {
    %c0_i32 = arith.constant 0 : i32
    %c0_i32_0 = arith.constant 0 : i32
    %c0_i32_1 = arith.constant 0 : i32
    return %c0_i32, %c0_i32_0 : i32, i32
  }
  func.func @transform_5(%arg0: i32) -> (i32, i32) {
    %c0_i32 = arith.constant 0 : i32
    %c0_i32_0 = arith.constant 0 : i32
    %c0_i32_1 = arith.constant 0 : i32
    return %c0_i32, %c0_i32_0 : i32, i32
  }
  func.func @transform_6(%arg0: i32) -> (i32, i32) {
    %c0_i32 = arith.constant 0 : i32
    %c0_i32_0 = arith.constant 0 : i32
    %c0_i32_1 = arith.constant 0 : i32
    return %c0_i32, %c0_i32_0 : i32, i32
  }
  func.func @transform_7(%arg0: i32) -> (i32, i32) {
    %c0_i32 = arith.constant 0 : i32
    %c0_i32_0 = arith.constant 0 : i32
    %c0_i32_1 = arith.constant 0 : i32
    return %c0_i32, %c0_i32_0 : i32, i32
  }
  func.func @transform_8(%arg0: i32) -> (i32, i32) {
    %c0_i32 = arith.constant 0 : i32
    %c0_i32_0 = arith.constant 0 : i32
    %c0_i32_1 = arith.constant 0 : i32
    return %c0_i32, %c0_i32_0 : i32, i32
  }
  func.func @transform_9(%arg0: i32) -> (i32, i32, i32) {
    %c0_i32 = arith.constant 0 : i32
    %c0_i32_0 = arith.constant 0 : i32
    %c0_i32_1 = arith.constant 0 : i32
    %c0_i32_2 = arith.constant 0 : i32
    return %c0_i32, %c0_i32_0, %c0_i32_1 : i32, i32, i32
  }
  func.func @transform_10(%arg0: i32) -> (i32, i32) {
    %c0_i32 = arith.constant 0 : i32
    %c0_i32_0 = arith.constant 0 : i32
    %c0_i32_1 = arith.constant 0 : i32
    return %c0_i32, %c0_i32_0 : i32, i32
  }
  func.func @transform_11(%arg0: i32) -> (i32, i32, i32) {
    %c0_i32 = arith.constant 0 : i32
    %c0_i32_0 = arith.constant 0 : i32
    %c0_i32_1 = arith.constant 0 : i32
    return %arg0, %c0_i32, %c0_i32_0 : i32, i32, i32
  }
}

</mosaic_0001>

<bundles_post_ra>
// kernel: forward.1
= control target key start
LH: loop header
LB: loop body
LE: loop exit
PB: predicated region body
PF: predicated region fallthrough
CT: control target
= control target key end

     0   :  { %s6315_s0 = inlined_call_operand.vmem [shape: f32[2,16,16,4], index: 0, kind: input, shape index: {}]   ;;  %s6316_s1 = inlined_call_operand.vmem [shape: f32[36,8], index: 1, kind: input, shape index: {}]   ;;  %s6317_s2 = inlined_call_operand.vmem [shape: f32[1,8], index: 2, kind: input, shape index: {}]   ;;  %s6318_s3 = inlined_call_operand.vmem [shape: f32[1,8], index: 3, kind: input, shape index: {}]   ;;  %s6319_s4 = inlined_call_operand.vmem [shape: f32[72,16], index: 4, kind: input, shape index: {}]   ;;  %s6320_s5 = inlined_call_operand.vmem [shape: f32[1,16], index: 5, kind: input, shape index: {}]   ;;  %s6321_s6 = inlined_call_operand.vmem [shape: f32[1,16], index: 6, kind: input, shape index: {}]   ;;  %s6322_s7 = inlined_call_operand.vmem [shape: f32[16,32], index: 7, kind: input, shape index: {}]   ;;  %s6323_s8 = inlined_call_operand.vmem [shape: f32[1,32], index: 8, kind: input, shape index: {}]   ;;  %s6324_s9 = inlined_call_operand.vmem [shape: f32[8,36,32], index: 9, kind: input, shape index: {}]   ;;  %s6325_s10 = inlined_call_operand.vmem [shape: f32[1,8], index: 10, kind: input, shape index: {}]   ;;  %s6326_s11 = inlined_call_operand.hbm [shape: f32[2,1,8], index: 11, kind: output, shape index: {}]  }
   0x1   :  { %6351 = sst [smem:[#allocation11_spill]] %s6315_s0 }
   0x2   :  { %16 = vsyncpa [#allocation9], 0 }
   0x3   :  { %18 = vsyncpa [#allocation9 + $0x1], 0  ;;  %s4224_s17 = smov 0   ;;  %s4226_s18 = smov 0  }
   0x4   :  { %s4228_s19 = smov 0   ;;  %s4230_s20 = smov 0  }
   0x5 LB: > { %s4245_s21 = sadd.s32 4294967295, %s4148_s20   ;;  %s3744_s22 = sadd.s32 4294967294, %s4148_s20   ;;  %s4148_s20 = sphi %s4230_s20, %s6370_s20   ;;  %s4144_s19 = sphi %s4228_s19, %s6369_s19   ;;  %s4140_s18 = sphi %s4226_s18, %s6368_s18   ;;  %s4136_s17 = sphi %s4224_s17, %s6367_s17  }
   0x6   : > { %s4249_s23 = sadd.s32 1, %s4148_s20   ;;  %s267_s24 = sadd.s32 1, %s4144_s19 }
   0x7   : > { %s264_s25 = ssub.s32 %s4148_s20, %s4249_s23  ;;  %p277_p0 = scmp.ne.s32.totalorder %s4144_s19, %s4140_s18 }
   0x8   : > { %p265_p1 = scmp.eq.s32.totalorder %s264_s25, 0  ;;  %p278_p2 = scmp.eq.s32.totalorder %s4245_s21, 1 }
   0x9   : > { %p283_p3 = scmp.ne.s32.totalorder %s4140_s18, %s4136_s17  ;;  %p284_p4 = scmp.eq.s32.totalorder %s3744_s22, 1 }
   0xa   : > { %s4260_s26 = scalar_select %p265_p1, %s4144_s19, %s267_s24  }
   0xb   : > { %p4262_p5 = por %p278_p2, %p277_p0  ;;  %p4266_p6 = por %p284_p4, %p283_p3 }
   0xc   : > { %p3747_p7 = scmp.ge.s32.totalorder %s4148_s20, 1  ;;  %p340_p8 = scmp.lt.s32.totalorder %s4148_s20, 3 }
   0xe   : > { %p341_p9 = pnand %p3747_p7, %p340_p8 }
   0xf   : > { %vm384_vm0 = vcmask (!%p341_p9), 31744   ;;  %vm387_vm1 = vcmask (!%p341_p9), 25600   ;;  %vm1850_vm2 = vcmask (!%p341_p9), 64512   ;;  %v4150_v0 = vmov (!%p341_p9), 0.0   ;;  %p379_p10 = scmp.lt.s32.totalorder (!%p341_p9), %s4245_s21, 1  ;;  %s6354_s0 = sld [smem:[#allocation11_spill]] (!%p341_p9) }
  0x10   : > { %344 = sbr.rel (%p341_p9) target bundleno = 1782 (0x6f6), region = 64  ;;  %385 = vst.msk [vmem:[#allocation2] sm:$0xff] (!%p341_p9), %vm384_vm0, %v4150_v0  ;;  %386 = vst.msk [vmem:[#allocation2 + $0x8] sm:$0xff] (!%p341_p9), %vm384_vm0, %v4150_v0  ;;  %s6329_s15 = smov (!%p341_p9), 8   ;;  %v2081_v23 = vld [vmem:[%s6316_s1] sm:$0xff] (!%p341_p9)  ;;  %v2082_v24 = vld [vmem:[%s6316_s1 + $0x8] sm:$0xff] (!%p341_p9) }
  0x11   : > { %389 = vst.msk [vmem:[#allocation2 + $0x18] sm:$0xff] (!%p341_p9), %vm384_vm0, %v4150_v0  ;;  %390 = vst.msk [vmem:[#allocation2 + $0x20] sm:$0xff] (!%p341_p9), %vm384_vm0, %v4150_v0  ;;  %s6333_s16 = smov (!%p341_p9), 4   ;;  %s6337_s22 = smov (!%p341_p9), 12   ;;  %v3990_v25 = vpack.c.bf16 (!%p341_p9), %v2082_v24, %v2081_v23  ;;  %v2083_v27 = vld [vmem:[%s6316_s1 + $0x10] sm:$0xff] (!%p341_p9)  ;;  %v2084_v28 = vld [vmem:[%s6316_s1 + $0x18] sm:$0xff] (!%p341_p9) }
  0x12   : > { %392 = vst.msk [vmem:[#allocation2 + $0x30] sm:$0xff] (!%p341_p9), %vm384_vm0, %v4150_v0  ;;  %393 = vst.msk [vmem:[#allocation2 + $0x38] sm:$0xff] (!%p341_p9), %vm384_vm0, %v4150_v0  ;;  %s6327_s24 = smov (!%p341_p9), 16   ;;  %s6331_s25 = smov (!%p341_p9), 20   ;;  %v3994_v31 = vpack.c.bf16 (!%p341_p9), %v2084_v28, %v2083_v27  ;;  %v2085_v32 = vld [vmem:[%s6316_s1 + $0x20] sm:$0xf] (!%p341_p9) }
  0x13   : > { %395 = vst.msk [vmem:[#allocation2 + $0x48] sm:$0xff] (!%p341_p9), %vm384_vm0, %v4150_v0  ;;  %396 = vst.msk [vmem:[#allocation2 + $0x50] sm:$0xff] (!%p341_p9), %vm384_vm0, %v4150_v0  ;;  %3991 = vmatprep.subr.bf16.mxu0 (!%p341_p9), %v3990_v25  ;;  %4018 = vmatprep.subr.bf16.mxu1 (!%p341_p9), %v3990_v25  ;;  %vm2183_vm3 = vcmask (!%p341_p9), 1043456   ;;  %s6358_s12 = smov (!%p341_p9), 8   ;;  %vm1883_vm4 = vcmask (!%p341_p9), 97280   ;;  %vm1916_vm5 = vcmask (!%p341_p9), 130048  }
  0x14   : > { %398 = vst.msk [vmem:[#allocation2 + $0x60] sm:$0xff] (!%p341_p9), %vm384_vm0, %v4150_v0  ;;  %399 = vst.msk [vmem:[#allocation2 + $0x68] sm:$0xff] (!%p341_p9), %vm384_vm0, %v4150_v0  ;;  %3993 = vmatpush3.bf16.msra.mxu0 (!%p341_p9), %v3990_v25  ;;  %4021 = vmatpush3.bf16.msra.mxu1 (!%p341_p9), %v3990_v25  ;;  %vm1949_vm6 = vcmask (!%p341_p9), 162816   ;;  %vm1982_vm7 = vcmask (!%p341_p9), 195584   ;;  %vm2015_vm8 = vcmask (!%p341_p9), 228352   ;;  %vm2048_vm9 = vcmask (!%p341_p9), 261120  }
  0x15   : > { %401 = vst.msk [vmem:[#allocation2 + $0x78] sm:$0xff] (!%p341_p9), %vm384_vm0, %v4150_v0  ;;  %402 = vst.msk [vmem:[#allocation2 + $0x80] sm:$0xff] (!%p341_p9), %vm384_vm0, %v4150_v0  ;;  %3995 = vmatprep.subr.bf16.mxu0 (!%p341_p9), %v3994_v31  ;;  %4019 = vmatprep.subr.bf16.mxu1 (!%p341_p9), %v3994_v31  ;;  %vm2086_vm10 = vcmask (!%p341_p9), 293888   ;;  %vm2634_vm11 = vcmask (!%p341_p9), 58368   ;;  %s6345_s13 = smov (!%p341_p9), 64   ;;  %vm3038_vm12 = vcmask (!%p341_p9), 326656  }
  0x16   : > { %404 = vst.msk [vmem:[#allocation2 + $0x90] sm:$0xff] (!%p341_p9), %vm384_vm0, %v4150_v0  ;;  %405 = vst.msk [vmem:[#allocation2 + $0x98] sm:$0xff] (!%p341_p9), %vm384_vm0, %v4150_v0  ;;  %vm3047_vm13 = vcmask (!%p341_p9), 392192   ;;  %vm3056_vm14 = vcmask (!%p341_p9), 457728   ;;  %vm3065_vm15 = vcmask (!%p341_p9), 523264  }
  0x17   : > { %407 = vst.msk [vmem:[#allocation2 + $0xa8] sm:$0xff] %vm384_vm0, %v4150_v0  ;;  %408 = vst.msk [vmem:[#allocation2 + $0xb0] sm:$0xff] %vm384_vm0, %v4150_v0  ;;  %s380_s29 = scalar_select %p379_p10, %s4245_s21, 1  ;;  %v569_v4 = vld [vmem:[#allocation2 + $0x2] sm:$0xff] }
  0x18   : > { %410 = vst.msk [vmem:[#allocation2 + $0xc0] sm:$0xff] %vm384_vm0, %v4150_v0  ;;  %411 = vst.msk [vmem:[#allocation2 + $0xc8] sm:$0xff] %vm384_vm0, %v4150_v0  ;;  %v537_v5 = vld [vmem:[#allocation2 + $0x1] sm:$0xff]  ;;  %954 = vrot.lane.b32.xlu1 %v569_v4, %s6329_s15  ;;  %3997 = vmatpush3.bf16.msra.mxu0 %v3994_v31 }
  0x19   : > { %413 = vst.msk [vmem:[#allocation2 + $0xd8] sm:$0xff] %vm384_vm0, %v4150_v0  ;;  %414 = vst.msk [vmem:[#allocation2 + $0xe0] sm:$0xff] %vm384_vm0, %v4150_v0  ;;  %s3836_s30 = sshll.u32 %s380_s29, 8  ;;  %826 = vrot.lane.b32.xlu0 %v537_v5, %s6333_s16  ;;  %4022 = vmatpush3.bf16.msra.mxu1 %v3994_v31  ;;  %s6355_s29 = smov 16  }
  0x1a   : > { %416 = vst.msk [vmem:[#allocation2 + $0xf0] sm:$0xff] %vm384_vm0, %v4150_v0  ;;  %417 = vst.msk [vmem:[#allocation2 + $0xf8] sm:$0xff] %vm384_vm0, %v4150_v0  ;;  %s4405_s14 = scalar_lea.vmem %s6354_s0, %s3836_s30  ;;  %3903 = vmatprep.subr.msk.mxu0 %vm2183_vm3, %v2085_v32  ;;  %4020 = vmatprep.subr.msk.mxu1 %vm2183_vm3, %v2085_v32  ;;  %s6357_s30 = smov 20  }
  0x1b   : > { %419 = vst.msk [vmem:[#allocation2 + $0x108] sm:$0xff] %vm384_vm0, %v4150_v0  ;;  %420 = vst.msk [vmem:[#allocation2 + $0x110] sm:$0xff] %vm384_vm0, %v4150_v0  ;;  %v440_v1 = vld [vmem:[%s4405_s14] sm:$0xff]  ;;  %v441_v2 = vld [vmem:[%s4405_s14 + $0x8] sm:$0xff] }
  0x1c   : > { %422 = vst.msk [vmem:[#allocation2 + $0x120] sm:$0xff] %vm384_vm0, %v4150_v0  ;;  %423 = vst.msk [vmem:[#allocation2 + $0x128] sm:$0xff] %vm384_vm0, %v4150_v0  ;;  %v442_v3 = vld [vmem:[%s4405_s14 + $0x10] sm:$0xff]  ;;  %v443_v8 = vld [vmem:[%s4405_s14 + $0x18] sm:$0xff]  ;;  %3904 = vmatpush3.msk.msra.mxu0 %vm2183_vm3, %v2085_v32 }
  0x1d   : > { %425 = vst.msk [vmem:[#allocation2 + $0x138] sm:$0xff] %vm384_vm0, %v4150_v0  ;;  %426 = vst.msk [vmem:[#allocation2 + $0x140] sm:$0xff] %vm384_vm0, %v4150_v0  ;;  %v444_v9 = vld [vmem:[%s4405_s14 + $0x20] sm:$0xff]  ;;  %v445_v10 = vld [vmem:[%s4405_s14 + $0x28] sm:$0xff]  ;;  %4023 = vmatpush3.msk.msra.mxu1 %vm2183_vm3, %v2085_v32  ;;  %vm3282_vm3 = vcmask 125952  }
  0x1e   : > { %428 = vst.msk [vmem:[#allocation2 + $0x150] sm:$0xff] %vm384_vm0, %v4150_v0  ;;  %429 = vst.msk [vmem:[#allocation2 + $0x158] sm:$0xff] %vm384_vm0, %v4150_v0  ;;  %v446_v11 = vld [vmem:[%s4405_s14 + $0x30] sm:$0xff]  ;;  %v447_v12 = vld [vmem:[%s4405_s14 + $0x38] sm:$0xff] }
  0x1f   : > { %431 = vst.msk [vmem:[#allocation2 + $0x168] sm:$0xff] %vm384_vm0, %v4150_v0  ;;  %432 = vst.msk [vmem:[#allocation2 + $0x170] sm:$0xff] %vm384_vm0, %v4150_v0  ;;  %v448_v13 = vld [vmem:[%s4405_s14 + $0x40] sm:$0xff]  ;;  %v449_v14 = vld [vmem:[%s4405_s14 + $0x48] sm:$0xff] }
  0x20   : > { %434 = vst.msk [vmem:[#allocation2 + $0x180] sm:$0xff] %vm384_vm0, %v4150_v0  ;;  %435 = vst.msk [vmem:[#allocation2 + $0x188] sm:$0xff] %vm384_vm0, %v4150_v0  ;;  %v450_v20 = vld [vmem:[%s4405_s14 + $0x50] sm:$0xff]  ;;  %v451_v26 = vld [vmem:[%s4405_s14 + $0x58] sm:$0xff] }
  0x21   : > { %437 = vst.msk [vmem:[#allocation2 + $0x198] sm:$0xff] %vm384_vm0, %v4150_v0  ;;  %438 = vst.msk [vmem:[#allocation2 + $0x1a0] sm:$0xff] %vm384_vm0, %v4150_v0  ;;  %v452_v36 = vld [vmem:[%s4405_s14 + $0x60] sm:$0xff]  ;;  %v453_v38 = vld [vmem:[%s4405_s14 + $0x68] sm:$0xff] }
  0x22   : > { %388 = vst.msk [vmem:[#allocation2 + $0x10] sm:$0x3] %vm387_vm1, %v4150_v0  ;;  %391 = vst.msk [vmem:[#allocation2 + $0x28] sm:$0x3] %vm387_vm1, %v4150_v0  ;;  %v460_v41 = vld [vmem:[%s4405_s14 + $0xa0] sm:$0xff]  ;;  %v461_v45 = vld [vmem:[%s4405_s14 + $0xa8] sm:$0xff] }
  0x23   : > { %394 = vst.msk [vmem:[#allocation2 + $0x40] sm:$0x3] %vm387_vm1, %v4150_v0  ;;  %397 = vst.msk [vmem:[#allocation2 + $0x58] sm:$0x3] %vm387_vm1, %v4150_v0  ;;  %v454_v47 = vld [vmem:[%s4405_s14 + $0x70] sm:$0xff]  ;;  %v455_v51 = vld [vmem:[%s4405_s14 + $0x78] sm:$0xff] }
  0x24   : > { %400 = vst.msk [vmem:[#allocation2 + $0x70] sm:$0x3] %vm387_vm1, %v4150_v0  ;;  %403 = vst.msk [vmem:[#allocation2 + $0x88] sm:$0x3] %vm387_vm1, %v4150_v0  ;;  %v462_v50 = vld [vmem:[%s4405_s14 + $0xb0] sm:$0xff]  ;;  %v463_v54 = vld [vmem:[%s4405_s14 + $0xb8] sm:$0xff] }
  0x25   : > { %406 = vst.msk [vmem:[#allocation2 + $0xa0] sm:$0x3] %vm387_vm1, %v4150_v0  ;;  %409 = vst.msk [vmem:[#allocation2 + $0xb8] sm:$0x3] %vm387_vm1, %v4150_v0 }
  0x26   : > { %412 = vst.msk [vmem:[#allocation2 + $0xd0] sm:$0x3] %vm387_vm1, %v4150_v0  ;;  %415 = vst.msk [vmem:[#allocation2 + $0xe8] sm:$0x3] %vm387_vm1, %v4150_v0 }
  0x27   : > { %418 = vst.msk [vmem:[#allocation2 + $0x100] sm:$0x3] %vm387_vm1, %v4150_v0  ;;  %421 = vst.msk [vmem:[#allocation2 + $0x118] sm:$0x3] %vm387_vm1, %v4150_v0 }
  0x28   : > { %424 = vst.msk [vmem:[#allocation2 + $0x130] sm:$0x3] %vm387_vm1, %v4150_v0  ;;  %427 = vst.msk [vmem:[#allocation2 + $0x148] sm:$0x3] %vm387_vm1, %v4150_v0 }
  0x29   : > { %430 = vst.msk [vmem:[#allocation2 + $0x160] sm:$0x3] %vm387_vm1, %v4150_v0  ;;  %433 = vst.msk [vmem:[#allocation2 + $0x178] sm:$0x3] %vm387_vm1, %v4150_v0  ;;  %v570_v6 = vld [vmem:[#allocation2 + $0xa] sm:$0xff] }
  0x2a   : > { %436 = vst.msk [vmem:[#allocation2 + $0x190] sm:$0x3] %vm387_vm1, %v4150_v0  ;;  %439 = vst.msk [vmem:[#allocation2 + $0x1a8] sm:$0x3] %vm387_vm1, %v4150_v0  ;;  %v538_v7 = vld [vmem:[#allocation2 + $0x9] sm:$0xff]  ;;  %956 = vrot.lane.b32.xlu1 %v570_v6, %s6329_s15  ;;  %vm3083_vm1 = vcmask 588800  }
  0x2b   : > { %2633 = vst.msk [vmem:[#allocation4] sm:$0xff] %vm1850_vm2, %v4150_v0  ;;  %2636 = vst.msk [vmem:[#allocation4 + $0x10] sm:$0xff] %vm1850_vm2, %v4150_v0  ;;  %828 = vrot.lane.b32.xlu0 %v538_v7, %s6333_s16 }
  0x2c   : > { %2638 = vst.msk [vmem:[#allocation4 + $0x20] sm:$0xff] %vm1850_vm2, %v4150_v0  ;;  %2640 = vst.msk [vmem:[#allocation4 + $0x30] sm:$0xff] %vm1850_vm2, %v4150_v0 }
  0x2d   : > { %2642 = vst.msk [vmem:[#allocation4 + $0x40] sm:$0xff] %vm1850_vm2, %v4150_v0  ;;  %2644 = vst.msk [vmem:[#allocation4 + $0x50] sm:$0xff] %vm1850_vm2, %v4150_v0 }
  0x2e   : > { %2646 = vst.msk [vmem:[#allocation4 + $0x60] sm:$0xff] %vm1850_vm2, %v4150_v0  ;;  %2648 = vst.msk [vmem:[#allocation4 + $0x70] sm:$0xff] %vm1850_vm2, %v4150_v0 }
  0x2f   : > { %2650 = vst.msk [vmem:[#allocation4 + $0x80] sm:$0xff] %vm1850_vm2, %v4150_v0  ;;  %2652 = vst.msk [vmem:[#allocation4 + $0x90] sm:$0xff] %vm1850_vm2, %v4150_v0 }
  0x30   : > { %473 = vst.msk [vmem:[#allocation2 + $0x19] sm:$0xff] %vm384_vm0, %v440_v1  ;;  %474 = vst.msk [vmem:[#allocation2 + $0x21] sm:$0xff] %vm384_vm0, %v441_v2 }
  0x31   : > { %475 = vst.msk [vmem:[#allocation2 + $0x31] sm:$0xff] %vm384_vm0, %v442_v3  ;;  %476 = vst.msk [vmem:[#allocation2 + $0x39] sm:$0xff] %vm384_vm0, %v443_v8 }
  0x32   : > { %477 = vst.msk [vmem:[#allocation2 + $0x49] sm:$0xff] %vm384_vm0, %v444_v9  ;;  %478 = vst.msk [vmem:[#allocation2 + $0x51] sm:$0xff] %vm384_vm0, %v445_v10 }
  0x33   : > { %479 = vst.msk [vmem:[#allocation2 + $0x61] sm:$0xff] %vm384_vm0, %v446_v11  ;;  %480 = vst.msk [vmem:[#allocation2 + $0x69] sm:$0xff] %vm384_vm0, %v447_v12  ;;  %v456_v12 = vld [vmem:[%s4405_s14 + $0x80] sm:$0xff] }
  0x34   : > { %481 = vst.msk [vmem:[#allocation2 + $0x79] sm:$0xff] %vm384_vm0, %v448_v13  ;;  %482 = vst.msk [vmem:[#allocation2 + $0x81] sm:$0xff] %vm384_vm0, %v449_v14  ;;  %v464_v13 = vld [vmem:[%s4405_s14 + $0xc0] sm:$0xff] }
  0x35   : > { %483 = vst.msk [vmem:[#allocation2 + $0x91] sm:$0xff] %vm384_vm0, %v450_v20  ;;  %484 = vst.msk [vmem:[#allocation2 + $0x99] sm:$0xff] %vm384_vm0, %v451_v26 }
  0x36   : > { %485 = vst.msk [vmem:[#allocation2 + $0xa9] sm:$0xff] %vm384_vm0, %v452_v36  ;;  %486 = vst.msk [vmem:[#allocation2 + $0xb1] sm:$0xff] %vm384_vm0, %v453_v38 }
  0x37   : > { %v4431_v15 = vld [vmem:[#allocation2 + $0x20] sm:$0xff]  ;;  %v4433_v16 = vld [vmem:[#allocation2 + $0x18] sm:$0xff]  ;;  %493 = vst.msk [vmem:[#allocation2 + $0x109] sm:$0xff] %vm384_vm0, %v460_v41  ;;  %494 = vst.msk [vmem:[#allocation2 + $0x111] sm:$0xff] %vm384_vm0, %v461_v45 }
  0x38   : > { %1084 = vrot.lane.b32.xlu1 %v4431_v15, %s6337_s22  ;;  %1082 = vrot.lane.b32.xlu0 %v4433_v16, %s6337_s22  ;;  %v633_v17 = vld [vmem:[#allocation2 + $0x19] sm:$0xff]  ;;  %v634_v18 = vld [vmem:[#allocation2 + $0x21] sm:$0xff]  ;;  %v4447_v22 = vld [vmem:[#allocation2 + $0x30] sm:$0xff]  ;;  %487 = vst.msk [vmem:[#allocation2 + $0xc1] sm:$0xff] %vm384_vm0, %v454_v47 }
  0x39   : > { %v665_v19 = vld [vmem:[#allocation2 + $0x1a] sm:$0xff]  ;;  %v666_v21 = vld [vmem:[#allocation2 + $0x22] sm:$0xff]  ;;  %v730_v30 = vld [vmem:[#allocation2 + $0x31] sm:$0xff]  ;;  %495 = vst.msk [vmem:[#allocation2 + $0x121] sm:$0xff] %vm384_vm0, %v462_v50 }
  0x3a   : > { %v4469_v29 = vld [vmem:[#allocation2 + $0x38] sm:$0xff]  ;;  %v4490_v37 = vld [vmem:[#allocation2 + $0x48] sm:$0xff]  ;;  %v4500_v39 = vld [vmem:[#allocation2 + $0x50] sm:$0xff]  ;;  %488 = vst.msk [vmem:[#allocation2 + $0xc9] sm:$0xff] %vm384_vm0, %v455_v51 }
  0x3b   : > { %v731_v33 = vld [vmem:[#allocation2 + $0x39] sm:$0xff]  ;;  %v732_v40 = vld [vmem:[#allocation2 + $0x49] sm:$0xff]  ;;  %v733_v42 = vld [vmem:[#allocation2 + $0x51] sm:$0xff]  ;;  %496 = vst.msk [vmem:[#allocation2 + $0x129] sm:$0xff] %vm384_vm0, %v463_v54 }
  0x3c   : > { %1210 = vrot.lane.b32.xlu0 %v633_v17, %s6327_s24  ;;  %830 = vrot.lane.b32.xlu1 %v633_v17, %s6333_s16  ;;  %v762_v34 = vld [vmem:[#allocation2 + $0x32] sm:$0xff]  ;;  %v763_v35 = vld [vmem:[#allocation2 + $0x3a] sm:$0xff]  ;;  %v764_v43 = vld [vmem:[#allocation2 + $0x4a] sm:$0xff]  ;;  %489 = vst.msk [vmem:[#allocation2 + $0xd9] sm:$0xff] %vm384_vm0, %v456_v12 }
  0x3d   : > { %v765_v44 = vld [vmem:[#allocation2 + $0x52] sm:$0xff]  ;;  %v4520_v46 = vld [vmem:[#allocation2 + $0x60] sm:$0xff]  ;;  %v4530_v48 = vld [vmem:[#allocation2 + $0x68] sm:$0xff]  ;;  %497 = vst.msk [vmem:[#allocation2 + $0x139] sm:$0xff] %vm384_vm0, %v464_v13 }
  0x3e   : > { %v734_v49 = vld [vmem:[#allocation2 + $0x61] sm:$0xff]  ;;  %v735_v52 = vld [vmem:[#allocation2 + $0x69] sm:$0xff]  ;;  %v4552_v58 = vld [vmem:[#allocation2 + $0x78] sm:$0xff]  ;;  %2635 = vst.msk [vmem:[#allocation4 + $0x8] sm:$0x3] %vm2634_vm11, %v4150_v0 }
  0x3f   : > { %v766_v53 = vld [vmem:[#allocation2 + $0x62] sm:$0xff]  ;;  %v767_v55 = vld [vmem:[#allocation2 + $0x6a] sm:$0xff]  ;;  %v736_v1 = vld [vmem:[#allocation2 + $0x79] sm:$0xff]  ;;  %2637 = vst.msk [vmem:[#allocation4 + $0x18] sm:$0x3] %vm2634_vm11, %v4150_v0 }
  0x40   : > { %1212 = vrot.lane.b32.xlu0 %v634_v18, %s6327_s24  ;;  %1338 = vrot.lane.b32.xlu1 %v665_v19, %s6331_s25  ;;  %s6347_s24 = smov 24   ;;  %v4566_v63 = vld [vmem:[#allocation2 + $0x80] sm:$0xff]  ;;  %v4600_v25 = vld [vmem:[#allocation2 + $0x90] sm:$0xff]  ;;  %v4667_v13 = vld [vmem:[#allocation2 + $0xa8] sm:$0xff]  ;;  %2639 = vst.msk [vmem:[#allocation4 + $0x28] sm:$0x3] %vm2634_vm11, %v4150_v0 }
  0x41   : > { %v737_v6 = vld [vmem:[#allocation2 + $0x81] sm:$0xff]  ;;  %v738_v45 = vld [vmem:[#allocation2 + $0x91] sm:$0xff]  ;;  %2641 = vst.msk [vmem:[#allocation4 + $0x38] sm:$0x3] %vm2634_vm11, %v4150_v0  ;;  %2643 = vst.msk [vmem:[#allocation4 + $0x48] sm:$0x3] %vm2634_vm11, %v4150_v0 }
  0x42   : > { %v768_v7 = vld [vmem:[#allocation2 + $0x7a] sm:$0xff]  ;;  %v769_v14 = vld [vmem:[#allocation2 + $0x82] sm:$0xff]  ;;  %2645 = vst.msk [vmem:[#allocation4 + $0x58] sm:$0x3] %vm2634_vm11, %v4150_v0  ;;  %2647 = vst.msk [vmem:[#allocation4 + $0x68] sm:$0x3] %vm2634_vm11, %v4150_v0 }
  0x43   : > { %2649 = vst.msk [vmem:[#allocation4 + $0x78] sm:$0x3] %vm2634_vm11, %v4150_v0  ;;  %2651 = vst.msk [vmem:[#allocation4 + $0x88] sm:$0x3] %vm2634_vm11, %v4150_v0 }
  0x44   : > { %832 = vrot.lane.b32.xlu0 %v634_v18, %s6333_s16  ;;  %958 = vrot.lane.b32.xlu1 %v665_v19, %s6329_s15  ;;  %s6349_s16 = smov 32   ;;  %v505_v19 = vld [vmem:[#allocation2] sm:$0xff]  ;;  %2653 = vst.msk [vmem:[#allocation4 + $0x98] sm:$0x3] %vm2634_vm11, %v4150_v0  ;;  %vm3650_vm11 = vcmask 56320  }
  0x48   : > { %1340 = vrot.lane.b32.xlu0 %v666_v21, %s6331_s25  ;;  %1466 = vrot.lane.b32.xlu1 %v4447_v22, %s6347_s24  ;;  %s6356_s25 = smov 4  }
  0x4c   : > { %960 = vrot.lane.b32.xlu0 %v666_v21, %s6329_s15  ;;  %1086 = vrot.lane.b32.xlu1 %v4447_v22, %s6337_s22  ;;  %s6335_s15 = smov 28  }
  0x50   : > { %1468 = vrot.lane.b32.xlu0 %v4469_v29, %s6347_s24  ;;  %1594 = vrot.lane.b32.xlu1 %v730_v30, %s6335_s15 }
  0x54   : > { %1088 = vrot.lane.b32.xlu0 %v4469_v29, %s6337_s22  ;;  %1214 = vrot.lane.b32.xlu1 %v730_v30, %s6355_s29 }
  0x58   : > { %1596 = vrot.lane.b32.xlu0 %v731_v33, %s6335_s15  ;;  %1722 = vrot.lane.b32.xlu1 %v762_v34, %s6349_s16 }
  0x5c   : > { %834 = vrot.lane.b32.xlu0 %v730_v30, %s6356_s25  ;;  %1216 = vrot.lane.b32.xlu1 %v731_v33, %s6355_s29  ;;  %v506_v30 = vld [vmem:[#allocation2 + $0x8] sm:$0xff] }
  0x60   : > { %1342 = vrot.lane.b32.xlu0 %v762_v34, %s6357_s30  ;;  %1724 = vrot.lane.b32.xlu1 %v763_v35, %s6349_s16 }
  0x64   : > { %836 = vrot.lane.b32.xlu0 %v731_v33, %s6356_s25  ;;  %962 = vrot.lane.b32.xlu1 %v762_v34, %s6358_s12  ;;  %v457_v33 = vld [vmem:[%s4405_s14 + $0x88] sm:$0xff] }
  0x65   : > { %v465_v34 = vld [vmem:[%s4405_s14 + $0xc8] sm:$0xff]  ;;  %490 = vst.msk [vmem:[#allocation2 + $0xe1] sm:$0xff] %vm384_vm0, %v457_v33 }
  0x66   : > { %498 = vst.msk [vmem:[#allocation2 + $0x141] sm:$0xff] %vm384_vm0, %v465_v34 }
  0x68   : > { %1344 = vrot.lane.b32.xlu0 %v763_v35, %s6357_s30  ;;  %1470 = vrot.lane.b32.xlu1 %v4490_v37, %s6347_s24 }
  0x6c   : > { %964 = vrot.lane.b32.xlu0 %v763_v35, %s6358_s12  ;;  %1090 = vrot.lane.b32.xlu1 %v4490_v37, %s6337_s22 }
  0x70   : > { %1472 = vrot.lane.b32.xlu0 %v4500_v39, %s6347_s24  ;;  %1598 = vrot.lane.b32.xlu1 %v732_v40, %s6335_s15 }
  0x74   : > { %1092 = vrot.lane.b32.xlu0 %v4500_v39, %s6337_s22  ;;  %1218 = vrot.lane.b32.xlu1 %v732_v40, %s6355_s29 }
  0x78   : > { %1600 = vrot.lane.b32.xlu0 %v733_v42, %s6335_s15  ;;  %1726 = vrot.lane.b32.xlu1 %v764_v43, %s6349_s16 }
  0x7c   : > { %838 = vrot.lane.b32.xlu0 %v732_v40, %s6356_s25  ;;  %1220 = vrot.lane.b32.xlu1 %v733_v42, %s6355_s29 }
  0x80   : > { %1346 = vrot.lane.b32.xlu0 %v764_v43, %s6357_s30  ;;  %1728 = vrot.lane.b32.xlu1 %v765_v44, %s6349_s16 }
  0x84   : > { %840 = vrot.lane.b32.xlu0 %v733_v42, %s6356_s25  ;;  %966 = vrot.lane.b32.xlu1 %v764_v43, %s6358_s12 }
  0x88   : > { %1348 = vrot.lane.b32.xlu0 %v765_v44, %s6357_s30  ;;  %1474 = vrot.lane.b32.xlu1 %v4520_v46, %s6347_s24 }
  0x8a   : > { %v955_v56 = vpop.permute.xlu1 %954 }
  0x8b   : > { %v827_v57 = vpop.permute.xlu0 %826 }
  0x8c   : > { %968 = vrot.lane.b32.xlu0 %v765_v44, %s6358_s12  ;;  %1094 = vrot.lane.b32.xlu1 %v4520_v46, %s6337_s22  ;;  %v1818_v20 = vsel %vm384_vm0, %v505_v19, %v827_v57  ;;  %v4627_v44 = vld [vmem:[#allocation2 + $0x98] sm:$0xff] }
  0x8d   : > { %v1851_v24 = vsel %vm1850_vm2, %v1818_v20, %v955_v56 }
  0x90   : > { %1476 = vrot.lane.b32.xlu0 %v4530_v48, %s6347_s24  ;;  %1602 = vrot.lane.b32.xlu1 %v734_v49, %s6335_s15 }
  0x94   : > { %1096 = vrot.lane.b32.xlu0 %v4530_v48, %s6337_s22  ;;  %1222 = vrot.lane.b32.xlu1 %v734_v49, %s6355_s29 }
  0x98   : > { %1604 = vrot.lane.b32.xlu0 %v735_v52, %s6335_s15  ;;  %1730 = vrot.lane.b32.xlu1 %v766_v53, %s6349_s16 }
  0x9c   : > { %842 = vrot.lane.b32.xlu0 %v734_v49, %s6356_s25  ;;  %1224 = vrot.lane.b32.xlu1 %v735_v52, %s6355_s29  ;;  %v4554_v59 = vpop.permute.xlu1 %956 }
  0x9d   : > { %v4556_v60 = vpop.permute.xlu0 %828 }
  0x9e   : > { %v1819_v36 = vsel %vm384_vm0, %v506_v30, %v4556_v60  ;;  %v770_v60 = vld [vmem:[#allocation2 + $0x92] sm:$0xff] }
  0x9f   : > { %v1852_v43 = vsel %vm1850_vm2, %v1819_v36, %v4554_v59  ;;  %v739_v59 = vld [vmem:[#allocation2 + $0x99] sm:$0xff] }
  0xa0   : > { %1350 = vrot.lane.b32.xlu0 %v766_v53, %s6357_s30  ;;  %1732 = vrot.lane.b32.xlu1 %v767_v55, %s6349_s16 }
  0xa4   : > { %844 = vrot.lane.b32.xlu0 %v735_v52, %s6356_s25  ;;  %970 = vrot.lane.b32.xlu1 %v766_v53, %s6358_s12 }
  0xa8   : > { %1352 = vrot.lane.b32.xlu0 %v767_v55, %s6357_s30  ;;  %1478 = vrot.lane.b32.xlu1 %v4552_v58, %s6347_s24 }
  0xaa   : > { %v4561_v61 = vpop.permute.xlu1 %1084  ;;  %v1083_v62 = vpop.permute.xlu0 %1082 }
  0xab   : > { %v1884_v26 = vsel %vm1883_vm4, %v1851_v24, %v1083_v62  ;;  %v1885_v47 = vsel %vm1883_vm4, %v1852_v43, %v4561_v61 }
  0xac   : > { %972 = vrot.lane.b32.xlu0 %v767_v55, %s6358_s12  ;;  %1098 = vrot.lane.b32.xlu1 %v4552_v58, %s6337_s22 }
  0xae   : > { %v1211_v2 = vpop.permute.xlu0 %1210  ;;  %v4568_v3 = vpop.permute.xlu1 %830 }
  0xaf   : > { %v1917_v31 = vsel %vm1916_vm5, %v1884_v26, %v1211_v2 }
  0xb0   : > { %1480 = vrot.lane.b32.xlu0 %v4566_v63, %s6347_s24  ;;  %1606 = vrot.lane.b32.xlu1 %v736_v1, %s6335_s15 }
  0xb2   : > { %v4573_v4 = vpop.permute.xlu0 %1212  ;;  %v1339_v5 = vpop.permute.xlu1 %1338 }
  0xb3   : > { %v1950_v32 = vsel %vm1949_vm6, %v1917_v31, %v1339_v5  ;;  %v1918_v51 = vsel %vm1916_vm5, %v1885_v47, %v4573_v4  ;;  %v771_v4 = vld [vmem:[#allocation2 + $0x9a] sm:$0xff] }
  0xb4   : > { %1100 = vrot.lane.b32.xlu0 %v4566_v63, %s6337_s22  ;;  %1226 = vrot.lane.b32.xlu1 %v736_v1, %s6355_s29 }
  0xb6   : > { %v4578_v8 = vpop.permute.xlu0 %832  ;;  %v4580_v9 = vpop.permute.xlu1 %958 }
  0xb8   : > { %1608 = vrot.lane.b32.xlu0 %v737_v6, %s6335_s15  ;;  %1734 = vrot.lane.b32.xlu1 %v768_v7, %s6349_s16 }
  0xba   : > { %v1341_v10 = vpop.permute.xlu0 %1340  ;;  %v1467_v11 = vpop.permute.xlu1 %1466 }
  0xbb   : > { %v1983_v35 = vsel %vm1982_vm7, %v1950_v32, %v1467_v11  ;;  %v1951_v52 = vsel %vm1949_vm6, %v1918_v51, %v1341_v10  ;;  %v1820_v11 = vsel %vm384_vm0, %v4433_v16, %v4568_v3  ;;  %v1821_v16 = vsel %vm384_vm0, %v4431_v15, %v4578_v8  ;;  %v4693_v15 = vld [vmem:[#allocation2 + $0xb0] sm:$0xff] }
  0xbc   : > { %846 = vrot.lane.b32.xlu0 %v736_v1, %s6356_s25  ;;  %1228 = vrot.lane.b32.xlu1 %v737_v6, %s6355_s29  ;;  %v1853_v12 = vsel %vm1850_vm2, %v1820_v11, %v4580_v9  ;;  %v740_v8 = vld [vmem:[#allocation2 + $0xa9] sm:$0xff]  ;;  %v467_v11 = vld [vmem:[%s4405_s14 + $0xd8] sm:$0xff] }
  0xbd   : > { %v458_v51 = vld [vmem:[%s4405_s14 + $0x90] sm:$0xff]  ;;  %500 = vst.msk [vmem:[#allocation2 + $0x159] sm:$0xff] %vm384_vm0, %v467_v11 }
  0xbe   : > { %v4590_v17 = vpop.permute.xlu0 %960  ;;  %v4592_v18 = vpop.permute.xlu1 %1086  ;;  %491 = vst.msk [vmem:[#allocation2 + $0xf1] sm:$0xff] %vm384_vm0, %v458_v51 }
  0xbf   : > { %v1854_v26 = vsel %vm1850_vm2, %v1821_v16, %v4590_v17  ;;  %v4764_v16 = vld [vmem:[#allocation2 + $0xc0] sm:$0xff] }
  0xc0   : > { %1354 = vrot.lane.b32.xlu0 %v768_v7, %s6357_s30  ;;  %1736 = vrot.lane.b32.xlu1 %v769_v14, %s6349_s16 }
  0xc2   : > { %v1469_v21 = vpop.permute.xlu0 %1468  ;;  %v1595_v23 = vpop.permute.xlu1 %1594 }
  0xc3   : > { %v2016_v38 = vsel %vm2015_vm8, %v1983_v35, %v1595_v23  ;;  %v1984_v53 = vsel %vm1982_vm7, %v1951_v52, %v1469_v21  ;;  %v466_v52 = vld [vmem:[%s4405_s14 + $0xd0] sm:$0xff] }
  0xc4   : > { %848 = vrot.lane.b32.xlu0 %v737_v6, %s6356_s25  ;;  %974 = vrot.lane.b32.xlu1 %v768_v7, %s6358_s12  ;;  %499 = vst.msk [vmem:[#allocation2 + $0x151] sm:$0xff] %vm384_vm0, %v466_v52 }
  0xc6   : > { %v4603_v27 = vpop.permute.xlu0 %1088  ;;  %v4605_v28 = vpop.permute.xlu1 %1214 }
  0xc7   : > { %v1887_v30 = vsel %vm1883_vm4, %v1854_v26, %v4603_v27  ;;  %v592_v26 = vld [vmem:[#allocation2 + $0x112] sm:$0xff] }
  0xc8   : > { %1356 = vrot.lane.b32.xlu0 %v769_v14, %s6357_s30  ;;  %1482 = vrot.lane.b32.xlu1 %v4600_v25, %s6347_s24 }
  0xca   : > { %v1597_v40 = vpop.permute.xlu0 %1596  ;;  %v1723_v41 = vpop.permute.xlu1 %1722 }
  0xcb   : > { %v2049_v42 = vsel %vm2048_vm9, %v2016_v38, %v1723_v41  ;;  %v2017_v54 = vsel %vm2015_vm8, %v1984_v53, %v1597_v40  ;;  %v741_v40 = vld [vmem:[#allocation2 + $0xb1] sm:$0xff] }
  0xcc   : > { %976 = vrot.lane.b32.xlu0 %v769_v14, %s6358_s12  ;;  %1102 = vrot.lane.b32.xlu1 %v4600_v25, %s6337_s22  ;;  %v1886_v14 = vsel %vm1883_vm4, %v1853_v12, %v4592_v18  ;;  %v772_v41 = vld [vmem:[#allocation2 + $0xaa] sm:$0xff] }
  0xcd   : > { %3905 = vmatprep.mubr.msk.f32.mxu0 %vm2086_vm10, %v2049_v42  ;;  %v1919_v21 = vsel %vm1916_vm5, %v1886_v14, %v4605_v28  ;;  %v591_v12 = vld [vmem:[#allocation2 + $0x10a] sm:$0xff] }
  0xce   : > { %v4631_v49 = vpop.permute.xlu0 %834  ;;  %v1217_v50 = vpop.permute.xlu1 %1216 }
  0xcf   : > { %v1920_v17 = vsel %vm1916_vm5, %v1887_v30, %v1217_v50 }
  0xd0   : > { %1484 = vrot.lane.b32.xlu0 %v4627_v44, %s6347_s24  ;;  %1610 = vrot.lane.b32.xlu1 %v738_v45, %s6335_s15 }
  0xd2   : > { %v1343_v55 = vpop.permute.xlu0 %1342  ;;  %v1725_v56 = vpop.permute.xlu1 %1724 }
  0xd3   : > { %v2050_v57 = vsel %vm2048_vm9, %v2017_v54, %v1725_v56  ;;  %v1952_v3 = vsel %vm1949_vm6, %v1919_v21, %v1343_v55  ;;  %v773_v55 = vld [vmem:[#allocation2 + $0xb2] sm:$0xff]  ;;  %v1822_v56 = vsel %vm384_vm0, %v4447_v22, %v4631_v49 }
  0xd4   : > { %1104 = vrot.lane.b32.xlu0 %v4627_v44, %s6337_s22  ;;  %1230 = vrot.lane.b32.xlu1 %v738_v45, %s6355_s29 }
  0xd5   : > { %3906 = vmatmul.mubr.msk.f32.vlgmr.msra.gmra.mrb[0].mxu0 %vm2086_vm10, %v2050_v57 }
  0xd6   : > { %v4646_v61 = vpop.permute.xlu0 %836  ;;  %v4648_v62 = vpop.permute.xlu1 %962 }
  0xd7   : > { %v1823_v49 = vsel %vm384_vm0, %v4469_v29, %v4646_v61 }
  0xd8   : > { %1612 = vrot.lane.b32.xlu0 %v739_v59, %s6335_s15  ;;  %1738 = vrot.lane.b32.xlu1 %v770_v60, %s6349_s16 }
  0xda   : > { %v1345_v1 = vpop.permute.xlu0 %1344  ;;  %v1471_v2 = vpop.permute.xlu1 %1470 }
  0xdb   : > { %v1985_v9 = vsel %vm1982_vm7, %v1952_v3, %v1471_v2  ;;  %v1953_v33 = vsel %vm1949_vm6, %v1920_v17, %v1345_v1  ;;  %v560_v1 = vld [vmem:[#allocation2 + $0x111] sm:$0xff]  ;;  %v711_v17 = vld [vmem:[#allocation2 + $0xc8] sm:$0xff] }
  0xdc   : > { %850 = vrot.lane.b32.xlu0 %v738_v45, %s6356_s25  ;;  %1232 = vrot.lane.b32.xlu1 %v739_v59, %s6355_s29  ;;  %v559_v45 = vld [vmem:[#allocation2 + $0x109] sm:$0xff] }
  0xde   : > { %v4654_v5 = vpop.permute.xlu0 %964  ;;  %v4656_v6 = vpop.permute.xlu1 %1090 }
  0xdf   : > { %v1856_v29 = vsel %vm1850_vm2, %v1823_v49, %v4654_v5 }
  0xe0   : > { %1358 = vrot.lane.b32.xlu0 %v770_v60, %s6357_s30  ;;  %1740 = vrot.lane.b32.xlu1 %v771_v4, %s6349_s16 }
  0xe2   : > { %v1473_v7 = vpop.permute.xlu0 %1472  ;;  %v1599_v10 = vpop.permute.xlu1 %1598 }
  0xe3   : > { %v2018_v18 = vsel %vm2015_vm8, %v1985_v9, %v1599_v10  ;;  %v1986_v34 = vsel %vm1982_vm7, %v1953_v33, %v1473_v7 }
  0xe4   : > { %852 = vrot.lane.b32.xlu0 %v739_v59, %s6356_s25  ;;  %978 = vrot.lane.b32.xlu1 %v770_v60, %s6358_s12  ;;  %v1855_v60 = vsel %vm1850_vm2, %v1822_v56, %v4648_v62  ;;  %v459_v62 = vld [vmem:[%s4405_s14 + $0x98] sm:$0xff]  ;;  %v774_v56 = vld [vmem:[#allocation2 + $0xc2] sm:$0xff] }
  0xe5   : > { %v1888_v2 = vsel %vm1883_vm4, %v1855_v60, %v4656_v6  ;;  %492 = vst.msk [vmem:[#allocation2 + $0xf9] sm:$0xff] %vm384_vm0, %v459_v62 }
  0xe6   : > { %v4671_v19 = vpop.permute.xlu0 %1092  ;;  %v4673_v20 = vpop.permute.xlu1 %1218 }
  0xe7   : > { %v1921_v22 = vsel %vm1916_vm5, %v1888_v2, %v4673_v20  ;;  %v1889_v3 = vsel %vm1883_vm4, %v1856_v29, %v4671_v19 }
  0xe8   : > { %1360 = vrot.lane.b32.xlu0 %v771_v4, %s6357_s30  ;;  %1486 = vrot.lane.b32.xlu1 %v4667_v13, %s6347_s24 }
  0xea   : > { %v1601_v23 = vpop.permute.xlu0 %1600  ;;  %v1727_v24 = vpop.permute.xlu1 %1726 }
  0xeb   : > { %v2051_v28 = vsel %vm2048_vm9, %v2018_v18, %v1727_v24  ;;  %v2019_v35 = vsel %vm2015_vm8, %v1986_v34, %v1601_v23 }
  0xec   : > { %980 = vrot.lane.b32.xlu0 %v771_v4, %s6358_s12  ;;  %1106 = vrot.lane.b32.xlu1 %v4667_v13, %s6337_s22 }
  0xed   : > { %3908 = vmatprep.mubr.msk.f32.mxu0 %vm2086_vm10, %v2051_v28 }
  0xee   : > { %v4697_v31 = vpop.permute.xlu0 %838  ;;  %v4699_v32 = vpop.permute.xlu1 %1220 }
  0xef   : > { %v1922_v23 = vsel %vm1916_vm5, %v1889_v3, %v4699_v32  ;;  %v4783_v32 = vld [vmem:[#allocation2 + $0x120] sm:$0xff] }
  0xf0   : > { %1488 = vrot.lane.b32.xlu0 %v4693_v15, %s6347_s24  ;;  %1614 = vrot.lane.b32.xlu1 %v740_v8, %s6335_s15 }
  0xf2   : > { %v1347_v36 = vpop.permute.xlu0 %1346  ;;  %v1729_v38 = vpop.permute.xlu1 %1728 }
  0xf3   : > { %v2052_v27 = vsel %vm2048_vm9, %v2019_v35, %v1729_v38  ;;  %v1954_v10 = vsel %vm1949_vm6, %v1921_v22, %v1347_v36  ;;  %v742_v35 = vld [vmem:[#allocation2 + $0xc1] sm:$0xff] }
  0xf4   : > { %1108 = vrot.lane.b32.xlu0 %v4693_v15, %s6337_s22  ;;  %1234 = vrot.lane.b32.xlu1 %v740_v8, %s6355_s29 }
  0xf5   : > { %3909 = vmatmul.mubr.msk.f32.gmra.mrb[2].mxu0 %vm2086_vm10, %v2052_v27  ;;  %v624_v27 = vld [vmem:[#allocation2 + $0x128] sm:$0xff] }
  0xf6   : > { %v4713_v42 = vpop.permute.xlu0 %840  ;;  %v4715_v43 = vpop.permute.xlu1 %966 }
  0xf8   : > { %1616 = vrot.lane.b32.xlu0 %v741_v40, %s6335_s15  ;;  %1742 = vrot.lane.b32.xlu1 %v772_v41, %s6349_s16 }
  0xfa   : > { %v1349_v47 = vpop.permute.xlu0 %1348  ;;  %v1475_v50 = vpop.permute.xlu1 %1474 }
  0xfb   : > { %v1987_v6 = vsel %vm1982_vm7, %v1954_v10, %v1475_v50  ;;  %v1955_v5 = vsel %vm1949_vm6, %v1922_v23, %v1349_v47  ;;  %v743_v47 = vld [vmem:[#allocation2 + $0xc9] sm:$0xff]  ;;  %v1824_v50 = vsel %vm384_vm0, %v4490_v37, %v4697_v31  ;;  %v1825_v37 = vsel %vm384_vm0, %v4500_v39, %v4713_v42 }
  0xfc   : > { %854 = vrot.lane.b32.xlu0 %v740_v8, %s6356_s25  ;;  %870 = vrot.lane.b32.xlu1 %v559_v45, %s6356_s25  ;;  %v655_v45 = vld [vmem:[#allocation2 + $0x121] sm:$0xff]  ;;  %v656_v39 = vld [vmem:[#allocation2 + $0x129] sm:$0xff] }
  0xfe   : > { %v4725_v53 = vpop.permute.xlu0 %968  ;;  %v4727_v54 = vpop.permute.xlu1 %1094 }
  0xff   : > { %v1858_v49 = vsel %vm1850_vm2, %v1825_v37, %v4725_v53 }
 0x100   : > { %1236 = vrot.lane.b32.xlu0 %v741_v40, %s6355_s29  ;;  %1362 = vrot.lane.b32.xlu1 %v772_v41, %s6357_s30 }
 0x102   : > { %v1477_v57 = vpop.permute.xlu0 %1476  ;;  %v1603_v59 = vpop.permute.xlu1 %1602 }
 0x103   : > { %v2020_v14 = vsel %vm2015_vm8, %v1987_v6, %v1603_v59  ;;  %v1988_v24 = vsel %vm1982_vm7, %v1955_v5, %v1477_v57  ;;  %v468_v5 = vld [vmem:[%s4405_s14 + $0xe0] sm:$0xff] }
 0x104   : > { %1744 = vrot.lane.b32.xlu0 %v773_v55, %s6349_s16  ;;  %856 = vrot.lane.b32.xlu1 %v741_v40, %s6356_s25  ;;  %501 = vst.msk [vmem:[#allocation2 + $0x169] sm:$0xff] %vm384_vm0, %v468_v5 }
 0x106   : > { %v4740_v4 = vpop.permute.xlu0 %1096  ;;  %v4742_v7 = vpop.permute.xlu1 %1222 }
 0x107   : > { %v1891_v42 = vsel %vm1883_vm4, %v1858_v49, %v4740_v4 }
 0x108   : > { %872 = vrot.lane.b32.xlu0 %v560_v1, %s6356_s25  ;;  %982 = vrot.lane.b32.xlu1 %v772_v41, %s6358_s12 }
 0x10a   : > { %v1605_v20 = vpop.permute.xlu0 %1604  ;;  %v1731_v21 = vpop.permute.xlu1 %1730 }
 0x10b   : > { %v2053_v61 = vsel %vm2048_vm9, %v2020_v14, %v1731_v21  ;;  %v2021_v28 = vsel %vm2015_vm8, %v1988_v24, %v1605_v20  ;;  %v775_v14 = vld [vmem:[#allocation2 + $0xca] sm:$0xff] }
 0x10c   : > { %998 = vrot.lane.b32.xlu0 %v591_v12, %s6358_s12  ;;  %1364 = vrot.lane.b32.xlu1 %v773_v55, %s6357_s30  ;;  %v687_v12 = vld [vmem:[#allocation2 + $0x122] sm:$0xff]  ;;  %v688_v24 = vld [vmem:[#allocation2 + $0x12a] sm:$0xff] }
 0x10d   : > { %3911 = vmatprep.mubr.msk.f32.mxu0 %vm2086_vm10, %v2053_v61 }
 0x10e   : > { %v4768_v9 = vpop.permute.xlu0 %842  ;;  %v1225_v18 = vpop.permute.xlu1 %1224 }
 0x10f   : > { %v1924_v11 = vsel %vm1916_vm5, %v1891_v42, %v1225_v18 }
 0x110   : > { %1490 = vrot.lane.b32.xlu0 %v4764_v16, %s6347_s24  ;;  %984 = vrot.lane.b32.xlu1 %v773_v55, %s6358_s12  ;;  %v1857_v55 = vsel %vm1850_vm2, %v1824_v50, %v4715_v43 }
 0x111   : > { %v1890_v57 = vsel %vm1883_vm4, %v1857_v55, %v4727_v54 }
 0x112   : > { %v1351_v8 = vpop.permute.xlu0 %1350  ;;  %v1733_v19 = vpop.permute.xlu1 %1732  ;;  %v1923_v1 = vsel %vm1916_vm5, %v1890_v57, %v4742_v7 }
 0x113   : > { %v2054_v30 = vsel %vm2048_vm9, %v2021_v28, %v1733_v19  ;;  %v1956_v31 = vsel %vm1949_vm6, %v1923_v1, %v1351_v8  ;;  %v712_v8 = vld [vmem:[#allocation2 + $0xd8] sm:$0xff] }
 0x114   : > { %1000 = vrot.lane.b32.xlu0 %v592_v26, %s6358_s12  ;;  %1110 = vrot.lane.b32.xlu1 %v4764_v16, %s6337_s22  ;;  %v720_v19 = vld [vmem:[#allocation2 + $0x138] sm:$0xff] }
 0x115   : > { %3912 = vmatmul.mubr.msk.f32.gmra.mrb[4].mxu0 %vm2086_vm10, %v2054_v30  ;;  %v1826_v30 = vsel %vm384_vm0, %v4520_v46, %v4768_v9 }
 0x116   : > { %v4785_v33 = vpop.permute.xlu0 %844  ;;  %v4787_v34 = vpop.permute.xlu1 %970 }
 0x117   : > { %v1827_v46 = vsel %vm384_vm0, %v4530_v48, %v4785_v33  ;;  %v713_v33 = vld [vmem:[#allocation2 + $0xe0] sm:$0xff] }
 0x118   : > { %1126 = vrot.lane.b32.xlu0 %v4783_v32, %s6337_s22  ;;  %1492 = vrot.lane.b32.xlu1 %v711_v17, %s6347_s24 }
 0x11a   : > { %v1353_v36 = vpop.permute.xlu0 %1352  ;;  %v1479_v38 = vpop.permute.xlu1 %1478 }
 0x11b   : > { %v1989_v43 = vsel %vm1982_vm7, %v1956_v31, %v1479_v38  ;;  %v1957_v53 = vsel %vm1949_vm6, %v1924_v11, %v1353_v36  ;;  %v1859_v36 = vsel %vm1850_vm2, %v1826_v30, %v4787_v34  ;;  %v469_v34 = vld [vmem:[%s4405_s14 + $0xe8] sm:$0xff] }
 0x11c   : > { %1618 = vrot.lane.b32.xlu0 %v742_v35, %s6335_s15  ;;  %1112 = vrot.lane.b32.xlu1 %v711_v17, %s6337_s22  ;;  %502 = vst.msk [vmem:[#allocation2 + $0x171] sm:$0xff] %vm384_vm0, %v469_v34  ;;  %v745_v11 = vld [vmem:[#allocation2 + $0xe1] sm:$0xff] }
 0x11e   : > { %v4794_v40 = vpop.permute.xlu0 %972  ;;  %v4796_v41 = vpop.permute.xlu1 %1098 }
 0x11f   : > { %v1892_v38 = vsel %vm1883_vm4, %v1859_v36, %v4796_v41  ;;  %v1860_v55 = vsel %vm1850_vm2, %v1827_v46, %v4794_v40 }
 0x120   : > { %1128 = vrot.lane.b32.xlu0 %v624_v27, %s6337_s22  ;;  %1238 = vrot.lane.b32.xlu1 %v742_v35, %s6355_s29 }
 0x122   : > { %v1481_v51 = vpop.permute.xlu0 %1480  ;;  %v1607_v52 = vpop.permute.xlu1 %1606 }
 0x123   : > { %v2022_v54 = vsel %vm2015_vm8, %v1989_v43, %v1607_v52  ;;  %v1990_v6 = vsel %vm1982_vm7, %v1957_v53, %v1481_v51  ;;  %v744_v43 = vld [vmem:[#allocation2 + $0xd9] sm:$0xff]  ;;  %v753_v53 = vld [vmem:[#allocation2 + $0x141] sm:$0xff] }
 0x124   : > { %1254 = vrot.lane.b32.xlu0 %v655_v45, %s6355_s29  ;;  %1620 = vrot.lane.b32.xlu1 %v743_v47, %s6335_s15 }
 0x126   : > { %v4809_v59 = vpop.permute.xlu0 %1100  ;;  %v1227_v60 = vpop.permute.xlu1 %1226 }
 0x127   : > { %v1893_v57 = vsel %vm1883_vm4, %v1860_v55, %v4809_v59 }
 0x128   : > { %1746 = vrot.lane.b32.xlu0 %v774_v56, %s6349_s16  ;;  %858 = vrot.lane.b32.xlu1 %v742_v35, %s6356_s25 }
 0x12a   : > { %v1609_v2 = vpop.permute.xlu0 %1608  ;;  %v1735_v22 = vpop.permute.xlu1 %1734 }
 0x12b   : > { %v2055_v7 = vsel %vm2048_vm9, %v2022_v54, %v1735_v22  ;;  %v2023_v20 = vsel %vm2015_vm8, %v1990_v6, %v1609_v2  ;;  %v752_v54 = vld [vmem:[#allocation2 + $0x139] sm:$0xff] }
 0x12c   : > { %874 = vrot.lane.b32.xlu0 %v655_v45, %s6356_s25  ;;  %1240 = vrot.lane.b32.xlu1 %v743_v47, %s6355_s29 }
 0x12d   : > { %3914 = vmatprep.mubr.msk.f32.mxu0 %vm2086_vm10, %v2055_v7 }
 0x12e   : > { %v4829_v10 = vpop.permute.xlu0 %846  ;;  %v4831_v62 = vpop.permute.xlu1 %1228 }
 0x12f   : > { %v1926_v40 = vsel %vm1916_vm5, %v1893_v57, %v4831_v62  ;;  %v1828_v0 = vsel %vm384_vm0, %v4552_v58, %v4829_v10  ;;  %v4997_v57 = vld [vmem:[#allocation2 + $0xf0] sm:$0xff] }
 0x130   : > { %1256 = vrot.lane.b32.xlu0 %v656_v39, %s6355_s29  ;;  %1366 = vrot.lane.b32.xlu1 %v774_v56, %s6357_s30 }
 0x132   : > { %v1355_v4 = vpop.permute.xlu0 %1354  ;;  %v1737_v21 = vpop.permute.xlu1 %1736 }
 0x133   : > { %v2056_v29 = vsel %vm2048_vm9, %v2023_v20, %v1737_v21  ;;  %v784_v20 = vld [vmem:[#allocation2 + $0x13a] sm:$0xff] }
 0x134   : > { %1382 = vrot.lane.b32.xlu0 %v687_v12, %s6357_s30  ;;  %1748 = vrot.lane.b32.xlu1 %v775_v14, %s6349_s16 }
 0x135   : > { %3915 = vmatmul.mubr.msk.f32.gmra.mrb[6].mxu0 %vm2086_vm10, %v2056_v29 }
 0x136   : > { %v4843_v61 = vpop.permute.xlu0 %848  ;;  %v4845_v3 = vpop.permute.xlu1 %974 }
 0x137   : > { %v1861_v29 = vsel %vm1850_vm2, %v1828_v0, %v4845_v3  ;;  %v1829_v30 = vsel %vm384_vm0, %v4566_v63, %v4843_v61  ;;  %v785_v63 = vld [vmem:[#allocation2 + $0x142] sm:$0xff] }
 0x138   : > { %860 = vrot.lane.b32.xlu0 %v743_v47, %s6356_s25  ;;  %876 = vrot.lane.b32.xlu1 %v656_v39, %s6356_s25  ;;  %v1925_v47 = vsel %vm1916_vm5, %v1892_v38, %v1227_v60  ;;  %v777_v38 = vld [vmem:[#allocation2 + $0xe2] sm:$0xff] }
 0x139   : > { %v1958_v9 = vsel %vm1949_vm6, %v1925_v47, %v1355_v4 }
 0x13a   : > { %v1357_v18 = vpop.permute.xlu0 %1356  ;;  %v1483_v23 = vpop.permute.xlu1 %1482 }
 0x13b   : > { %v1991_v50 = vsel %vm1982_vm7, %v1958_v9, %v1483_v23  ;;  %v1959_v37 = vsel %vm1949_vm6, %v1926_v40, %v1357_v18 }
 0x13c   : > { %986 = vrot.lane.b32.xlu0 %v774_v56, %s6358_s12  ;;  %1002 = vrot.lane.b32.xlu1 %v687_v12, %s6358_s12  ;;  %v721_v56 = vld [vmem:[#allocation2 + $0x140] sm:$0xff] }
 0x13e   : > { %v4853_v26 = vpop.permute.xlu0 %976  ;;  %v4855_v28 = vpop.permute.xlu1 %1102 }
 0x13f   : > { %v1894_v18 = vsel %vm1883_vm4, %v1861_v29, %v4855_v28  ;;  %v1862_v36 = vsel %vm1850_vm2, %v1829_v30, %v4853_v26 }
 0x140   : > { %1368 = vrot.lane.b32.xlu0 %v775_v14, %s6357_s30  ;;  %1384 = vrot.lane.b32.xlu1 %v688_v24, %s6357_s30 }
 0x142   : > { %v1485_v17 = vpop.permute.xlu0 %1484  ;;  %v1611_v35 = vpop.permute.xlu1 %1610 }
 0x143   : > { %v2024_v41 = vsel %vm2015_vm8, %v1991_v50, %v1611_v35  ;;  %v1992_v31 = vsel %vm1982_vm7, %v1959_v37, %v1485_v17 }
 0x144   : > { %1494 = vrot.lane.b32.xlu0 %v712_v8, %s6347_s24  ;;  %1510 = vrot.lane.b32.xlu1 %v720_v19, %s6347_s24 }
 0x146   : > { %v4868_v27 = vpop.permute.xlu0 %1104  ;;  %v4870_v45 = vpop.permute.xlu1 %1230 }
 0x147   : > { %v1895_v61 = vsel %vm1883_vm4, %v1862_v36, %v4868_v27 }
 0x148   : > { %988 = vrot.lane.b32.xlu0 %v775_v14, %s6358_s12  ;;  %1004 = vrot.lane.b32.xlu1 %v688_v24, %s6358_s12  ;;  %v776_v14 = vld [vmem:[#allocation2 + $0xda] sm:$0xff]  ;;  %v1927_v24 = vsel %vm1916_vm5, %v1894_v18, %v4870_v45 }
 0x14a   : > { %v1613_v51 = vpop.permute.xlu0 %1612  ;;  %v1739_v52 = vpop.permute.xlu1 %1738 }
 0x14b   : > { %v2057_v48 = vsel %vm2048_vm9, %v2024_v41, %v1739_v52  ;;  %v2025_v2 = vsel %vm2015_vm8, %v1992_v31, %v1613_v51  ;;  %v470_v51 = vld [vmem:[%s4405_s14 + $0xf0] sm:$0xff] }
 0x14c   : > { %1114 = vrot.lane.b32.xlu0 %v712_v8, %s6337_s22  ;;  %1130 = vrot.lane.b32.xlu1 %v720_v19, %s6337_s22  ;;  %503 = vst.msk [vmem:[#allocation2 + $0x181] sm:$0xff] %vm384_vm0, %v470_v51 }
 0x14d   : > { %3917 = vmatprep.mubr.msk.f32.mxu0 %vm2086_vm10, %v2057_v48 }
 0x14e   : > { %v4891_v60 = vpop.permute.xlu0 %850  ;;  %v4893_v1 = vpop.permute.xlu1 %1232 }
 0x14f   : > { %v1928_v46 = vsel %vm1916_vm5, %v1895_v61, %v4893_v1  ;;  %v722_v1 = vld [vmem:[#allocation2 + $0x150] sm:$0xff] }
 0x150   : > { %1496 = vrot.lane.b32.xlu0 %v713_v33, %s6347_s24  ;;  %1512 = vrot.lane.b32.xlu1 %v721_v56, %s6347_s24 }
 0x152   : > { %v1359_v59 = vpop.permute.xlu0 %1358  ;;  %v1741_v22 = vpop.permute.xlu1 %1740 }
 0x153   : > { %v2058_v49 = vsel %vm2048_vm9, %v2025_v2, %v1741_v22  ;;  %v1960_v58 = vsel %vm1949_vm6, %v1927_v24, %v1359_v59  ;;  %v5016_v59 = vld [vmem:[#allocation2 + $0xf8] sm:$0xff] }
 0x154   : > { %1622 = vrot.lane.b32.xlu0 %v744_v43, %s6335_s15  ;;  %1638 = vrot.lane.b32.xlu1 %v752_v54, %s6335_s15  ;;  %v723_v22 = vld [vmem:[#allocation2 + $0x158] sm:$0xff] }
 0x155   : > { %3918 = vmatmul.mubr.msk.f32.gmra.mrb[8].mxu0 %vm2086_vm10, %v2058_v49 }
 0x156   : > { %v4906_v7 = vpop.permute.xlu0 %852  ;;  %v4908_v39 = vpop.permute.xlu1 %978 }
 0x158   : > { %1116 = vrot.lane.b32.xlu0 %v713_v33, %s6337_s22  ;;  %1132 = vrot.lane.b32.xlu1 %v721_v56, %s6337_s22  ;;  %v471_v56 = vld [vmem:[%s4405_s14 + $0xf8] sm:$0xff]  ;;  %s6343_s14 = smov 56  }
 0x159   : > { %504 = vst.msk [vmem:[#allocation2 + $0x189] sm:$0xff] %vm384_vm0, %v471_v56 }
 0x15a   : > { %v1361_v42 = vpop.permute.xlu0 %1360  ;;  %v1487_v62 = vpop.permute.xlu1 %1486 }
 0x15b   : > { %v1993_v10 = vsel %vm1982_vm7, %v1960_v58, %v1487_v62  ;;  %v1961_v9 = vsel %vm1949_vm6, %v1928_v46, %v1361_v42  ;;  %v746_v62 = vld [vmem:[#allocation2 + $0xf1] sm:$0xff] }
 0x15c   : > { %1242 = vrot.lane.b32.xlu0 %v744_v43, %s6355_s29  ;;  %1258 = vrot.lane.b32.xlu1 %v752_v54, %s6355_s29 }
 0x15e   : > { %v4924_v6 = vpop.permute.xlu0 %980  ;;  %v4926_v12 = vpop.permute.xlu1 %1106 }
 0x160   : > { %1624 = vrot.lane.b32.xlu0 %v745_v11, %s6335_s15  ;;  %1640 = vrot.lane.b32.xlu1 %v753_v53, %s6335_s15 }
 0x162   : > { %v1489_v4 = vpop.permute.xlu0 %1488  ;;  %v1615_v21 = vpop.permute.xlu1 %1614 }
 0x163   : > { %v2026_v3 = vsel %vm2015_vm8, %v1993_v10, %v1615_v21  ;;  %v1994_v26 = vsel %vm1982_vm7, %v1961_v9, %v1489_v4  ;;  %v747_v10 = vld [vmem:[#allocation2 + $0xf9] sm:$0xff] }
 0x164   : > { %1750 = vrot.lane.b32.xlu0 %v776_v14, %s6349_s16  ;;  %1766 = vrot.lane.b32.xlu1 %v784_v20, %s6349_s16  ;;  %v5082_v9 = vld [vmem:[%s6317_s2] ss:$0 sm:$0xff] }
 0x166   : > { %v4939_v23 = vpop.permute.xlu0 %1108  ;;  %v4941_v5 = vpop.permute.xlu1 %1234 }
 0x168   : > { %862 = vrot.lane.b32.xlu0 %v744_v43, %s6356_s25  ;;  %878 = vrot.lane.b32.xlu1 %v752_v54, %s6356_s25 }
 0x16a   : > { %v1617_v8 = vpop.permute.xlu0 %1616  ;;  %v1743_v19 = vpop.permute.xlu1 %1742 }
 0x16b   : > { %v2059_v28 = vsel %vm2048_vm9, %v2026_v3, %v1743_v19  ;;  %v2027_v34 = vsel %vm2015_vm8, %v1994_v26, %v1617_v8  ;;  %v755_v3 = vld [vmem:[#allocation2 + $0x159] sm:$0xff] }
 0x16c   : > { %1244 = vrot.lane.b32.xlu0 %v745_v11, %s6355_s29  ;;  %1260 = vrot.lane.b32.xlu1 %v753_v53, %s6355_s29 }
 0x16d   : > { %3920 = vmatprep.mubr.msk.f32.mxu0 %vm2086_vm10, %v2059_v28 }
 0x16e   : > { %v4957_v17 = vpop.permute.xlu0 %854  ;;  %v4959_v35 = vpop.permute.xlu1 %870 }
 0x170   : > { %1370 = vrot.lane.b32.xlu0 %v776_v14, %s6357_s30  ;;  %1386 = vrot.lane.b32.xlu1 %v784_v20, %s6357_s30 }
 0x172   : > { %v4967_v45 = vpop.permute.xlu0 %1236  ;;  %v1363_v47 = vpop.permute.xlu1 %1362 }
 0x174   : > { %1752 = vrot.lane.b32.xlu0 %v777_v38, %s6349_s16  ;;  %1768 = vrot.lane.b32.xlu1 %v785_v63, %s6349_s16 }
 0x176   : > { %v1745_v50 = vpop.permute.xlu0 %1744  ;;  %v4976_v41 = vpop.permute.xlu1 %856 }
 0x177   : > { %v2060_v27 = vsel %vm2048_vm9, %v2027_v34, %v1745_v50  ;;  %v5088_v34 = vld [vmem:[%s6318_s3] ss:$0 sm:$0xff] }
 0x178   : > { %864 = vrot.lane.b32.xlu0 %v745_v11, %s6356_s25  ;;  %880 = vrot.lane.b32.xlu1 %v753_v53, %s6356_s25  ;;  %v754_v11 = vld [vmem:[#allocation2 + $0x151] sm:$0xff]  ;;  %v1830_v53 = vsel %vm384_vm0, %v4600_v25, %v4891_v60 }
 0x179   : > { %3921 = vmatmul.mubr.msk.f32.gmra.mrb[10].mxu0 %vm2086_vm10, %v2060_v27  ;;  %v1863_v0 = vsel %vm1850_vm2, %v1830_v53, %v4908_v39  ;;  %v787_v53 = vld [vmem:[#allocation2 + $0x15a] sm:$0xff] }
 0x17a   : > { %v4984_v52 = vpop.permute.xlu0 %872  ;;  %v4986_v55 = vpop.permute.xlu1 %982  ;;  %v1896_v4 = vsel %vm1883_vm4, %v1863_v0, %v4926_v12 }
 0x17b   : > { %v1929_v25 = vsel %vm1916_vm5, %v1896_v4, %v4941_v5  ;;  %v1831_v5 = vsel %vm384_vm0, %v4627_v44, %v4906_v7  ;;  %v778_v44 = vld [vmem:[#allocation2 + $0xf2] sm:$0xff] }
 0x17c   : > { %990 = vrot.lane.b32.xlu0 %v776_v14, %s6358_s12  ;;  %1006 = vrot.lane.b32.xlu1 %v784_v20, %s6358_s12  ;;  %v1962_v60 = vsel %vm1949_vm6, %v1929_v25, %v1363_v47  ;;  %v1864_v28 = vsel %vm1850_vm2, %v1831_v5, %v4924_v6  ;;  %v786_v7 = vld [vmem:[#allocation2 + $0x152] sm:$0xff] }
 0x17d   : > { %v1897_v30 = vsel %vm1883_vm4, %v1864_v28, %v4939_v23 }
 0x17e   : > { %v4990_v48 = vpop.permute.xlu0 %998  ;;  %v4992_v33 = vpop.permute.xlu1 %1364 }
 0x180   : > { %1372 = vrot.lane.b32.xlu0 %v777_v38, %s6357_s30  ;;  %1388 = vrot.lane.b32.xlu1 %v785_v63, %s6357_s30 }
 0x182   : > { %v1491_v40 = vpop.permute.xlu0 %1490  ;;  %v5000_v37 = vpop.permute.xlu1 %984 }
 0x183   : > { %v1995_v18 = vsel %vm1982_vm7, %v1962_v60, %v1491_v40 }
 0x184   : > { %1498 = vrot.lane.b32.xlu0 %v4997_v57, %s6347_s24  ;;  %1514 = vrot.lane.b32.xlu1 %v722_v1, %s6347_s24 }
 0x186   : > { %v5005_v31 = vpop.permute.xlu0 %1000  ;;  %v5007_v43 = vpop.permute.xlu1 %1110 }
 0x188   : > { %992 = vrot.lane.b32.xlu0 %v777_v38, %s6358_s12  ;;  %1008 = vrot.lane.b32.xlu1 %v785_v63, %s6358_s12  ;;  %v1930_v63 = vsel %vm1916_vm5, %v1897_v30, %v4967_v45 }
 0x189   : > { %v1963_v61 = vsel %vm1949_vm6, %v1930_v63, %v4992_v33 }
 0x18a   : > { %v5011_v54 = vpop.permute.xlu0 %1126  ;;  %v1493_v2 = vpop.permute.xlu1 %1492 }
 0x18b   : > { %v1996_v6 = vsel %vm1982_vm7, %v1963_v61, %v1493_v2 }
 0x18c   : > { %1118 = vrot.lane.b32.xlu0 %v4997_v57, %s6337_s22  ;;  %1134 = vrot.lane.b32.xlu1 %v722_v1, %s6337_s22 }
 0x18e   : > { %v1619_v49 = vpop.permute.xlu0 %1618  ;;  %v5018_v42 = vpop.permute.xlu1 %1112 }
 0x18f   : > { %v2028_v39 = vsel %vm2015_vm8, %v1995_v18, %v1619_v49 }
 0x190   : > { %1500 = vrot.lane.b32.xlu0 %v5016_v59, %s6347_s24  ;;  %1516 = vrot.lane.b32.xlu1 %v723_v22, %s6347_s24 }
 0x192   : > { %v5026_v14 = vpop.permute.xlu0 %1128  ;;  %v5028_v20 = vpop.permute.xlu1 %1238 }
 0x194   : > { %1626 = vrot.lane.b32.xlu0 %v746_v62, %s6335_s15  ;;  %1642 = vrot.lane.b32.xlu1 %v754_v11, %s6335_s15 }
 0x196   : > { %v5036_v21 = vpop.permute.xlu0 %1254  ;;  %v1621_v29 = vpop.permute.xlu1 %1620 }
 0x197   : > { %v2029_v47 = vsel %vm2015_vm8, %v1996_v6, %v1621_v29 }
 0x198   : > { %1120 = vrot.lane.b32.xlu0 %v5016_v59, %s6337_s22  ;;  %1136 = vrot.lane.b32.xlu1 %v723_v22, %s6337_s22  ;;  %s6360_s22 = smov 28  }
 0x19a   : > { %v1747_v24 = vpop.permute.xlu0 %1746  ;;  %v5046_v58 = vpop.permute.xlu1 %858 }
 0x19b   : > { %v2061_v12 = vsel %vm2048_vm9, %v2028_v39, %v1747_v24 }
 0x19c   : > { %1246 = vrot.lane.b32.xlu0 %v746_v62, %s6355_s29  ;;  %1262 = vrot.lane.b32.xlu1 %v754_v11, %s6355_s29 }
 0x19d   : > { %3923 = vmatprep.mubr.msk.f32.mxu0 %vm2086_vm10, %v2061_v12  ;;  %v5131_v12 = vld [vmem:[#allocation2 + $0x168] sm:$0xff] }
 0x19e   : > { %v5055_v8 = vpop.permute.xlu0 %874  ;;  %v5057_v19 = vpop.permute.xlu1 %1240 }
 0x1a0   : > { %1628 = vrot.lane.b32.xlu0 %v747_v10, %s6335_s15  ;;  %1644 = vrot.lane.b32.xlu1 %v755_v3, %s6335_s15  ;;  %s6359_s15 = smov 12  }
 0x1a2   : > { %v5065_v36 = vpop.permute.xlu0 %1256  ;;  %v5067_v38 = vpop.permute.xlu1 %1366 }
 0x1a4   : > { %1754 = vrot.lane.b32.xlu0 %v778_v44, %s6349_s16  ;;  %1770 = vrot.lane.b32.xlu1 %v786_v7, %s6349_s16 }
 0x1a6   : > { %v5077_v46 = vpop.permute.xlu0 %1382  ;;  %v1749_v23 = vpop.permute.xlu1 %1748 }
 0x1a7   : > { %v2062_v45 = vsel %vm2048_vm9, %v2029_v47, %v1749_v23 }
 0x1a8   : > { %v3907_v26 = vpop.f32.mrb[0].mxu0  ;;  %866 = vrot.lane.b32.xlu0 %v746_v62, %s6356_s25  ;;  %882 = vrot.lane.b32.xlu1 %v754_v11, %s6356_s25  ;;  %v779_v11 = vld [vmem:[#allocation2 + $0xfa] sm:$0xff] }
 0x1a9   : > { %v2420_v50 = vmul.f32 %v3907_v26, %v5082_v9  ;;  %v2253_v27 = vpop.f32.mrb[1].mxu0  ;;  %3924 = vmatmul.mubr.msk.f32.gmra.mrb[12].mxu0 %vm2086_vm10, %v2062_v45 }
 0x1aa   : > { %v2419_v51 = vmul.f32 %v5082_v9, %v2253_v27  ;;  %v5095_v33 = vpop.permute.xlu0 %860  ;;  %v5097_v56 = vpop.permute.xlu1 %876  ;;  %v1832_v27 = vsel %vm384_vm0, %v4667_v13, %v4957_v17 }
 0x1ab   : > { %v2459_v1 = vadd.f32 %v5088_v34, %v2420_v50  ;;  %v5153_v50 = vld [vmem:[#allocation2 + $0x170] sm:$0xff]  ;;  %v1865_v13 = vsel %vm1850_vm2, %v1832_v27, %v4986_v55 }
 0x1ac   : > { %v2458_v40 = vadd.f32 %v5088_v34, %v2419_v51  ;;  %1248 = vrot.lane.b32.xlu0 %v747_v10, %s6355_s29  ;;  %1264 = vrot.lane.b32.xlu1 %v755_v3, %s6355_s29 }
 0x1ad   : > { %v2491_v2 = vmax.f32 %v2459_v1, 0.0 }
 0x1ae   : > { %v2490_v22 = vmax.f32 %v2458_v40, 0.0  ;;  %v5103_v49 = vpop.permute.xlu0 %986  ;;  %v5105_v62 = vpop.permute.xlu1 %1002 }
 0x1af   : > { %2523 = vst.msk [vmem:[#allocation3 + $0x8] sm:$0xff] %vm1850_vm2, %v2491_v2  ;;  %v528_v2 = vld [vmem:[#allocation2 + $0x110] sm:$0xff] }
 0x1b0   : > { %2522 = vst.msk [vmem:[#allocation3] sm:$0xff] %vm1850_vm2, %v2490_v22  ;;  %1374 = vrot.lane.b32.xlu0 %v778_v44, %s6357_s30  ;;  %1390 = vrot.lane.b32.xlu1 %v786_v7, %s6357_s30 }
 0x1b2   : > { %v5111_v0 = vpop.permute.xlu0 %1368  ;;  %v5113_v4 = vpop.permute.xlu1 %1384 }
 0x1b4   : > { %1756 = vrot.lane.b32.xlu0 %v779_v11, %s6349_s16  ;;  %1772 = vrot.lane.b32.xlu1 %v787_v53, %s6349_s16 }
 0x1b6   : > { %v1495_v29 = vpop.permute.xlu0 %1494  ;;  %v1511_v25 = vpop.permute.xlu1 %1510 }
 0x1b8   : > { %868 = vrot.lane.b32.xlu0 %v747_v10, %s6356_s25  ;;  %884 = vrot.lane.b32.xlu1 %v755_v3, %s6356_s25  ;;  %v527_v3 = vld [vmem:[#allocation2 + $0x108] sm:$0xff] }
 0x1b9   : > { %v1840_v22 = vsel %vm384_vm0, %v527_v3, %v4959_v35 }
 0x1ba   : > { %v5119_v60 = vpop.permute.xlu0 %988  ;;  %v5121_v18 = vpop.permute.xlu1 %1004  ;;  %v1873_v17 = vsel %vm1850_vm2, %v1840_v22, %v4990_v48 }
 0x1bb   : > { %v1906_v35 = vsel %vm1883_vm4, %v1873_v17, %v5011_v54  ;;  %v2586_v54 = vld [vmem:[#allocation3 + $0x1] ss:$2 sm:$0xff] }
 0x1bc   : > { %994 = vrot.lane.b32.xlu0 %v778_v44, %s6358_s12  ;;  %1010 = vrot.lane.b32.xlu1 %v786_v7, %s6358_s12  ;;  %v1939_v55 = vsel %vm1916_vm5, %v1906_v35, %v5036_v21  ;;  %v1841_v35 = vsel %vm384_vm0, %v528_v2, %v4984_v52  ;;  %v788_v52 = vld [vmem:[#allocation2 + $0x16a] sm:$0xff] }
 0x1be   : > { %v5125_v39 = vpop.permute.xlu0 %1114  ;;  %v5127_v24 = vpop.permute.xlu1 %1130 }
 0x1c0   : > { %1376 = vrot.lane.b32.xlu0 %v779_v11, %s6357_s30  ;;  %1392 = vrot.lane.b32.xlu1 %v787_v53, %s6357_s30 }
 0x1c2   : > { %v5133_v5 = vpop.permute.xlu0 %1496  ;;  %v5135_v10 = vpop.permute.xlu1 %1512 }
 0x1c4   : > { %1502 = vrot.lane.b32.xlu0 %v527_v3, %s6347_s24  ;;  %1518 = vrot.lane.b32.xlu1 %v5131_v12, %s6347_s24 }
 0x1c6   : > { %v1623_v28 = vpop.permute.xlu0 %1622  ;;  %v1639_v44 = vpop.permute.xlu1 %1638 }
 0x1c8   : > { %v3910_v7 = vpop.f32.mrb[2].mxu0  ;;  %996 = vrot.lane.b32.xlu0 %v779_v11, %s6358_s12  ;;  %1012 = vrot.lane.b32.xlu1 %v787_v53, %s6358_s12  ;;  %v748_v11 = vld [vmem:[#allocation2 + $0x109] sm:$0xff] }
 0x1c9   : > { %v2422_v30 = vmul.f32 %v3910_v7, %v5082_v9  ;;  %v2263_v63 = vpop.f32.mrb[3].mxu0  ;;  %v5173_v53 = vld [vmem:[#allocation2 + $0x169] sm:$0xff]  ;;  %v1898_v7 = vsel %vm1883_vm4, %v1865_v13, %v5007_v43 }
 0x1ca   : > { %v2421_v61 = vmul.f32 %v5082_v9, %v2263_v63  ;;  %v5144_v6 = vpop.permute.xlu0 %1116  ;;  %v5146_v47 = vpop.permute.xlu1 %1132  ;;  %v1931_v63 = vsel %vm1916_vm5, %v1898_v7, %v5028_v20  ;;  %v2554_v43 = vld [vmem:[#allocation3] ss:$2 sm:$0xff] }
 0x1cb   : > { %v2461_v23 = vadd.f32 %v5088_v34, %v2422_v30  ;;  %v1964_v48 = vsel %vm1949_vm6, %v1931_v63, %v5067_v38  ;;  %v2617_v13 = vmax.f32 %v2554_v43, %v2586_v54  ;;  %v757_v7 = vld [vmem:[#allocation2 + $0x171] sm:$0xff] }
 0x1cc   : > { %v2460_v45 = vadd.f32 %v5088_v34, %v2421_v61  ;;  %1122 = vrot.lane.b32.xlu0 %v527_v3, %s6359_s15  ;;  %1138 = vrot.lane.b32.xlu1 %v5131_v12, %s6359_s15  ;;  %v1972_v61 = vsel %vm1949_vm6, %v1939_v55, %v5077_v46  ;;  %v780_v43 = vld [vmem:[#allocation2 + $0x10a] sm:$0xff] }
 0x1cd   : > { %v2493_v26 = vmax.f32 %v2461_v23, 0.0  ;;  %v1997_v23 = vsel %vm1982_vm7, %v1964_v48, %v1495_v29  ;;  %v2005_v20 = vsel %vm1982_vm7, %v1972_v61, %v1511_v25  ;;  %v1833_v48 = vsel %vm384_vm0, %v4693_v15, %v4976_v41 }
 0x1ce   : > { %v2492_v51 = vmax.f32 %v2460_v45, 0.0  ;;  %v5158_v1 = vpop.permute.xlu0 %1242  ;;  %v5160_v40 = vpop.permute.xlu1 %1258  ;;  %v2030_v45 = vsel %vm2015_vm8, %v1997_v23, %v1623_v28  ;;  %v2038_v21 = vsel %vm2015_vm8, %v2005_v20, %v1639_v44  ;;  %v749_v44 = vld [vmem:[#allocation2 + $0x111] sm:$0xff]  ;;  %v1874_v61 = vsel %vm1850_vm2, %v1841_v35, %v5005_v31 }
 0x1cf   : > { %2525 = vst.msk [vmem:[#allocation3 + $0x18] sm:$0xff] %vm1850_vm2, %v2493_v26  ;;  %v1907_v54 = vsel %vm1883_vm4, %v1874_v61, %v5026_v14  ;;  %v718_v61 = vld [vmem:[#allocation2 + $0x120] sm:$0xff] }
 0x1d0   : > { %2524 = vst.msk [vmem:[#allocation3 + $0x10] sm:$0xff] %vm1850_vm2, %v2492_v51  ;;  %1504 = vrot.lane.b32.xlu0 %v528_v2, %s6347_s24  ;;  %1520 = vrot.lane.b32.xlu1 %v5153_v50, %s6347_s24 }
 0x1d2   : > { %v1625_v3 = vpop.permute.xlu0 %1624  ;;  %v1641_v30 = vpop.permute.xlu1 %1640 }
 0x1d4   : > { %1630 = vrot.lane.b32.xlu0 %v748_v11, %s6360_s22  ;;  %1646 = vrot.lane.b32.xlu1 %v5173_v53, %s6360_s22 }
 0x1d6   : > { %v1751_v26 = vpop.permute.xlu0 %1750  ;;  %v1767_v38 = vpop.permute.xlu1 %1766 }
 0x1d7   : > { %v2556_v27 = vld [vmem:[#allocation3 + $0x10] ss:$2 sm:$0xff]  ;;  %v2588_v51 = vld [vmem:[#allocation3 + $0x11] ss:$2 sm:$0xff]  ;;  %v2063_v46 = vsel %vm2048_vm9, %v2030_v45, %v1751_v26  ;;  %v2071_v22 = vsel %vm2048_vm9, %v2038_v21, %v1767_v38 }
 0x1d8   : > { %v2618_v17 = vmax.f32 %v2556_v27, %v2588_v51  ;;  %1124 = vrot.lane.b32.xlu0 %v528_v2, %s6359_s15  ;;  %1140 = vrot.lane.b32.xlu1 %v5153_v50, %s6359_s15 }
 0x1d9   : > { %3926 = vmatprep.mubr.msk.f32.mxu0 %vm2086_vm10, %v2063_v46  ;;  %3938 = vmatprep.mubr.msk.f32.mxu1 %vm2086_vm10, %v2071_v22  ;;  %v781_v46 = vld [vmem:[#allocation2 + $0x112] sm:$0xff] }
 0x1da   : > { %v2654_v29 = vmax.f32 %v2617_v13, %v2618_v17  ;;  %v5201_v25 = vpop.permute.xlu0 %862  ;;  %v5203_v28 = vpop.permute.xlu1 %878 }
 0x1dc   : > { %1250 = vrot.lane.b32.xlu0 %v748_v11, %s6355_s29  ;;  %1266 = vrot.lane.b32.xlu1 %v5173_v53, %s6355_s29  ;;  %2656 = vst.msk [vmem:[#allocation4 + $0x11] sm:$0xff] %vm1850_vm2, %v2654_v29  ;;  %v1866_v11 = vsel %vm1850_vm2, %v1833_v48, %v5000_v37  ;;  %v1940_v37 = vsel %vm1916_vm5, %v1907_v54, %v5065_v36  ;;  %v789_v29 = vld [vmem:[#allocation2 + $0x172] sm:$0xff]  ;;  %v726_v54 = vld [vmem:[#allocation2 + $0x180] sm:$0xff] }
 0x1dd   : > { %v1899_v2 = vsel %vm1883_vm4, %v1866_v11, %v5018_v42  ;;  %v1973_v20 = vsel %vm1949_vm6, %v1940_v37, %v5113_v4 }
 0x1de   : > { %v5211_v63 = vpop.permute.xlu0 %1244  ;;  %v5213_v55 = vpop.permute.xlu1 %1260  ;;  %v1932_v41 = vsel %vm1916_vm5, %v1899_v2, %v5057_v19  ;;  %v2006_v14 = vsel %vm1982_vm7, %v1973_v20, %v5135_v10  ;;  %v727_v20 = vld [vmem:[#allocation2 + $0x188] sm:$0xff] }
 0x1df   : > { %v1965_v31 = vsel %vm1949_vm6, %v1932_v41, %v5111_v0  ;;  %v2039_v36 = vsel %vm2015_vm8, %v2006_v14, %v1641_v30 }
 0x1e0   : > { %1632 = vrot.lane.b32.xlu0 %v749_v44, %s6360_s22  ;;  %1648 = vrot.lane.b32.xlu1 %v757_v7, %s6360_s22  ;;  %v1998_v42 = vsel %vm1982_vm7, %v1965_v31, %v5133_v5 }
 0x1e1   : > { %v2031_v19 = vsel %vm2015_vm8, %v1998_v42, %v1625_v3  ;;  %v750_v42 = vld [vmem:[#allocation2 + $0x121] sm:$0xff] }
 0x1e2   : > { %v5228_v23 = vpop.permute.xlu0 %1370  ;;  %v5230_v15 = vpop.permute.xlu1 %1386 }
 0x1e4   : > { %1758 = vrot.lane.b32.xlu0 %v780_v43, %s6349_s16  ;;  %1774 = vrot.lane.b32.xlu1 %v788_v52, %s6349_s16 }
 0x1e6   : > { %v1753_v45 = vpop.permute.xlu0 %1752  ;;  %v1769_v21 = vpop.permute.xlu1 %1768 }
 0x1e7   : > { %v2064_v0 = vsel %vm2048_vm9, %v2031_v19, %v1753_v45  ;;  %v2072_v4 = vsel %vm2048_vm9, %v2039_v36, %v1769_v21 }
 0x1e8   : > { %v3913_v26 = vpop.f32.mrb[4].mxu0  ;;  %886 = vrot.lane.b32.xlu0 %v5173_v53, %s6356_s25  ;;  %1252 = vrot.lane.b32.xlu1 %v749_v44, %s6355_s29 }
 0x1e9   : > { %v2424_v5 = vmul.f32 %v3913_v26, %v5082_v9  ;;  %v2273_v38 = vpop.f32.mrb[5].mxu0  ;;  %3927 = vmatmul.mubr.msk.f32.gmra.mrb[14].mxu0 %vm2086_vm10, %v2064_v0  ;;  %3939 = vmatmul.mubr.msk.f32.vlgmr.msra.gmra.mrb[0].mxu1 %vm2086_vm10, %v2072_v4  ;;  %v758_v0 = vld [vmem:[#allocation2 + $0x181] sm:$0xff] }
 0x1ea   : > { %v2423_v10 = vmul.f32 %v5082_v9, %v2273_v38  ;;  %v5257_v3 = vpop.permute.xlu0 %864  ;;  %v5259_v30 = vpop.permute.xlu1 %880 }
 0x1eb   : > { %v2463_v27 = vadd.f32 %v5088_v34, %v2424_v5 }
 0x1ec   : > { %v2462_v51 = vadd.f32 %v5088_v34, %v2423_v10  ;;  %1268 = vrot.lane.b32.xlu0 %v757_v7, %s6355_s29  ;;  %1378 = vrot.lane.b32.xlu1 %v780_v43, %s6357_s30 }
 0x1ed   : > { %v2495_v53 = vmax.f32 %v2463_v27, 0.0 }
 0x1ee   : > { %v2494_v22 = vmax.f32 %v2462_v51, 0.0  ;;  %v5265_v13 = vpop.permute.xlu0 %990  ;;  %v5267_v17 = vpop.permute.xlu1 %1006  ;;  %v751_v51 = vld [vmem:[#allocation2 + $0x129] sm:$0xff] }
 0x1ef   : > { %2527 = vst.msk [vmem:[#allocation3 + $0x28] sm:$0xff] %vm1850_vm2, %v2495_v53  ;;  %v1842_v53 = vsel %vm384_vm0, %v4783_v32, %v5055_v8 }
 0x1f0   : > { %2526 = vst.msk [vmem:[#allocation3 + $0x20] sm:$0xff] %vm1850_vm2, %v2494_v22  ;;  %1394 = vrot.lane.b32.xlu0 %v788_v52, %s6357_s30  ;;  %1760 = vrot.lane.b32.xlu1 %v781_v46, %s6349_s16  ;;  %v1875_v8 = vsel %vm1850_vm2, %v1842_v53, %v5105_v62 }
 0x1f2   : > { %v5273_v44 = vpop.permute.xlu0 %1372  ;;  %v5275_v35 = vpop.permute.xlu1 %1388 }
 0x1f4   : > { %1776 = vrot.lane.b32.xlu0 %v789_v29, %s6349_s16  ;;  %888 = vrot.lane.b32.xlu1 %v757_v7, %s6356_s25  ;;  %s6339_s25 = smov 40  }
 0x1f6   : > { %v5279_v48 = vpop.permute.xlu0 %1498  ;;  %v5281_v11 = vpop.permute.xlu1 %1514 }
 0x1f8   : > { %1014 = vrot.lane.b32.xlu0 %v788_v52, %s6358_s12  ;;  %1380 = vrot.lane.b32.xlu1 %v781_v46, %s6357_s30  ;;  %v719_v52 = vld [vmem:[#allocation2 + $0x128] sm:$0xff] }
 0x1fa   : > { %v5285_v43 = vpop.permute.xlu0 %992  ;;  %v5287_v2 = vpop.permute.xlu1 %1008 }
 0x1fc   : > { %1396 = vrot.lane.b32.xlu0 %v789_v29, %s6357_s30  ;;  %1506 = vrot.lane.b32.xlu1 %v718_v61, %s6347_s24  ;;  %v1834_v61 = vsel %vm384_vm0, %v4764_v16, %v5046_v58  ;;  %v1908_v16 = vsel %vm1883_vm4, %v1875_v8, %v5127_v24  ;;  %v2590_v24 = vld [vmem:[#allocation3 + $0x21] ss:$2 sm:$0xff] }
 0x1fd   : > { %v1867_v32 = vsel %vm1850_vm2, %v1834_v61, %v5103_v49  ;;  %v791_v61 = vld [vmem:[#allocation2 + $0x18a] sm:$0xff] }
 0x1fe   : > { %v5291_v41 = vpop.permute.xlu0 %1118  ;;  %v5293_v7 = vpop.permute.xlu1 %1134 }
 0x200   : > { %1522 = vrot.lane.b32.xlu0 %v726_v54, %s6347_s24  ;;  %1016 = vrot.lane.b32.xlu1 %v789_v29, %s6358_s12 }
 0x202   : > { %v5297_v37 = vpop.permute.xlu0 %1500  ;;  %v5299_v31 = vpop.permute.xlu1 %1516 }
 0x204   : > { %1142 = vrot.lane.b32.xlu0 %v726_v54, %s6359_s15  ;;  %1508 = vrot.lane.b32.xlu1 %v719_v52, %s6347_s24  ;;  %v759_v54 = vld [vmem:[#allocation2 + $0x189] sm:$0xff] }
 0x205   : > { %v782_v52 = vld [vmem:[#allocation2 + $0x122] sm:$0xff] }
 0x206   : > { %v1627_v14 = vpop.permute.xlu0 %1626  ;;  %v1643_v19 = vpop.permute.xlu1 %1642 }
 0x208   : > { %v3916_v36 = vpop.f32.mrb[6].mxu0  ;;  %1524 = vrot.lane.b32.xlu0 %v727_v20, %s6347_s24  ;;  %1634 = vrot.lane.b32.xlu1 %v750_v42, %s6360_s22 }
 0x209   : > { %v2426_v45 = vmul.f32 %v3916_v36, %v5082_v9  ;;  %v2283_v21 = vpop.f32.mrb[7].mxu0 }
 0x20a   : > { %v2425_v4 = vmul.f32 %v5082_v9, %v2283_v21  ;;  %v5307_v26 = vpop.permute.xlu0 %1120  ;;  %v5309_v5 = vpop.permute.xlu1 %1136 }
 0x20b   : > { %v2465_v38 = vadd.f32 %v5088_v34, %v2426_v45  ;;  %v1941_v45 = vsel %vm1916_vm5, %v1908_v16, %v5160_v40 }
 0x20c   : > { %v2464_v10 = vadd.f32 %v5088_v34, %v2425_v4  ;;  %1650 = vrot.lane.b32.xlu0 %v758_v0, %s6360_s22  ;;  %1144 = vrot.lane.b32.xlu1 %v727_v20, %s6359_s15  ;;  %v1900_v20 = vsel %vm1883_vm4, %v1867_v32, %v5125_v39  ;;  %v1974_v62 = vsel %vm1949_vm6, %v1941_v45, %v5230_v15  ;;  %v2558_v39 = vld [vmem:[#allocation3 + $0x20] ss:$2 sm:$0xff]  ;;  %v4076_v32 = vld [vmem:[#allocation2 + $0xc8] sm:$0xff] }
 0x20d   : > { %v2497_v27 = vmax.f32 %v2465_v38, 0.0  ;;  %v1933_v36 = vsel %vm1916_vm5, %v1900_v20, %v5158_v1  ;;  %v2007_v1 = vsel %vm1982_vm7, %v1974_v62, %v5281_v11  ;;  %v2619_v53 = vmax.f32 %v2558_v39, %v2590_v24  ;;  %v4077_v20 = vld [vmem:[#allocation2 + $0x128] sm:$0xff] }
 0x20e   : > { %v2496_v46 = vmax.f32 %v2464_v10, 0.0  ;;  %v5318_v22 = vpop.permute.xlu0 %1246  ;;  %v5320_v29 = vpop.permute.xlu1 %1262  ;;  %v1966_v49 = vsel %vm1949_vm6, %v1933_v36, %v5228_v23  ;;  %v2040_v23 = vsel %vm2015_vm8, %v2007_v1, %v1643_v19  ;;  %v1835_v8 = vsel %vm384_vm0, %v4076_v32, %v5095_v33  ;;  %v729_v33 = vld [vmem:[#allocation2 + $0x1a0] sm:$0xff] }
 0x20f   : > { %2529 = vst.msk [vmem:[#allocation3 + $0x38] sm:$0xff] %vm1850_vm2, %v2497_v27  ;;  %v1999_v21 = vsel %vm1982_vm7, %v1966_v49, %v5279_v48  ;;  %v783_v48 = vld [vmem:[#allocation2 + $0x12a] sm:$0xff]  ;;  %v1843_v16 = vsel %vm384_vm0, %v4077_v20, %v5097_v56  ;;  %v1868_v36 = vsel %vm1850_vm2, %v1835_v8, %v5119_v60  ;;  %v728_v49 = vld [vmem:[#allocation2 + $0x198] sm:$0xff]  ;;  %v2687_v8 = vld [vmem:[#allocation4 + $0x11] sm:$0xff] }
 0x210   : > { %2528 = vst.msk [vmem:[#allocation3 + $0x30] sm:$0xff] %vm1850_vm2, %v2496_v46  ;;  %1270 = vrot.lane.b32.xlu0 %v758_v0, %s6355_s29  ;;  %1636 = vrot.lane.b32.xlu1 %v751_v51, %s6360_s22  ;;  %v790_v0 = vld [vmem:[#allocation2 + $0x182] sm:$0xff]  ;;  %v2032_v40 = vsel %vm2015_vm8, %v1999_v21, %v1627_v14  ;;  %v1876_v45 = vsel %vm1850_vm2, %v1843_v16, %v5121_v18  ;;  %v2694_v20 = vld [vmem:[#allocation4 + $0x2] sm:$0xff] }
 0x211   : > { %v1901_v62 = vsel %vm1883_vm4, %v1868_v36, %v5144_v6  ;;  %v1909_v39 = vsel %vm1883_vm4, %v1876_v45, %v5146_v47  ;;  %v2695_v45 = vld [vmem:[#allocation4 + $0x12] sm:$0xff] }
 0x212   : > { %v1629_v58 = vpop.permute.xlu0 %1628  ;;  %v1645_v42 = vpop.permute.xlu1 %1644  ;;  %v1934_v21 = vsel %vm1916_vm5, %v1901_v62, %v5211_v63  ;;  %v1942_v60 = vsel %vm1916_vm5, %v1909_v39, %v5213_v55  ;;  %v760_v63 = vld [vmem:[#allocation2 + $0x199] sm:$0xff] }
 0x213   : > { %v1967_v18 = vsel %vm1949_vm6, %v1934_v21, %v5273_v44  ;;  %v1975_v1 = vsel %vm1949_vm6, %v1942_v60, %v5275_v35  ;;  %v5434_v62 = vld [vmem:[#allocation4 + $0x10] sm:$0xff] }
 0x214   : > { %1652 = vrot.lane.b32.xlu0 %v759_v54, %s6360_s22  ;;  %1762 = vrot.lane.b32.xlu1 %v782_v52, %s6349_s16  ;;  %v2000_v6 = vsel %vm1982_vm7, %v1967_v18, %v5297_v37  ;;  %v2008_v47 = vsel %vm1982_vm7, %v1975_v1, %v5299_v31 }
 0x215   : > { %v2033_v55 = vsel %vm2015_vm8, %v2000_v6, %v1629_v58  ;;  %v792_v58 = vld [vmem:[#allocation2 + $0x19a] sm:$0xff] }
 0x216   : > { %v1755_v4 = vpop.permute.xlu0 %1754  ;;  %v1771_v38 = vpop.permute.xlu1 %1770 }
 0x217   : > { %v2560_v15 = vld [vmem:[#allocation3 + $0x30] ss:$2 sm:$0xff]  ;;  %v2592_v10 = vld [vmem:[#allocation3 + $0x31] ss:$2 sm:$0xff]  ;;  %v2065_v27 = vsel %vm2048_vm9, %v2032_v40, %v1755_v4  ;;  %v2073_v51 = vsel %vm2048_vm9, %v2040_v23, %v1771_v38  ;;  %v2041_v40 = vsel %vm2015_vm8, %v2008_v47, %v1645_v42 }
 0x218   : > { %v2620_v46 = vmax.f32 %v2560_v15, %v2592_v10  ;;  %1778 = vrot.lane.b32.xlu0 %v790_v0, %s6349_s16  ;;  %1272 = vrot.lane.b32.xlu1 %v759_v54, %s6355_s29  ;;  %v793_v42 = vld [vmem:[#allocation2 + $0x1a2] sm:$0xff] }
 0x219   : > { %3929 = vmatprep.mubr.msk.f32.mxu0 %vm2086_vm10, %v2065_v27  ;;  %3941 = vmatprep.mubr.msk.f32.mxu1 %vm2086_vm10, %v2073_v51 }
 0x21a   : > { %v2657_v11 = vmax.f32 %v2619_v53, %v2620_v46  ;;  %v5359_v14 = vpop.permute.xlu0 %866  ;;  %v5361_v19 = vpop.permute.xlu1 %882 }
 0x21c   : > { %1398 = vrot.lane.b32.xlu0 %v790_v0, %s6357_s30  ;;  %1764 = vrot.lane.b32.xlu1 %v783_v48, %s6349_s16  ;;  %2659 = vst.msk [vmem:[#allocation4 + $0x21] sm:$0xff] %vm1850_vm2, %v2657_v11  ;;  %v761_v0 = vld [vmem:[#allocation2 + $0x1a1] sm:$0xff]  ;;  %v2686_v48 = vld [vmem:[#allocation4 + $0x1] sm:$0xff] }
 0x21e   : > { %v5368_v54 = vpop.permute.xlu0 %1248  ;;  %v5370_v52 = vpop.permute.xlu1 %1264 }
 0x220   : > { %1780 = vrot.lane.b32.xlu0 %v791_v61, %s6349_s16  ;;  %1400 = vrot.lane.b32.xlu1 %v791_v61, %s6357_s30  ;;  %s6341_s30 = smov 48  }
 0x222   : > { %v5384_v24 = vpop.permute.xlu0 %1374  ;;  %v5386_v56 = vpop.permute.xlu1 %1390 }
 0x223   : > { %v5436_v39 = vld [vmem:[#allocation4 + $0x20] sm:$0xff] }
 0x224   : > { %1526 = vrot.lane.b32.xlu0 %v728_v49, %s6347_s24  ;;  %1528 = vrot.lane.b32.xlu1 %v729_v33, %s6347_s24  ;;  %v5446_v18 = vld [vmem:[#allocation4 + $0x21] sm:$0xff] }
 0x226   : > { %v1757_v44 = vpop.permute.xlu0 %1756  ;;  %v1773_v23 = vpop.permute.xlu1 %1772 }
 0x227   : > { %v2066_v35 = vsel %vm2048_vm9, %v2033_v55, %v1757_v44  ;;  %v2074_v4 = vsel %vm2048_vm9, %v2041_v40, %v1773_v23 }
 0x228   : > { %v3919_v38 = vpop.f32.mrb[8].mxu0  ;;  %1654 = vrot.lane.b32.xlu0 %v760_v63, %s6360_s22  ;;  %1656 = vrot.lane.b32.xlu1 %v761_v0, %s6360_s22  ;;  %v5462_v0 = vld [vmem:[#allocation4 + $0x22] sm:$0xff]  ;;  %s3833_s22 = sshll.u32 %s4245_s21, 4  ;;  %s4163_s21 = smov [#allocation8]  }
 0x229   : > { %v2428_v37 = vmul.f32 %v3919_v38, %v5082_v9  ;;  %v2293_v31 = vpop.f32.mrb[9].mxu0  ;;  %3930 = vmatmul.mubr.msk.f32.gmra.mrb[16].mxu0 %vm2086_vm10, %v2066_v35  ;;  %3942 = vmatmul.mubr.msk.f32.gmra.mrb[2].mxu1 %vm2086_vm10, %v2074_v4  ;;  %s4090_s15 = sshll.u32 %s4163_s21, 4  ;;  %s4091_s15 = int_to_ptr.vmem [resolvable:$false] %s4090_s15 }
 0x22a   : > { %v2427_v15 = vmul.f32 %v5082_v9, %v2293_v31  ;;  %v5412_v10 = vpop.permute.xlu0 %868  ;;  %v5414_v27 = vpop.permute.xlu1 %884  ;;  %s4092_s0 = scalar_lea.vmem %s4091_s15, 32 }
 0x22b   : > { %v2467_v51 = vadd.f32 %v5088_v34, %v2428_v37 }
 0x22c   : > { %v2466_v53 = vadd.f32 %v5088_v34, %v2427_v15  ;;  %1782 = vrot.lane.b32.xlu0 %v792_v58, %s6349_s16  ;;  %1784 = vrot.lane.b32.xlu1 %v793_v42, %s6349_s16  ;;  %v4078_v15 = vld [vmem:[#allocation2 + $0xd8] sm:$0xff] }
 0x22d   : > { %v2499_v46 = vmax.f32 %v2467_v51, 0.0  ;;  %v1836_v51 = vsel %vm384_vm0, %v4078_v15, %v5201_v25 }
 0x22e   : > { %v2498_v11 = vmax.f32 %v2466_v53, 0.0  ;;  %v5420_v61 = vpop.permute.xlu0 %994  ;;  %v5422_v32 = vpop.permute.xlu1 %1010  ;;  %v4079_v53 = vld [vmem:[#allocation2 + $0x138] sm:$0xff] }
 0x22f   : > { %2531 = vst.msk [vmem:[#allocation3 + $0x48] sm:$0xff] %vm1850_vm2, %v2499_v46  ;;  %v1844_v46 = vsel %vm384_vm0, %v4079_v53, %v5203_v28 }
 0x230   : > { %2530 = vst.msk [vmem:[#allocation3 + $0x40] sm:$0xff] %vm1850_vm2, %v2498_v11  ;;  %2758 = vrot.lane.b32.xlu0 %v2686_v48, %s6358_s12  ;;  %2760 = vrot.lane.b32.xlu1 %v2687_v8, %s6358_s12  ;;  %v1869_v11 = vsel %vm1850_vm2, %v1836_v51, %v5265_v13 }
 0x232   : > { %v5428_v16 = vpop.permute.xlu0 %1376  ;;  %v5430_v36 = vpop.permute.xlu1 %1392 }
 0x234   : > { %2790 = vrot.lane.b32.xlu0 %v2694_v20, %s6355_s29  ;;  %2792 = vrot.lane.b32.xlu1 %v2695_v45, %s6355_s29 }
 0x236   : > { %v1503_v49 = vpop.permute.xlu0 %1502  ;;  %v1519_v33 = vpop.permute.xlu1 %1518 }
 0x238   : > { %2822 = vrot.lane.b32.xlu0 %v5434_v62, %s6347_s24  ;;  %2824 = vrot.lane.b32.xlu1 %v5436_v39, %s6347_s24 }
 0x23a   : > { %v5442_v21 = vpop.permute.xlu0 %996  ;;  %v5444_v60 = vpop.permute.xlu1 %1012 }
 0x23c   : > { %2854 = vrot.lane.b32.xlu0 %v2687_v8, %s6349_s16  ;;  %2762 = vrot.lane.b32.xlu1 %v5446_v18, %s6358_s12  ;;  %v1877_v8 = vsel %vm1850_vm2, %v1844_v46, %v5267_v17  ;;  %v4080_v46 = vld [vmem:[#allocation2 + $0xe0] sm:$0xff] }
 0x23e   : > { %v5451_v1 = vpop.permute.xlu0 %1122  ;;  %v5453_v6 = vpop.permute.xlu1 %1138 }
 0x240   : > { %2856 = vrot.lane.b32.xlu0 %v5446_v18, %s6349_s16  ;;  %2886 = vrot.lane.b32.xlu1 %v2695_v45, %s6339_s25  ;;  %v1902_v45 = vsel %vm1883_vm4, %v1869_v11, %v5291_v41 }
 0x241   : > { %v1935_v28 = vsel %vm1916_vm5, %v1902_v45, %v5318_v22 }
 0x242   : > { %v5458_v47 = vpop.permute.xlu0 %1504  ;;  %v5460_v63 = vpop.permute.xlu1 %1520  ;;  %v1968_v13 = vsel %vm1949_vm6, %v1935_v28, %v5384_v24  ;;  %v2562_v24 = vld [vmem:[#allocation3 + $0x40] ss:$2 sm:$0xff] }
 0x243   : > { %v2001_v41 = vsel %vm1982_vm7, %v1968_v13, %v1503_v49  ;;  %v1837_v49 = vsel %vm384_vm0, %v4080_v46, %v5257_v3 }
 0x244   : > { %2794 = vrot.lane.b32.xlu1 %v5462_v0, %s6355_s29 }
 0x246   : > { %v1631_v55 = vpop.permute.xlu0 %1630  ;;  %v1647_v40 = vpop.permute.xlu1 %1646 }
 0x248   : > { %2918 = vrot.lane.b32.xlu1 %v5436_v39, %s6341_s30 }
 0x24a   : > { %v5468_v44 = vpop.permute.xlu0 %1124  ;;  %v5470_v23 = vpop.permute.xlu1 %1140 }
 0x24c   : > { %v3922_v35 = vpop.f32.mrb[10].mxu0 }
 0x24d   : > { %v2430_v4 = vmul.f32 %v3922_v35, %v5082_v9  ;;  %v2303_v38 = vpop.f32.mrb[11].mxu0  ;;  %v1910_v35 = vsel %vm1883_vm4, %v1877_v8, %v5293_v7 }
 0x24e   : > { %v2429_v37 = vmul.f32 %v5082_v9, %v2303_v38  ;;  %v5474_v31 = vpop.permute.xlu0 %1250  ;;  %v5476_v58 = vpop.permute.xlu1 %1266 }
 0x24f   : > { %v2469_v42 = vadd.f32 %v5088_v34, %v2430_v4 }
 0x250   : > { %v2468_v48 = vadd.f32 %v5088_v34, %v2429_v37  ;;  %v1943_v37 = vsel %vm1916_vm5, %v1910_v35, %v5320_v29 }
 0x251   : > { %v2501_v20 = vmax.f32 %v2469_v42, 0.0  ;;  %v1976_v17 = vsel %vm1949_vm6, %v1943_v37, %v5386_v56  ;;  %v2034_v42 = vsel %vm2015_vm8, %v2001_v41, %v1631_v55  ;;  %v2594_v56 = vld [vmem:[#allocation3 + $0x41] ss:$2 sm:$0xff]  ;;  %v4081_v37 = vld [vmem:[#allocation2 + $0x140] sm:$0xff] }
 0x252   : > { %v2500_v25 = vmax.f32 %v2468_v48, 0.0  ;;  %v1633_v4 = vpop.permute.xlu0 %1632  ;;  %v1649_v38 = vpop.permute.xlu1 %1648  ;;  %v2009_v7 = vsel %vm1982_vm7, %v1976_v17, %v1519_v33  ;;  %v2621_v11 = vmax.f32 %v2562_v24, %v2594_v56  ;;  %v1845_v13 = vsel %vm384_vm0, %v4081_v37, %v5259_v30 }
 0x253   : > { %2533 = vst.msk [vmem:[#allocation3 + $0x58] sm:$0xff] %vm1850_vm2, %v2501_v20  ;;  %v2042_v22 = vsel %vm2015_vm8, %v2009_v7, %v1647_v40  ;;  %v1870_v20 = vsel %vm1850_vm2, %v1837_v49, %v5285_v43  ;;  %v1878_v43 = vsel %vm1850_vm2, %v1845_v13, %v5287_v2 }
 0x254   : > { %2532 = vst.msk [vmem:[#allocation3 + $0x50] sm:$0xff] %vm1850_vm2, %v2500_v25  ;;  %v1903_v45 = vsel %vm1883_vm4, %v1870_v20, %v5307_v26  ;;  %v1911_v41 = vsel %vm1883_vm4, %v1878_v43, %v5309_v5 }
 0x255   : > { %v1936_v3 = vsel %vm1916_vm5, %v1903_v45, %v5368_v54  ;;  %v1944_v30 = vsel %vm1916_vm5, %v1911_v41, %v5370_v52 }
 0x256   : > { %v1759_v15 = vpop.permute.xlu0 %1758  ;;  %v1775_v29 = vpop.permute.xlu1 %1774  ;;  %v1969_v17 = vsel %vm1949_vm6, %v1936_v3, %v5428_v16 }
 0x257   : > { %v2067_v51 = vsel %vm2048_vm9, %v2034_v42, %v1759_v15  ;;  %v2075_v53 = vsel %vm2048_vm9, %v2042_v22, %v1775_v29  ;;  %v2002_v26 = vsel %vm1982_vm7, %v1969_v17, %v5458_v47  ;;  %v1977_v22 = vsel %vm1949_vm6, %v1944_v30, %v5430_v36 }
 0x258   : > { %3932 = vmatprep.mubr.msk.f32.mxu0 %vm2086_vm10, %v2067_v51  ;;  %3944 = vmatprep.mubr.msk.f32.mxu1 %vm2086_vm10, %v2075_v53  ;;  %v2035_v54 = vsel %vm2015_vm8, %v2002_v26, %v1633_v4  ;;  %v2010_v2 = vsel %vm1982_vm7, %v1977_v22, %v5460_v63 }
 0x259   : > { %v2043_v5 = vsel %vm2015_vm8, %v2010_v2, %v1649_v38 }
 0x25a   : > { %v5512_v33 = vpop.permute.xlu0 %886  ;;  %v5514_v55 = vpop.permute.xlu1 %1252 }
 0x25b   : > { %v2564_v40 = vld [vmem:[#allocation3 + $0x50] ss:$2 sm:$0xff]  ;;  %v2596_v48 = vld [vmem:[#allocation3 + $0x51] ss:$2 sm:$0xff] }
 0x25c   : > { %v2622_v8 = vmax.f32 %v2564_v40, %v2596_v48 }
 0x25e   : > { %v2660_v35 = vmax.f32 %v2621_v11, %v2622_v8  ;;  %v5520_v25 = vpop.permute.xlu0 %1268  ;;  %v5522_v28 = vpop.permute.xlu1 %1378 }
 0x260   : > { %2662 = vst.msk [vmem:[#allocation4 + $0x31] sm:$0xff] %vm1850_vm2, %v2660_v35 }
 0x262   : > { %v5538_v7 = vpop.permute.xlu0 %1394  ;;  %v1761_v42 = vpop.permute.xlu1 %1760 }
 0x263   : > { %v2068_v16 = vsel %vm2048_vm9, %v2035_v54, %v1761_v42  ;;  %v4082_v42 = vld [vmem:[#allocation2 + $0x150] sm:$0xff] }
 0x264   : > { %3933 = vmatmul.mubr.msk.f32.gmra.mrb[18].mxu0 %vm2086_vm10, %v2068_v16 }
 0x266   : > { %v1777_v47 = vpop.permute.xlu0 %1776  ;;  %v5549_v4 = vpop.permute.xlu1 %888 }
 0x267   : > { %v2076_v15 = vsel %vm2048_vm9, %v2043_v5, %v1777_v47  ;;  %v5552_v29 = vld [vmem:[#allocation4 + $0x30] sm:$0xff] }
 0x268   : > { %v5554_v52 = vld [vmem:[#allocation4 + $0x31] sm:$0xff]  ;;  %2826 = vrot.lane.b32.xlu1 %v5552_v29, %s6347_s24  ;;  %3945 = vmatmul.mubr.msk.f32.gmra.mrb[4].mxu1 %vm2086_vm10, %v2076_v15  ;;  %s6361_s24 = smov 32  }
 0x269   : > { %2764 = vrot.lane.b32.xlu0 %v5554_v52, %s6358_s12  ;;  %v5569_v53 = vld [vmem:[#allocation4 + $0x32] sm:$0xff] }
 0x26a   : > { %v5561_v36 = vpop.permute.xlu0 %1014  ;;  %v1381_v63 = vpop.permute.xlu1 %1380 }
 0x26c   : > { %2950 = vrot.lane.b32.xlu1 %v5446_v18, %s6343_s14  ;;  %s6365_s14 = smov 48  }
 0x26d   : > { %2888 = vrot.lane.b32.xlu0 %v5462_v0, %s6339_s25  ;;  %s6363_s25 = smov 64  }
 0x26e   : > { %v5567_v38 = vpop.permute.xlu0 %1396  ;;  %v1507_v51 = vpop.permute.xlu1 %1506 }
 0x270   : > { %2858 = vrot.lane.b32.xlu1 %v5554_v52, %s6349_s16  ;;  %s6362_s16 = smov 24  }
 0x271   : > { %2796 = vrot.lane.b32.xlu0 %v5569_v53, %s6355_s29 }
 0x272   : > { %v1523_v24 = vpop.permute.xlu0 %1522  ;;  %v5575_v56 = vpop.permute.xlu1 %1016 }
 0x274   : > { %2982 = vrot.lane.b32.xlu1 %v5462_v0, %s6345_s13  ;;  %v1838_v0 = vsel %vm384_vm0, %v4997_v57, %v5359_v14  ;;  %v1846_v57 = vsel %vm384_vm0, %v4082_v42, %v5361_v19  ;;  %s6366_s13 = smov 40  }
 0x275   : > { %2920 = vrot.lane.b32.xlu0 %v5552_v29, %s6341_s30  ;;  %v1871_v13 = vsel %vm1850_vm2, %v1838_v0, %v5420_v61  ;;  %v1879_v14 = vsel %vm1850_vm2, %v1846_v57, %v5422_v32  ;;  %s6364_s30 = smov 56  }
 0x276   : > { %v5581_v18 = vpop.permute.xlu0 %1142  ;;  %v1509_v46 = vpop.permute.xlu1 %1508  ;;  %v1904_v43 = vsel %vm1883_vm4, %v1871_v13, %v5451_v1  ;;  %v1839_v1 = vsel %vm384_vm0, %v5016_v59, %v5412_v10 }
 0x277   : > { %v1937_v54 = vsel %vm1916_vm5, %v1904_v43, %v5474_v31  ;;  %v1912_v31 = vsel %vm1883_vm4, %v1879_v14, %v5453_v6  ;;  %v1872_v59 = vsel %vm1850_vm2, %v1839_v1, %v5442_v21 }
 0x278   : > { %v1905_v6 = vsel %vm1883_vm4, %v1872_v59, %v5468_v44 }
 0x27a   : > { %v1525_v49 = vpop.permute.xlu0 %1524  ;;  %v1635_v40 = vpop.permute.xlu1 %1634 }
 0x27c   : > { %v3925_v48 = vpop.f32.mrb[12].mxu0 }
 0x27d   : > { %v2432_v11 = vmul.f32 %v3925_v48, %v5082_v9  ;;  %v2313_v8 = vpop.f32.mrb[13].mxu0 }
 0x27e   : > { %v2431_v20 = vmul.f32 %v5082_v9, %v2313_v8  ;;  %v1651_v45 = vpop.permute.xlu0 %1650  ;;  %v5585_v35 = vpop.permute.xlu1 %1144 }
 0x27f   : > { %v2471_v3 = vadd.f32 %v5088_v34, %v2432_v11 }
 0x280   : > { %v2470_v37 = vadd.f32 %v5088_v34, %v2431_v20  ;;  %v1970_v34 = vsel %vm1949_vm6, %v1937_v54, %v5522_v28  ;;  %v1945_v28 = vsel %vm1916_vm5, %v1912_v31, %v5476_v58  ;;  %v1938_v58 = vsel %vm1916_vm5, %v1905_v6, %v5514_v55 }
 0x281   : > { %v2503_v17 = vmax.f32 %v2471_v3, 0.0  ;;  %v2003_v61 = vsel %vm1982_vm7, %v1970_v34, %v1507_v51  ;;  %v1978_v32 = vsel %vm1949_vm6, %v1945_v28, %v5538_v7  ;;  %v4083_v7 = vld [vmem:[#allocation2 + $0x158] sm:$0xff]  ;;  %v1971_v21 = vsel %vm1949_vm6, %v1938_v58, %v1381_v63 }
 0x282   : > { %v2502_v26 = vmax.f32 %v2470_v37, 0.0  ;;  %v1271_v9 = vpop.permute.xlu0 %1270  ;;  %v1637_v41 = vpop.permute.xlu1 %1636  ;;  %v2036_v30 = vsel %vm2015_vm8, %v2003_v61, %v1635_v40  ;;  %v2011_v10 = vsel %vm1982_vm7, %v1978_v32, %v1523_v24  ;;  %v1847_v51 = vsel %vm384_vm0, %v4083_v7, %v5414_v27  ;;  %v5705_v7 = vld [vmem:[%s6318_s3] ss:$0 sm:$0xff] }
 0x283   : > { %2535 = vst.msk [vmem:[#allocation3 + $0x68] sm:$0xff] %vm1850_vm2, %v2503_v17  ;;  %v2044_v2 = vsel %vm2015_vm8, %v2011_v10, %v1651_v45  ;;  %v1880_v44 = vsel %vm1850_vm2, %v1847_v51, %v5444_v60  ;;  %v2004_v24 = vsel %vm1982_vm7, %v1971_v21, %v1509_v46 }
 0x284   : > { %2534 = vst.msk [vmem:[#allocation3 + $0x60] sm:$0xff] %vm1850_vm2, %v2502_v26  ;;  %v1913_v40 = vsel %vm1883_vm4, %v1880_v44, %v5470_v23  ;;  %v2037_v55 = vsel %vm2015_vm8, %v2004_v24, %v1637_v41 }
 0x285   : > { %v1946_v8 = vsel %vm1916_vm5, %v1913_v40, %v5520_v25  ;;  %v1848_v25 = vsel %vm384_vm0, %v5131_v12, %v5512_v33 }
 0x286   : > { %v1653_v19 = vpop.permute.xlu0 %1652  ;;  %v1763_v16 = vpop.permute.xlu1 %1762  ;;  %v1979_v63 = vsel %vm1949_vm6, %v1946_v8, %v5567_v38  ;;  %v1849_v38 = vsel %vm384_vm0, %v5153_v50, %v5549_v4 }
 0x287   : > { %v2069_v22 = vsel %vm2048_vm9, %v2036_v30, %v1763_v16  ;;  %v2012_v60 = vsel %vm1982_vm7, %v1979_v63, %v1525_v49  ;;  %v1881_v49 = vsel %vm1850_vm2, %v1848_v25, %v5561_v36  ;;  %v1882_v37 = vsel %vm1850_vm2, %v1849_v38, %v5575_v56 }
 0x288   : > { %3935 = vmatprep.mubr.msk.f32.mxu0 %vm2086_vm10, %v2069_v22  ;;  %v2045_v46 = vsel %vm2015_vm8, %v2012_v60, %v1653_v19  ;;  %v1914_v13 = vsel %vm1883_vm4, %v1881_v49, %v5581_v18  ;;  %v1915_v17 = vsel %vm1883_vm4, %v1882_v37, %v5585_v35  ;;  %v5690_v22 = vld [vmem:[%s6317_s2] ss:$0 sm:$0xff]  ;;  %vm3396_vm4 = vcmask 257024  }
 0x289   : > { %v1947_v33 = vsel %vm1916_vm5, %v1914_v13, %v1271_v9 }
 0x28a   : > { %v1779_v5 = vpop.permute.xlu0 %1778  ;;  %v1273_v47 = vpop.permute.xlu1 %1272 }
 0x28b   : > { %v2077_v15 = vsel %vm2048_vm9, %v2044_v2, %v1779_v5  ;;  %v1948_v26 = vsel %vm1916_vm5, %v1915_v17, %v1273_v47  ;;  %v3075_v2 = vld [vmem:[%s6319_s4 + $0x8] sm:$0xff]  ;;  %v2598_v25 = vld [vmem:[#allocation3 + $0x61] ss:$2 sm:$0xff] }
 0x28c   : > { %3947 = vmatprep.mubr.msk.f32.mxu1 %vm2086_vm10, %v2077_v15 }
 0x28e   : > { %v1399_v48 = vpop.permute.xlu0 %1398  ;;  %v1765_v11 = vpop.permute.xlu1 %1764 }
 0x28f   : > { %v2070_v27 = vsel %vm2048_vm9, %v2037_v55, %v1765_v11  ;;  %v1980_v50 = vsel %vm1949_vm6, %v1947_v33, %v1399_v48  ;;  %v3076_v48 = vld [vmem:[%s6319_s4 + $0x10] sm:$0xff]  ;;  %v3077_v11 = vld [vmem:[%s6319_s4 + $0x18] sm:$0xff]  ;;  %v3082_v33 = vld [vmem:[%s6319_s4 + $0x40] sm:$0xff] }
 0x290   : > { %3936 = vmatmul.mubr.msk.f32.gmra.mrb[20].mxu0 %vm2086_vm10, %v2070_v27  ;;  %v4002_v63 = vpack.c.bf16 %v3077_v11, %v3076_v48 }
 0x292   : > { %v1781_v20 = vpop.permute.xlu0 %1780  ;;  %v1401_v23 = vpop.permute.xlu1 %1400 }
 0x293   : > { %v2078_v45 = vsel %vm2048_vm9, %v2045_v46, %v1781_v20  ;;  %v1981_v4 = vsel %vm1949_vm6, %v1948_v26, %v1401_v23  ;;  %v3078_v46 = vld [vmem:[%s6319_s4 + $0x20] sm:$0xff]  ;;  %v3079_v20 = vld [vmem:[%s6319_s4 + $0x28] sm:$0xff]  ;;  %vm3615_vm6 = vcmask 7168  }
 0x294   : > { %3948 = vmatmul.mubr.msk.f32.gmra.mrb[6].mxu1 %vm2086_vm10, %v2078_v45  ;;  %v4006_v23 = vpack.c.bf16 %v3079_v20, %v3078_v46  ;;  %v2566_v45 = vld [vmem:[#allocation3 + $0x60] ss:$2 sm:$0xff] }
 0x295   : > { %v2623_v17 = vmax.f32 %v2566_v45, %v2598_v25 }
 0x296   : > { %v1527_v3 = vpop.permute.xlu0 %1526  ;;  %v1529_v0 = vpop.permute.xlu1 %1528 }
 0x297   : > { %v2013_v36 = vsel %vm1982_vm7, %v1980_v50, %v1527_v3  ;;  %v2014_v56 = vsel %vm1982_vm7, %v1981_v4, %v1529_v0  ;;  %v3080_v3 = vld [vmem:[%s6319_s4 + $0x30] sm:$0xff]  ;;  %v3081_v0 = vld [vmem:[%s6319_s4 + $0x38] sm:$0xff] }
 0x298   : > { %v4010_v49 = vpack.c.bf16 %v3081_v0, %v3080_v3 }
 0x29a   : > { %v1655_v43 = vpop.permute.xlu0 %1654  ;;  %v1657_v12 = vpop.permute.xlu1 %1656 }
 0x29b   : > { %v2046_v41 = vsel %vm2015_vm8, %v2013_v36, %v1655_v43  ;;  %v2047_v18 = vsel %vm2015_vm8, %v2014_v56, %v1657_v12  ;;  %vm3627_vm8 = vcmask 23552  }
 0x29e   : > { %v1783_v54 = vpop.permute.xlu0 %1782  ;;  %v1785_v35 = vpop.permute.xlu1 %1784 }
 0x29f   : > { %v2079_v42 = vsel %vm2048_vm9, %v2046_v41, %v1783_v54  ;;  %v2080_v9 = vsel %vm2048_vm9, %v2047_v18, %v1785_v35  ;;  %v2678_v41 = vld [vmem:[#allocation4] sm:$0xff] }
 0x2a0   : > { %3950 = vmatprep.mubr.msk.f32.mxu1 %vm2086_vm10, %v2079_v42 }
 0x2a1   : > { %3951 = vmatmul.mubr.msk.f32.gmra.mrb[8].mxu1 %vm2086_vm10, %v2080_v9  ;;  %vm3644_vm10 = vcmask 48128  }
 0x2a2   : > { %v5674_v57 = vpop.permute.xlu1 %2760  ;;  %v2759_v5 = vpop.permute.xlu0 %2758 }
 0x2a3   : > { %v3006_v42 = vsel %vm1850_vm2, %v2678_v41, %v2759_v5 }
 0x2a6   : > { %v5676_v34 = vpop.permute.xlu1 %2792  ;;  %v2791_v60 = vpop.permute.xlu0 %2790 }
 0x2aa   : > { %v5678_v14 = vpop.permute.xlu1 %2824  ;;  %v2823_v38 = vpop.permute.xlu0 %2822 }
 0x2ae   : > { %v2763_v61 = vpop.permute.xlu1 %2762  ;;  %v2855_v26 = vpop.permute.xlu0 %2854 }
 0x2af   : > { %v3008_v31 = vsel %vm1850_vm2, %v5436_v39, %v2763_v61  ;;  %v3074_v39 = vld [vmem:[%s6319_s4] sm:$0xff] }
 0x2b0   : > { %v3998_v15 = vpack.c.bf16 %v3075_v2, %v3074_v39 }
 0x2b2   : > { %v5680_v1 = vpop.permute.xlu1 %2886  ;;  %3999 = vmatprep.subr.bf16.mxu1 %v3998_v15  ;;  %v5737_v50 = vpop.permute.xlu0 %2856 }
 0x2b3   : > { %4001 = vmatpush3.bf16.msra.mxu1 %v3998_v15 }
 0x2b4   : > { %4003 = vmatprep.subr.bf16.mxu1 %v4002_v63 }
 0x2b6   : > { %v2795_v30 = vpop.permute.xlu1 %2794 }
 0x2b7   : > { %v5685_v19 = vsel %vm1916_vm5, %v3008_v31, %v2795_v30  ;;  %4005 = vmatpush3.bf16.msra.mxu1 %v4002_v63  ;;  %v3014_v31 = vsel %vm1916_vm5, %v3006_v42, %v2791_v60 }
 0x2b8   : > { %4007 = vmatprep.subr.bf16.mxu1 %v4006_v23 }
 0x2ba   : > { %v2919_v4 = vpop.permute.xlu1 %2918 }
 0x2bb   : > { %4009 = vmatpush3.bf16.msra.mxu1 %v4006_v23 }
 0x2bc   : > { %v3928_v16 = vpop.f32.mrb[14].mxu0  ;;  %v3940_v28 = vpop.f32.mrb[0].mxu1  ;;  %4011 = vmatprep.subr.bf16.mxu1 %v4010_v49 }
 0x2bd   : > { %v2434_v32 = vmul.f32 %v5690_v22, %v3928_v16  ;;  %v2442_v59 = vmul.f32 %v5690_v22, %v3940_v28  ;;  %v2323_v10 = vpop.f32.mrb[15].mxu0  ;;  %v2363_v6 = vpop.f32.mrb[1].mxu1 }
 0x2be   : > { %v2433_v47 = vmul.f32 %v5690_v22, %v2323_v10  ;;  %v2441_v58 = vmul.f32 %v5690_v22, %v2363_v6 }
 0x2bf   : > { %v2473_v51 = vadd.f32 %v5705_v7, %v2434_v32  ;;  %v2481_v21 = vadd.f32 %v5705_v7, %v2442_v59  ;;  %4013 = vmatpush3.bf16.msra.mxu1 %v4010_v49 }
 0x2c0   : > { %v2472_v44 = vadd.f32 %v5705_v7, %v2433_v47  ;;  %v2480_v24 = vadd.f32 %v5705_v7, %v2441_v58  ;;  %3969 = vmatprep.subr.mxu1 %v3082_v33 }
 0x2c1   : > { %v2505_v40 = vmax.f32 %v2473_v51, 0.0  ;;  %v2513_v55 = vmax.f32 %v2481_v21, 0.0 }
 0x2c2   : > { %v2504_v8 = vmax.f32 %v2472_v44, 0.0  ;;  %v2512_v27 = vmax.f32 %v2480_v24, 0.0 }
 0x2c3   : > { %2537 = vst.msk [vmem:[#allocation3 + $0x78] sm:$0xff] %vm1850_vm2, %v2505_v40  ;;  %2545 = vst.msk [vmem:[#allocation3 + $0xb8] sm:$0xff] %vm1850_vm2, %v2513_v55  ;;  %3970 = vmatpush3.msra.mxu1 %v3082_v33 }
 0x2c4   : > { %2536 = vst.msk [vmem:[#allocation3 + $0x70] sm:$0xff] %vm1850_vm2, %v2504_v8  ;;  %2544 = vst.msk [vmem:[#allocation3 + $0xb0] sm:$0xff] %vm1850_vm2, %v2512_v27 }
 0x2cb   : > { %v2568_v37 = vld [vmem:[#allocation3 + $0x70] ss:$2 sm:$0xff]  ;;  %v2600_v13 = vld [vmem:[#allocation3 + $0x71] ss:$2 sm:$0xff] }
 0x2cc   : > { %v2624_v43 = vmax.f32 %v2568_v37, %v2600_v13 }
 0x2ce   : > { %v2663_v12 = vmax.f32 %v2623_v17, %v2624_v43 }
 0x2d0   : > { %2665 = vst.msk [vmem:[#allocation4 + $0x41] sm:$0xff] %vm1850_vm2, %v2663_v12 }
 0x2d7   : > { %v5739_v36 = vld [vmem:[#allocation4 + $0x41] sm:$0xff] }
 0x2d8   : > { %v5741_v56 = vld [vmem:[#allocation4 + $0x40] sm:$0xff]  ;;  %2860 = vrot.lane.b32.xlu1 %v5739_v36, %s6361_s24 }
 0x2d9   : > { %2828 = vrot.lane.b32.xlu0 %v5741_v56, %s6362_s16  ;;  %v5757_v30 = vld [vmem:[#allocation4 + $0x42] sm:$0xff] }
 0x2da   : > { %v2827_v18 = vpop.permute.xlu1 %2826 }
 0x2db   : > { %v2765_v54 = vpop.permute.xlu0 %2764  ;;  %v3024_v35 = vsel %vm1982_vm7, %v5685_v19, %v2827_v18  ;;  %v3022_v19 = vsel %vm1982_vm7, %v3014_v31, %v2823_v38 }
 0x2dc   : > { %2984 = vrot.lane.b32.xlu1 %v5569_v53, %s6363_s25  ;;  %v3030_v32 = vsel %vm2048_vm9, %v3022_v19, %v2855_v26 }
 0x2dd   : > { %2952 = vrot.lane.b32.xlu0 %v5554_v52, %s6364_s30  ;;  %v3009_v52 = vsel %vm1850_vm2, %v5552_v29, %v2765_v54  ;;  %v3039_v6 = vsel %vm3038_vm12, %v3030_v32, %v5680_v1 }
 0x2de   : > { %v2951_v9 = vpop.permute.xlu1 %2950  ;;  %v3048_v29 = vsel %vm3047_vm13, %v3039_v6, %v2919_v4 }
 0x2df   : > { %v5754_v61 = vpop.permute.xlu0 %2888  ;;  %v3057_v39 = vsel %vm3056_vm14, %v3048_v29, %v2951_v9  ;;  %v3007_v9 = vsel %vm1850_vm2, %v5434_v62, %v5674_v57 }
 0x2e0   : > { %2798 = vrot.lane.b32.xlu1 %v5757_v30, %s6355_s29 }
 0x2e1   : > { %2766 = vrot.lane.b32.xlu0 %v5739_v36, %s6358_s12 }
 0x2e2   : > { %v2859_v16 = vpop.permute.xlu1 %2858 }
 0x2e3   : > { %v2797_v28 = vpop.permute.xlu0 %2796  ;;  %v5768_v59 = vsel %vm2048_vm9, %v3024_v35, %v2859_v16  ;;  %v3015_v16 = vsel %vm1916_vm5, %v3007_v9, %v5676_v34 }
 0x2e4   : > { %v5771_v10 = vsel %vm1916_vm5, %v3009_v52, %v2797_v28  ;;  %2922 = vrot.lane.b32.xlu1 %v5741_v56, %s6365_s14  ;;  %v3023_v6 = vsel %vm1982_vm7, %v3015_v16, %v5678_v14 }
 0x2e5   : > { %2890 = vrot.lane.b32.xlu0 %v5569_v53, %s6366_s13  ;;  %v3031_v62 = vsel %vm2048_vm9, %v3023_v6, %v5737_v50 }
 0x2e6   : > { %v2983_v2 = vpop.permute.xlu1 %2982  ;;  %v3040_v34 = vsel %vm3038_vm12, %v3031_v62, %v5754_v61  ;;  %v2741_v62 = vld [vmem:[#allocation4 + $0x91] sm:$0xff] }
 0x2e7   : > { %v3066_v5 = vsel %vm3065_vm15, %v3057_v39, %v2983_v2  ;;  %v2921_v41 = vpop.permute.xlu0 %2920 }
 0x2e8   : > { %3971 = vmatprep.mubr.msk.f32.mxu1 %vm3083_vm1, %v3066_v5  ;;  %v3049_v14 = vsel %vm3047_vm13, %v3040_v34, %v2921_v41 }
 0x2fc   : > { %v3931_v47 = vpop.f32.mrb[16].mxu0  ;;  %v3943_v58 = vpop.f32.mrb[2].mxu1 }
 0x2fd   : > { %v2436_v1 = vmul.f32 %v5690_v22, %v3931_v47  ;;  %v2444_v15 = vmul.f32 %v5690_v22, %v3943_v58  ;;  %v2333_v51 = vpop.f32.mrb[17].mxu0  ;;  %v2373_v21 = vpop.f32.mrb[3].mxu1 }
 0x2fe   : > { %v2435_v53 = vmul.f32 %v5690_v22, %v2333_v51  ;;  %v2443_v44 = vmul.f32 %v5690_v22, %v2373_v21 }
 0x2ff   : > { %v2475_v24 = vadd.f32 %v5705_v7, %v2436_v1  ;;  %v2483_v40 = vadd.f32 %v5705_v7, %v2444_v15 }
 0x300   : > { %v2474_v55 = vadd.f32 %v5705_v7, %v2435_v53  ;;  %v2482_v48 = vadd.f32 %v5705_v7, %v2443_v44 }
 0x301   : > { %v2507_v11 = vmax.f32 %v2475_v24, 0.0  ;;  %v2515_v8 = vmax.f32 %v2483_v40, 0.0 }
 0x302   : > { %v2506_v27 = vmax.f32 %v2474_v55, 0.0  ;;  %v2514_v63 = vmax.f32 %v2482_v48, 0.0 }
 0x303   : > { %2539 = vst.msk [vmem:[#allocation3 + $0x88] sm:$0xff] %vm1850_vm2, %v2507_v11  ;;  %2547 = vst.msk [vmem:[#allocation3 + $0xc8] sm:$0xff] %vm1850_vm2, %v2515_v8 }
 0x304   : > { %2538 = vst.msk [vmem:[#allocation3 + $0x80] sm:$0xff] %vm1850_vm2, %v2506_v27  ;;  %2546 = vst.msk [vmem:[#allocation3 + $0xc0] sm:$0xff] %vm1850_vm2, %v2514_v63 }
 0x30b   : > { %v2570_v26 = vld [vmem:[#allocation3 + $0x80] ss:$2 sm:$0xff]  ;;  %v2602_v4 = vld [vmem:[#allocation3 + $0x81] ss:$2 sm:$0xff] }
 0x30c   : > { %v2625_v35 = vmax.f32 %v2570_v26, %v2602_v4  ;;  %v2578_v31 = vld [vmem:[#allocation3 + $0xc0] ss:$2 sm:$0xff]  ;;  %v2610_v19 = vld [vmem:[#allocation3 + $0xc1] ss:$2 sm:$0xff] }
 0x30d   : > { %v2629_v57 = vmax.f32 %v2578_v31, %v2610_v19 }
 0x337   : > { %v3934_v60 = vpop.f32.mrb[18].mxu0 }
 0x338   : > { %v2438_v46 = vmul.f32 %v5690_v22, %v3934_v60  ;;  %v2343_v20 = vpop.f32.mrb[19].mxu0 }
 0x339   : > { %v2437_v23 = vmul.f32 %v5690_v22, %v2343_v20 }
 0x33a   : > { %v2477_v45 = vadd.f32 %v5705_v7, %v2438_v46 }
 0x33b   : > { %v2476_v25 = vadd.f32 %v5705_v7, %v2437_v23  ;;  %v3946_v0 = vpop.f32.mrb[4].mxu1 }
 0x33c   : > { %v2509_v3 = vmax.f32 %v2477_v45, 0.0  ;;  %v2446_v49 = vmul.f32 %v5690_v22, %v3946_v0  ;;  %v2383_v37 = vpop.f32.mrb[5].mxu1  ;;  %v2576_v45 = vld [vmem:[#allocation3 + $0xb0] ss:$2 sm:$0xff] }
 0x33d   : > { %v2508_v38 = vmax.f32 %v2476_v25, 0.0  ;;  %v2445_v13 = vmul.f32 %v5690_v22, %v2383_v37  ;;  %v2608_v25 = vld [vmem:[#allocation3 + $0xb1] ss:$2 sm:$0xff] }
 0x33e   : > { %2541 = vst.msk [vmem:[#allocation3 + $0x98] sm:$0xff] %vm1850_vm2, %v2509_v3  ;;  %v2485_v17 = vadd.f32 %v5705_v7, %v2446_v49 }
 0x33f   : > { %2540 = vst.msk [vmem:[#allocation3 + $0x90] sm:$0xff] %vm1850_vm2, %v2508_v38  ;;  %v2484_v43 = vadd.f32 %v5705_v7, %v2445_v13  ;;  %v2628_v38 = vmax.f32 %v2576_v45, %v2608_v25 }
 0x340   : > { %v2517_v12 = vmax.f32 %v2485_v17, 0.0 }
 0x341   : > { %v2516_v33 = vmax.f32 %v2484_v43, 0.0 }
 0x342   : > { %2549 = vst.msk [vmem:[#allocation3 + $0xd8] sm:$0xff] %vm1850_vm2, %v2517_v12 }
 0x343   : > { %2548 = vst.msk [vmem:[#allocation3 + $0xd0] sm:$0xff] %vm1850_vm2, %v2516_v33 }
 0x346   : > { %v2572_v18 = vld [vmem:[#allocation3 + $0x90] ss:$2 sm:$0xff]  ;;  %v2604_v54 = vld [vmem:[#allocation3 + $0x91] ss:$2 sm:$0xff] }
 0x347   : > { %v2626_v42 = vmax.f32 %v2572_v18, %v2604_v54 }
 0x349   : > { %v2666_v52 = vmax.f32 %v2625_v35, %v2626_v42 }
 0x34a   : > { %v2861_v28 = vpop.permute.xlu1 %2860  ;;  %v2580_v29 = vld [vmem:[#allocation3 + $0xd0] ss:$2 sm:$0xff]  ;;  %v2612_v39 = vld [vmem:[#allocation3 + $0xd1] ss:$2 sm:$0xff] }
 0x34b   : > { %v2829_v32 = vpop.permute.xlu0 %2828  ;;  %2668 = vst.msk [vmem:[#allocation4 + $0x51] sm:$0xff] %vm1850_vm2, %v2666_v52  ;;  %v2630_v5 = vmax.f32 %v2580_v29, %v2612_v39  ;;  %v2733_v39 = vld [vmem:[#allocation4 + $0x90] sm:$0xff] }
 0x34c   : > { %v3025_v2 = vsel %vm1982_vm7, %v5771_v10, %v2829_v32 }
 0x34d   : > { %v5820_v47 = vsel %vm2048_vm9, %v3025_v2, %v2861_v28  ;;  %v2672_v58 = vmax.f32 %v2629_v57, %v2630_v5  ;;  %v2749_v57 = vld [vmem:[#allocation4 + $0x92] sm:$0xff] }
 0x34e   : > { %v2985_v1 = vpop.permute.xlu1 %2984 }
 0x34f   : > { %v2953_v15 = vpop.permute.xlu0 %2952  ;;  %2674 = vst.msk [vmem:[#allocation4 + $0x71] sm:$0xff] %vm1850_vm2, %v2672_v58 }
 0x350   : > { %v3058_v51 = vsel %vm3056_vm14, %v3049_v14, %v2953_v15 }
 0x351   : > { %v3067_v10 = vsel %vm3065_vm15, %v3058_v51, %v2985_v1 }
 0x352   : > { %3972 = vmatmul.mubr.msk.f32.vlgmr.msra.gmra.mrb[10].mxu1 %vm3083_vm1, %v3067_v10  ;;  %v5829_v50 = vld [vmem:[#allocation4 + $0x50] sm:$0xff]  ;;  %v2799_v5 = vpop.permute.xlu1 %2798 }
 0x353   : > { %v2691_v21 = vld [vmem:[#allocation4 + $0x51] sm:$0xff]  ;;  %2830 = vrot.lane.b32.xlu1 %v5829_v50, %s6362_s16  ;;  %v2767_v34 = vpop.permute.xlu0 %2766 }
 0x354   : > { %2768 = vrot.lane.b32.xlu0 %v2691_v21, %s6358_s12  ;;  %v2699_v61 = vld [vmem:[#allocation4 + $0x52] sm:$0xff]  ;;  %v3010_v58 = vsel %vm1850_vm2, %v5741_v56, %v2767_v34 }
 0x355   : > { %v3018_v1 = vsel %vm1916_vm5, %v3010_v58, %v2799_v5 }
 0x356   : > { %v5876_v16 = vld [vmem:[#allocation4 + $0x70] sm:$0xff]  ;;  %v2923_v14 = vpop.permute.xlu1 %2922 }
 0x357   : > { %2954 = vrot.lane.b32.xlu1 %v5739_v36, %s6364_s30  ;;  %v2693_v28 = vld [vmem:[#allocation4 + $0x71] sm:$0xff] }
 0x358   : > { %2892 = vrot.lane.b32.xlu0 %v5757_v30, %s6366_s13  ;;  %v2701_v32 = vld [vmem:[#allocation4 + $0x72] sm:$0xff] }
 0x35b   : > { %2862 = vrot.lane.b32.xlu1 %v2691_v21, %s6361_s24 }
 0x35c   : > { %2800 = vrot.lane.b32.xlu0 %v2699_v61, %s6355_s29 }
 0x35f   : > { %2986 = vrot.lane.b32.xlu1 %v5757_v30, %s6363_s25 }
 0x360   : > { %2924 = vrot.lane.b32.xlu0 %v5829_v50, %s6365_s14 }
 0x363   : > { %v3937_v53 = vpop.f32.mrb[20].mxu0 }
 0x364   : > { %v2440_v44 = vmul.f32 %v5690_v22, %v3937_v53  ;;  %v2353_v24 = vpop.f32.mrb[21].mxu0 }
 0x365   : > { %v2439_v36 = vmul.f32 %v5690_v22, %v2353_v24 }
 0x366   : > { %v2479_v40 = vadd.f32 %v5705_v7, %v2440_v44 }
 0x367   : > { %v2478_v55 = vadd.f32 %v5705_v7, %v2439_v36  ;;  %v3949_v48 = vpop.f32.mrb[6].mxu1 }
 0x368   : > { %v2511_v11 = vmax.f32 %v2479_v40, 0.0  ;;  %v2448_v8 = vmul.f32 %v5690_v22, %v3949_v48  ;;  %v2393_v27 = vpop.f32.mrb[7].mxu1 }
 0x369   : > { %v2510_v63 = vmax.f32 %v2478_v55, 0.0  ;;  %v2447_v30 = vmul.f32 %v5690_v22, %v2393_v27 }
 0x36a   : > { %2543 = vst.msk [vmem:[#allocation3 + $0xa8] sm:$0xff] %vm1850_vm2, %v2511_v11  ;;  %v2487_v60 = vadd.f32 %v5705_v7, %v2448_v8 }
 0x36b   : > { %2542 = vst.msk [vmem:[#allocation3 + $0xa0] sm:$0xff] %vm1850_vm2, %v2510_v63  ;;  %v2486_v46 = vadd.f32 %v5705_v7, %v2447_v30 }
 0x36c   : > { %v2519_v20 = vmax.f32 %v2487_v60, 0.0 }
 0x36d   : > { %v2518_v23 = vmax.f32 %v2486_v46, 0.0 }
 0x36e   : > { %2551 = vst.msk [vmem:[#allocation3 + $0xe8] sm:$0xff] %vm1850_vm2, %v2519_v20 }
 0x36f   : > { %2550 = vst.msk [vmem:[#allocation3 + $0xe0] sm:$0xff] %vm1850_vm2, %v2518_v23 }
 0x372   : > { %v2574_v3 = vld [vmem:[#allocation3 + $0xa0] ss:$2 sm:$0xff]  ;;  %v2606_v0 = vld [vmem:[#allocation3 + $0xa1] ss:$2 sm:$0xff] }
 0x373   : > { %v2627_v49 = vmax.f32 %v2574_v3, %v2606_v0 }
 0x374   : > { %v3952_v37 = vpop.f32.mrb[8].mxu1 }
 0x375   : > { %v2669_v13 = vmax.f32 %v2627_v49, %v2628_v38  ;;  %v2450_v17 = vmul.f32 %v5690_v22, %v3952_v37  ;;  %v2403_v43 = vpop.f32.mrb[9].mxu1 }
 0x376   : > { %v2449_v12 = vmul.f32 %v5690_v22, %v2403_v43  ;;  %v2582_v22 = vld [vmem:[#allocation3 + $0xe0] ss:$2 sm:$0xff]  ;;  %v2614_v35 = vld [vmem:[#allocation3 + $0xe1] ss:$2 sm:$0xff] }
 0x377   : > { %2671 = vst.msk [vmem:[#allocation4 + $0x61] sm:$0xff] %vm1850_vm2, %v2669_v13  ;;  %v2489_v33 = vadd.f32 %v5705_v7, %v2450_v17 }
 0x378   : > { %v2488_v26 = vadd.f32 %v5705_v7, %v2449_v12  ;;  %v2631_v7 = vmax.f32 %v2582_v22, %v2614_v35 }
 0x379   : > { %v2521_v4 = vmax.f32 %v2489_v33, 0.0 }
 0x37a   : > { %v2520_v41 = vmax.f32 %v2488_v26, 0.0 }
 0x37b   : > { %2553 = vst.msk [vmem:[#allocation3 + $0xf8] sm:$0xff] %vm1850_vm2, %v2521_v4 }
 0x37c   : > { %2552 = vst.msk [vmem:[#allocation3 + $0xf0] sm:$0xff] %vm1850_vm2, %v2520_v41 }
 0x37e   : > { %v2715_v18 = vld [vmem:[#allocation4 + $0x61] sm:$0xff] }
 0x37f   : > { %v5863_v54 = vld [vmem:[#allocation4 + $0x60] sm:$0xff]  ;;  %2864 = vrot.lane.b32.xlu1 %v2715_v18, %s6361_s24 }
 0x380   : > { %2832 = vrot.lane.b32.xlu0 %v5863_v54, %s6362_s16  ;;  %v2700_v52 = vld [vmem:[#allocation4 + $0x62] sm:$0xff] }
 0x383   : > { %v2584_v42 = vld [vmem:[#allocation3 + $0xf0] ss:$2 sm:$0xff]  ;;  %v2616_v9 = vld [vmem:[#allocation3 + $0xf1] ss:$2 sm:$0xff]  ;;  %2988 = vrot.lane.b32.xlu1 %v2699_v61, %s6363_s25 }
 0x384   : > { %2956 = vrot.lane.b32.xlu0 %v2691_v21, %s6364_s30  ;;  %v2632_v31 = vmax.f32 %v2584_v42, %v2616_v9  ;;  %v2891_v21 = vpop.permute.xlu0 %2890 }
 0x386   : > { %v2675_v19 = vmax.f32 %v2631_v7, %v2632_v31 }
 0x387   : > { %2802 = vrot.lane.b32.xlu1 %v2700_v52, %s6355_s29 }
 0x388   : > { %2770 = vrot.lane.b32.xlu0 %v2715_v18, %s6358_s12  ;;  %2677 = vst.msk [vmem:[#allocation4 + $0x81] sm:$0xff] %vm1850_vm2, %v2675_v19 }
 0x38b   : > { %2926 = vrot.lane.b32.xlu1 %v5863_v54, %s6365_s14 }
 0x38c   : > { %2894 = vrot.lane.b32.xlu0 %v2699_v61, %s6366_s13  ;;  %v3041_v61 = vsel %vm3038_vm12, %v5768_v59, %v2891_v21 }
 0x38d   : > { %v3050_v44 = vsel %vm3047_vm13, %v3041_v61, %v2923_v14 }
 0x38f   : > { %2834 = vrot.lane.b32.xlu1 %v5876_v16, %s6362_s16  ;;  %v2709_v6 = vld [vmem:[#allocation4 + $0x80] sm:$0xff] }
 0x390   : > { %2772 = vrot.lane.b32.xlu0 %v2693_v28, %s6358_s12  ;;  %v2725_v29 = vld [vmem:[#allocation4 + $0x82] sm:$0xff] }
 0x391   : > { %v2717_v2 = vld [vmem:[#allocation4 + $0x81] sm:$0xff] }
 0x393   : > { %2958 = vrot.lane.b32.xlu1 %v2715_v18, %s6364_s30 }
 0x394   : > { %2896 = vrot.lane.b32.xlu0 %v2700_v52, %s6366_s13 }
 0x397   : > { %2866 = vrot.lane.b32.xlu1 %v2693_v28, %s6361_s24 }
 0x398   : > { %2804 = vrot.lane.b32.xlu0 %v2701_v32, %s6355_s29  ;;  %s377_s29 = sand.u32 1, %s4140_s18  }
 0x39b   : > { %2990 = vrot.lane.b32.xlu1 %v2700_v52, %s6363_s25 }
 0x39c   : > { %2928 = vrot.lane.b32.xlu0 %v5876_v16, %s6365_s14 }
 0x39f   : > { %2898 = vrot.lane.b32.xlu1 %v2701_v32, %s6366_s13 }
 0x3a0   : > { %2836 = vrot.lane.b32.xlu0 %v2709_v6, %s6362_s16 }
 0x3a3   : > { %2900 = vrot.lane.b32.xlu1 %v2725_v29, %s6366_s13  ;;  %s3677_s13 = scalar_lea.sflag [#allocation9], %s377_s29 }
 0x3a4   : > { %2960 = vrot.lane.b32.xlu0 %v2693_v28, %s6364_s30 }
 0x3a7   : > { %2932 = vrot.lane.b32.xlu1 %v2733_v39, %s6365_s14 }
 0x3a8   : > { %2868 = vrot.lane.b32.xlu0 %v2717_v2, %s6361_s24  ;;  %s378_s24 = scalar_lea.vmem [#allocation8], %s377_s29 }
 0x3a9   : > { %s3689_s16 = sshll.u32 %s378_s24, 4  ;;  %s6275_s16 = int_to_ptr.vmem [resolvable:$true] %s3689_s16 }
 0x3aa   : > { %s4086_s12 = scalar_lea.vmem %s6275_s16, 16  ;;  %p4093_p0 = scmp.lt.s32.totalorder %s6275_s16, %s4091_s15 }
 0x3ab   : > { %2964 = vrot.lane.b32.xlu1 %v2741_v62, %s6364_s30  ;;  %p4087_p11 = scmp.ne.s32.totalorder %s6275_s16, %s4086_s12  ;;  %p4094_p1 = scmp.lt.s32.totalorder %s4092_s0, %s4086_s12 }
 0x3ac   : > { %2992 = vrot.lane.b32.xlu0 %v2701_v32, %s6363_s25 }
 0x3ad   : > { %p4088_p12 = pnand %p4087_p11, %p4262_p5  ;;  %p4095_p2 = por %p4094_p1, %p4093_p0 }
 0x3af   : > { %2996 = vrot.lane.b32.xlu1 %v2749_v57, %s6363_s25  ;;  %p4089_p13 = pneg %p4088_p12 }
 0x3b0   : > { %2930 = vrot.lane.b32.xlu0 %v2709_v6, %s6365_s14  ;;  %s6273_s14 = scalar_lea.hbm %s6326_s11, %s3833_s22 }
 0x3b1   : > { %p4096_p3 = pnand %p4095_p2, %p4089_p13 }
 0x3b4   : > { %2962 = vrot.lane.b32.xlu0 %v2717_v2, %s6364_s30 }
 0x3b8   : > { %2994 = vrot.lane.b32.xlu0 %v2725_v29, %s6363_s25 }
 0x3c5   : > { %v2831_v15 = vpop.permute.xlu1 %2830 }
 0x3c6   : > { %v3026_v51 = vsel %vm1982_vm7, %v3018_v1, %v2831_v15  ;;  %v2769_v56 = vpop.permute.xlu0 %2768  ;;  %v5942_v1 = vld [vmem:[%s6320_s5] ss:$0 sm:$0xff] }
 0x3c7   : > { %v3011_v35 = vsel %vm1850_vm2, %v5829_v50, %v2769_v56 }
 0x3c9   : > { %v2955_v10 = vpop.permute.xlu1 %2954 }
 0x3ca   : > { %v3059_v24 = vsel %vm3056_vm14, %v3050_v44, %v2955_v10  ;;  %v2893_v55 = vpop.permute.xlu0 %2892  ;;  %v5949_v10 = vld [vmem:[%s6321_s6] ss:$0 sm:$0xff] }
 0x3cb   : > { %v3042_v63 = vsel %vm3038_vm12, %v5820_v47, %v2893_v55 }
 0x3cd   : > { %v2863_v53 = vpop.permute.xlu1 %2862 }
 0x3ce   : > { %v2801_v48 = vpop.permute.xlu0 %2800  ;;  %v3034_v47 = vsel %vm2048_vm9, %v3026_v51, %v2863_v53 }
 0x3cf   : > { %v3019_v9 = vsel %vm1916_vm5, %v3011_v35, %v2801_v48 }
 0x3d1   : > { %v2987_v36 = vpop.permute.xlu1 %2986 }
 0x3d2   : > { %v3068_v40 = vsel %vm3065_vm15, %v3059_v24, %v2987_v36  ;;  %v2925_v11 = vpop.permute.xlu0 %2924 }
 0x3d3   : > { %3974 = vmatprep.mubr.msk.f32.mxu1 %vm3083_vm1, %v3068_v40  ;;  %v3051_v59 = vsel %vm3047_vm13, %v3042_v63, %v2925_v11 }
 0x3f1   : > { %v2865_v8 = vpop.permute.xlu1 %2864 }
 0x3f2   : > { %v2833_v27 = vpop.permute.xlu0 %2832 }
 0x3f3   : > { %v3027_v31 = vsel %vm1982_vm7, %v3019_v9, %v2833_v27 }
 0x3f4   : > { %v3035_v52 = vsel %vm2048_vm9, %v3027_v31, %v2865_v8 }
 0x3f5   : > { %v2989_v30 = vpop.permute.xlu1 %2988 }
 0x3f6   : > { %v2957_v60 = vpop.permute.xlu0 %2956 }
 0x3f7   : > { %v3060_v46 = vsel %vm3056_vm14, %v3051_v59, %v2957_v60 }
 0x3f8   : > { %v3069_v20 = vsel %vm3065_vm15, %v3060_v46, %v2989_v30 }
 0x3f9   : > { %3975 = vmatmul.mubr.msk.f32.gmra.mrb[12].mxu1 %vm3083_vm1, %v3069_v20  ;;  %v2803_v23 = vpop.permute.xlu1 %2802 }
 0x3fa   : > { %v2771_v45 = vpop.permute.xlu0 %2770 }
 0x3fb   : > { %v3012_v5 = vsel %vm1850_vm2, %v5863_v54, %v2771_v45 }
 0x3fd   : > { %v2927_v25 = vpop.permute.xlu1 %2926 }
 0x3fe   : > { %v2895_v3 = vpop.permute.xlu0 %2894 }
 0x3ff   : > { %v3043_v13 = vsel %vm3038_vm12, %v3034_v47, %v2895_v3  ;;  %v3412_v47 = vld [vmem:[%s6324_s9 + $0x20] sm:$0xf] }
 0x400   : > { %v3052_v12 = vsel %vm3047_vm13, %v3043_v13, %v2927_v25 }
 0x401   : > { %v2835_v0 = vpop.permute.xlu1 %2834 }
 0x402   : > { %v2773_v38 = vpop.permute.xlu0 %2772 }
 0x403   : > { %v3013_v50 = vsel %vm1850_vm2, %v5876_v16, %v2773_v38  ;;  %v3020_v16 = vsel %vm1916_vm5, %v3012_v5, %v2803_v23  ;;  %v3302_v38 = vld [vmem:[%s6322_s7 + $0x8] sm:$0xff] }
 0x404   : > { %v3028_v54 = vsel %vm1982_vm7, %v3020_v16, %v2835_v0  ;;  %v3301_v0 = vld [vmem:[%s6322_s7] sm:$0xff] }
 0x405   : > { %v2959_v49 = vpop.permute.xlu1 %2958 }
 0x406   : > { %v2897_v37 = vpop.permute.xlu0 %2896  ;;  %v3061_v33 = vsel %vm3056_vm14, %v3052_v12, %v2959_v49  ;;  %v4014_v49 = vpack.c.bf16 %v3302_v38, %v3301_v0 }
 0x407   : > { %v3044_v28 = vsel %vm3038_vm12, %v3035_v52, %v2897_v37  ;;  %v5978_v37 = vld [vmem:[%s6323_s8] ss:$0 sm:$0xff] }
 0x408   : > { %4015 = vmatprep.subr.bf16.mxu1 %v4014_v49  ;;  %3397 = vst.msk [vmem:[#allocation7 + $0x20] sm:$0xf] %vm3396_vm4, %v5978_v37 }
 0x409   : > { %v2867_v17 = vpop.permute.xlu1 %2866  ;;  %4017 = vmatpush3.bf16.msra.mxu1 %v4014_v49  ;;  %3392 = vst.msk [vmem:[#allocation7] sm:$0xff] %vm2048_vm9, %v5978_v37  ;;  %3393 = vst.msk [vmem:[#allocation7 + $0x8] sm:$0xff] %vm2048_vm9, %v5978_v37 }
 0x40a   : > { %v2805_v43 = vpop.permute.xlu0 %2804  ;;  %v3036_v44 = vsel %vm2048_vm9, %v3028_v54, %v2867_v17  ;;  %3394 = vst.msk [vmem:[#allocation7 + $0x10] sm:$0xff] %vm2048_vm9, %v5978_v37  ;;  %3395 = vst.msk [vmem:[#allocation7 + $0x18] sm:$0xff] %vm2048_vm9, %v5978_v37 }
 0x40b   : > { %v3021_v62 = vsel %vm1916_vm5, %v3013_v50, %v2805_v43 }
 0x40d   : > { %v2991_v26 = vpop.permute.xlu1 %2990 }
 0x40e   : > { %v2929_v4 = vpop.permute.xlu0 %2928  ;;  %v3070_v41 = vsel %vm3065_vm15, %v3061_v33, %v2991_v26 }
 0x40f   : > { %3977 = vmatprep.mubr.msk.f32.mxu1 %vm3083_vm1, %v3070_v41  ;;  %v3053_v32 = vsel %vm3047_vm13, %v3044_v28, %v2929_v4  ;;  %v5993_v13 = vld [vmem:[#allocation7 + $0x20] sm:$0xf] }
 0x410   : > { %v3417_v17 = vmul.f32 %v3412_v47, %v5993_v13 }
 0x411   : > { %v2899_v18 = vpop.permute.xlu1 %2898 }
 0x412   : > { %v2837_v22 = vpop.permute.xlu0 %2836  ;;  %v3045_v36 = vsel %vm3038_vm12, %v3036_v44, %v2899_v18  ;;  %v3430_v43 = vsel %vm3396_vm4, %v3417_v17, 0.0  ;;  %v3801_v17 = vld [vmem:[%s6324_s9 + $0x40] sm:$0xff] }
 0x413   : > { %v3029_v57 = vsel %vm1982_vm7, %v3021_v62, %v2837_v22  ;;  %3431 = vadd.xlane.f32.xlu1 %v3430_v43  ;;  %v3411_v43 = vld [vmem:[%s6324_s9 + $0x18] sm:$0xff]  ;;  %vm3621_vm7 = vcmask 15360  }
 0x415   : > { %v2901_v7 = vpop.permute.xlu1 %2900 }
 0x416   : > { %v2961_v42 = vpop.permute.xlu0 %2960 }
 0x417   : > { %v3062_v29 = vsel %vm3056_vm14, %v3053_v32, %v2961_v42 }
 0x419   : > { %v2933_v6 = vpop.permute.xlu1 %2932 }
 0x41a   : > { %v2869_v19 = vpop.permute.xlu0 %2868 }
 0x41b   : > { %v3037_v34 = vsel %vm2048_vm9, %v3029_v57, %v2869_v19 }
 0x41c   : > { %v3046_v15 = vsel %vm3038_vm12, %v3037_v34, %v2901_v7 }
 0x41d   : > { %v2965_v58 = vpop.permute.xlu1 %2964  ;;  %v3055_v40 = vsel %vm3047_vm13, %v3046_v15, %v2933_v6 }
 0x41e   : > { %v2993_v39 = vpop.permute.xlu0 %2992  ;;  %v3064_v59 = vsel %vm3056_vm14, %v3055_v40, %v2965_v58 }
 0x41f   : > { %v3071_v2 = vsel %vm3065_vm15, %v3062_v29, %v2993_v39 }
 0x420   : > { %3978 = vmatmul.mubr.msk.f32.gmra.mrb[14].mxu1 %vm3083_vm1, %v3071_v2 }
 0x421   : > { %v2997_v55 = vpop.permute.xlu1 %2996 }
 0x422   : > { %v2931_v14 = vpop.permute.xlu0 %2930  ;;  %v3073_v46 = vsel %vm3065_vm15, %v3064_v59, %v2997_v55  ;;  %v3812_v59 = vld [vmem:[%s6324_s9 + $0x98] sm:$0xf] }
 0x423   : > { %v3054_v48 = vsel %vm3047_vm13, %v3045_v36, %v2931_v14 }
 0x425   : > { %v3973_v51 = vpop.f32.mrb[10].mxu1 }
 0x426   : > { %v3221_v21 = vmul.f32 %v3973_v51, %v5942_v1  ;;  %v3174_v61 = vpop.f32.mrb[11].mxu1  ;;  %v2963_v53 = vpop.permute.xlu0 %2962 }
 0x427   : > { %v3220_v24 = vmul.f32 %v5942_v1, %v3174_v61  ;;  %v3063_v27 = vsel %vm3056_vm14, %v3054_v48, %v2963_v53 }
 0x428   : > { %v3236_v56 = vadd.f32 %v5949_v10, %v3221_v21 }
 0x429   : > { %v3235_v11 = vadd.f32 %v5949_v10, %v3220_v24 }
 0x42a   : > { %v3244_v8 = vmax.f32 %v3236_v56, 0.0  ;;  %v2995_v63 = vpop.permute.xlu0 %2994 }
 0x42b   : > { %v3243_v30 = vmax.f32 %v3235_v11, 0.0  ;;  %v3072_v60 = vsel %vm3065_vm15, %v3063_v27, %v2995_v63  ;;  %v3802_v11 = vld [vmem:[%s6324_s9 + $0x48] sm:$0xf]  ;;  %v3817_v63 = vld [vmem:[%s6324_s9 + $0xc0] sm:$0xf] }
 0x42c   : > { %3252 = vst.msk [vmem:[#allocation5 + $0x8] sm:$0xff] %vm1916_vm5, %v3244_v8  ;;  %3980 = vmatprep.mubr.msk.f32.mxu1 %vm3083_vm1, %v3072_v60  ;;  %v3443_v27 = vmul.f32 %v3802_v11, %v5993_v13 }
 0x42d   : > { %3251 = vst.msk [vmem:[#allocation5] sm:$0xff] %vm1916_vm5, %v3243_v30  ;;  %3981 = vmatmul.mubr.msk.f32.gmra.mrb[16].mxu1 %vm3083_vm1, %v3073_v46  ;;  %v3822_v30 = vld [vmem:[%s6324_s9 + $0xe8] sm:$0xf]  ;;  %v3521_v46 = vmul.f32 %v3817_v63, %v5993_v13  ;;  %v3808_v63 = vld [vmem:[%s6324_s9 + $0x78] sm:$0xff] }
 0x42e   : > { %v3456_v60 = vsel %vm3396_vm4, %v3443_v27, 0.0 }
 0x42f   : > { %3457 = vadd.xlane.f32.xlu0 %v3456_v60 }
 0x434   : > { %v3259_v20 = vld [vmem:[#allocation5] ss:$2 sm:$0xff]  ;;  %v3267_v23 = vld [vmem:[#allocation5 + $0x1] ss:$2 sm:$0xff] }
 0x435   : > { %v3274_v45 = vmax.f32 %v3259_v20, %v3267_v23  ;;  %v3495_v20 = vmul.f32 %v3812_v59, %v5993_v13  ;;  %v3547_v23 = vmul.f32 %v3822_v30, %v5993_v13  ;;  %v3804_v59 = vld [vmem:[%s6324_s9 + $0x58] sm:$0xff] }
 0x437   : > { %v3279_v25 = vrot.slane %v3274_v45, 4 }
 0x439   : > { %v3281_v3 = vmax.f32 %v3274_v45, %v3279_v25  ;;  %v3534_v45 = vsel %vm3396_vm4, %v3521_v46, 0.0  ;;  %v3508_v25 = vsel %vm3396_vm4, %v3495_v20, 0.0 }
 0x43a   : > { %3509 = vadd.xlane.f32.xlu0 %v3508_v25 }
 0x43b   : > { %3283 = vst.msk [vmem:[#allocation6] sm:$0xf] %vm3282_vm3, %v3281_v3  ;;  %v3560_v3 = vsel %vm3396_vm4, %v3547_v23, 0.0  ;;  %v3805_v23 = vld [vmem:[%s6324_s9 + $0x60] sm:$0xff] }
 0x4cc   : > { %v3976_v12 = vpop.f32.mrb[12].mxu1 }
 0x4cd   : > { %v3223_v33 = vmul.f32 %v3976_v12, %v5942_v1  ;;  %v3184_v26 = vpop.f32.mrb[13].mxu1 }
 0x4ce   : > { %v3222_v4 = vmul.f32 %v5942_v1, %v3184_v26 }
 0x4cf   : > { %v3238_v41 = vadd.f32 %v5949_v10, %v3223_v33  ;;  %v3806_v33 = vld [vmem:[%s6324_s9 + $0x68] sm:$0xff] }
 0x4d0   : > { %v3237_v18 = vadd.f32 %v5949_v10, %v3222_v4 }
 0x4d1   : > { %v3246_v22 = vmax.f32 %v3238_v41, 0.0 }
 0x4d2   : > { %v3245_v35 = vmax.f32 %v3237_v18, 0.0 }
 0x4d3   : > { %3254 = vst.msk [vmem:[#allocation5 + $0x18] sm:$0xff] %vm1916_vm5, %v3246_v22 }
 0x4d4   : > { %3253 = vst.msk [vmem:[#allocation5 + $0x10] sm:$0xff] %vm1916_vm5, %v3245_v35 }
 0x4db   : > { %v3261_v42 = vld [vmem:[#allocation5 + $0x10] ss:$2 sm:$0xff]  ;;  %v3269_v9 = vld [vmem:[#allocation5 + $0x11] ss:$2 sm:$0xff] }
 0x4dc   : > { %v3275_v7 = vmax.f32 %v3261_v42, %v3269_v9  ;;  %v3811_v42 = vld [vmem:[%s6324_s9 + $0x90] sm:$0xff]  ;;  %v3826_v9 = vld [vmem:[%s6324_s9 + $0x108] sm:$0xff] }
 0x4de   : > { %v3285_v31 = vrot.slane %v3275_v7, 4 }
 0x4e0   : > { %v3287_v19 = vmax.f32 %v3275_v7, %v3285_v31 }
 0x4e2   : > { %3288 = vst.msk [vmem:[#allocation6 + $0x4] sm:$0xf] %vm3282_vm3, %v3287_v19 }
 0x4e9   : > { %v3299_v52 = vld [vmem:[#allocation6] sm:$0xff] }
 0x4ea   : > { %3987 = vmatprep.mubr.msk.f32.mxu1 %vm1916_vm5, %v3299_v52 }
 0x4f3   : > { %v3979_v28 = vpop.f32.mrb[14].mxu1 }
 0x4f4   : > { %v3225_v32 = vmul.f32 %v3979_v28, %v5942_v1  ;;  %v3194_v6 = vpop.f32.mrb[15].mxu1  ;;  %v3821_v28 = vld [vmem:[%s6324_s9 + $0xe0] sm:$0xff] }
 0x4f5   : > { %v3224_v29 = vmul.f32 %v5942_v1, %v3194_v6 }
 0x4f6   : > { %v3240_v39 = vadd.f32 %v5949_v10, %v3225_v32  ;;  %v3831_v32 = vld [vmem:[%s6324_s9 + $0x130] sm:$0xff] }
 0x4f7   : > { %v3239_v50 = vadd.f32 %v5949_v10, %v3224_v29 }
 0x4f8   : > { %v3248_v2 = vmax.f32 %v3240_v39, 0.0 }
 0x4f9   : > { %v3247_v62 = vmax.f32 %v3239_v50, 0.0 }
 0x4fa   : > { %3256 = vst.msk [vmem:[#allocation5 + $0x28] sm:$0xff] %vm1916_vm5, %v3248_v2  ;;  %v3409_v2 = vld [vmem:[%s6324_s9 + $0x8] sm:$0xff] }
 0x4fb   : > { %3255 = vst.msk [vmem:[#allocation5 + $0x20] sm:$0xff] %vm1916_vm5, %v3247_v62  ;;  %v3432_v62 = vpop.xlane.xlu1 %3431 }
 0x500   : > { %v3982_v57 = vpop.f32.mrb[16].mxu1 }
 0x501   : > { %v3227_v5 = vmul.f32 %v3982_v57, %v5942_v1  ;;  %v3204_v34 = vpop.f32.mrb[17].mxu1 }
 0x502   : > { %v3263_v14 = vld [vmem:[#allocation5 + $0x20] ss:$2 sm:$0xff]  ;;  %v3271_v58 = vld [vmem:[#allocation5 + $0x21] ss:$2 sm:$0xff]  ;;  %v3226_v16 = vmul.f32 %v5942_v1, %v3204_v34  ;;  %v3408_v34 = vld [vmem:[%s6324_s9] sm:$0xff] }
 0x503   : > { %v3276_v15 = vmax.f32 %v3263_v14, %v3271_v58  ;;  %v3242_v51 = vadd.f32 %v5949_v10, %v3227_v5 }
 0x504   : > { %v3241_v54 = vadd.f32 %v5949_v10, %v3226_v16  ;;  %v3807_v10 = vld [vmem:[%s6324_s9 + $0x70] sm:$0xf] }
 0x505   : > { %v3290_v21 = vrot.slane %v3276_v15, 4  ;;  %v3250_v61 = vmax.f32 %v3242_v51, 0.0  ;;  %v3469_v48 = vmul.f32 %v3807_v10, %v5993_v13  ;;  %v3803_v51 = vld [vmem:[%s6324_s9 + $0x50] sm:$0xff] }
 0x506   : > { %v3249_v53 = vmax.f32 %v3241_v54, 0.0  ;;  %v3798_v54 = vld [vmem:[%s6324_s9 + $0x28] sm:$0xff]  ;;  %v3799_v10 = vld [vmem:[%s6324_s9 + $0x30] sm:$0xff] }
 0x507   : > { %v3292_v44 = vmax.f32 %v3276_v15, %v3290_v21  ;;  %3258 = vst.msk [vmem:[#allocation5 + $0x38] sm:$0xff] %vm1916_vm5, %v3250_v61  ;;  %v3482_v8 = vsel %vm3396_vm4, %v3469_v48, 0.0  ;;  %v3458_v21 = vpop.xlane.xlu0 %3457 }
 0x508   : > { %3257 = vst.msk [vmem:[#allocation5 + $0x30] sm:$0xff] %vm1916_vm5, %v3249_v53  ;;  %3483 = vadd.xlane.f32.xlu1 %v3482_v8  ;;  %v3620_v53 = vsel %vm3615_vm6, %v3432_v62, %v3458_v21  ;;  %v3827_v62 = vld [vmem:[%s6324_s9 + $0x110] sm:$0xf] }
 0x509   : > { %3293 = vst.msk [vmem:[#allocation6 + $0x8] sm:$0xf] %vm3282_vm3, %v3292_v44 }
 0x50c   : > { %3535 = vadd.xlane.f32.xlu1 %v3534_v45  ;;  %v3800_v45 = vld [vmem:[%s6324_s9 + $0x38] sm:$0xff] }
 0x50f   : > { %v3265_v24 = vld [vmem:[#allocation5 + $0x30] ss:$2 sm:$0xff]  ;;  %v3273_v36 = vld [vmem:[#allocation5 + $0x31] ss:$2 sm:$0xff] }
 0x510   : > { %v3277_v40 = vmax.f32 %v3265_v24, %v3273_v36  ;;  %3561 = vadd.xlane.f32.xlu1 %v3560_v3 }
 0x512   : > { %v3295_v56 = vrot.slane %v3277_v40, 4 }
 0x514   : > { %v3297_v1 = vmax.f32 %v3277_v40, %v3295_v56 }
 0x516   : > { %3298 = vst.msk [vmem:[#allocation6 + $0xc] sm:$0xf] %vm3282_vm3, %v3297_v1 }
 0x51d   : > { %v3300_v55 = vld [vmem:[#allocation6 + $0x8] sm:$0xff] }
 0x51e   : > { %3988 = vmatmul.mubr.msk.f32.vlgmr.msra.gmra.mrb[18].mxu1 %vm1916_vm5, %v3300_v55  ;;  %vm3399_vm5 = vcmask 261124   ;;  %v3410_v55 = vld [vmem:[%s6324_s9 + $0x10] sm:$0xff] }
 0x595   : > { %v3484_v61 = vpop.xlane.xlu1 %3483 }
 0x596   : > { %v6101_v44 = vsel %vm3621_vm7, %v3620_v53, %v3484_v61  ;;  %v3820_v61 = vld [vmem:[%s6324_s9 + $0xd8] sm:$0xff] }
 0x5f1   : > { %v3989_v0 = vpop.f32.mrb[18].mxu1 }
 0x5f2   : > { %v3388_v38 = vadd.f32 %v3989_v0, %v5978_v37  ;;  %v3382_v49 = vpop.f32.mrb[19].mxu1 }
 0x5f3   : > { %v3383_v47 = vadd.f32 %v5978_v37, %v3382_v49  ;;  %v3816_v37 = vld [vmem:[%s6324_s9 + $0xb8] sm:$0xff]  ;;  %v3814_v49 = vld [vmem:[%s6324_s9 + $0xa8] sm:$0xff] }
 0x5f4   : > { %3401 = vst.msk [vmem:[#allocation7 + $0x13] sm:$0xf] %vm3396_vm4, %v3388_v38 }
 0x5f5   : > { %3402 = vst.msk [vmem:[#allocation7 + $0x15] sm:$0xf0] %vm3399_vm5, %v3388_v38  ;;  %3400 = vst.msk [vmem:[#allocation7 + $0x9] sm:$0xf0] %vm3399_vm5, %v3383_v47 }
 0x5f6   : > { %3398 = vst.msk [vmem:[#allocation7 + $0x7] sm:$0xf] %vm3396_vm4, %v3383_v47  ;;  %v3809_v47 = vld [vmem:[%s6324_s9 + $0x80] sm:$0xff] }
 0x5fc   : > { %v3406_v12 = vld [vmem:[#allocation7 + $0x18] sm:$0xff]  ;;  %v6107_v1 = vld [vmem:[#allocation7 + $0x10] sm:$0xff] }
 0x5fd   : > { %v3442_v26 = vmul.f32 %v3801_v17, %v3406_v12  ;;  %v3416_v4 = vmul.f32 %v3411_v43, %v3406_v12  ;;  %v3468_v22 = vmul.f32 %v3806_v33, %v3406_v12  ;;  %v3520_v35 = vmul.f32 %v3816_v37, %v3406_v12  ;;  %v6082_v57 = vld [vmem:[#allocation7 + $0x8] sm:$0xff]  ;;  %v6084_v5 = vld [vmem:[#allocation7] sm:$0xff] }
 0x5fe   : > { %v3494_v19 = vmul.f32 %v3811_v42, %v3406_v12  ;;  %v3572_v52 = vmul.f32 %v3826_v9, %v3406_v12  ;;  %v3546_v39 = vmul.f32 %v3821_v28, %v3406_v12  ;;  %v3598_v50 = vmul.f32 %v3831_v32, %v3406_v12  ;;  %v3818_v37 = vld [vmem:[%s6324_s9 + $0xc8] sm:$0xff]  ;;  %v3819_v28 = vld [vmem:[%s6324_s9 + $0xd0] sm:$0xff] }
 0x5ff   : > { %v3453_v41 = vsel %vm2048_vm9, %v3442_v26, 0.0  ;;  %v3427_v18 = vsel %vm2048_vm9, %v3416_v4, 0.0  ;;  %v3479_v7 = vsel %vm2048_vm9, %v3468_v22, 0.0  ;;  %v3531_v31 = vsel %vm2048_vm9, %v3520_v35, 0.0  ;;  %v3813_v26 = vld [vmem:[%s6324_s9 + $0xa0] sm:$0xff]  ;;  %v3823_v35 = vld [vmem:[%s6324_s9 + $0xf0] sm:$0xff] }
 0x600   : > { %3454 = vadd.xlane.f32.xlu1 %v3453_v41  ;;  %3428 = vadd.xlane.f32.xlu0 %v3427_v18  ;;  %v3505_v6 = vsel %vm2048_vm9, %v3494_v19, 0.0  ;;  %v3583_v29 = vsel %vm2048_vm9, %v3572_v52, 0.0  ;;  %v3557_v14 = vsel %vm2048_vm9, %v3546_v39, 0.0  ;;  %v3609_v58 = vsel %vm2048_vm9, %v3598_v50, 0.0  ;;  %v3810_v42 = vld [vmem:[%s6324_s9 + $0x88] sm:$0xff]  ;;  %v3828_v52 = vld [vmem:[%s6324_s9 + $0x118] sm:$0xff] }
 0x601   : > { %v3414_v16 = vmul.f32 %v3409_v2, %v6082_v57  ;;  %v3413_v15 = vmul.f32 %v3408_v34, %v6084_v5  ;;  %v3465_v40 = vmul.f32 %v3803_v51, %v6084_v5  ;;  %v3439_v56 = vmul.f32 %v3798_v54, %v6084_v5  ;;  %v3825_v50 = vld [vmem:[%s6324_s9 + $0x100] sm:$0xff]  ;;  %v3815_v2 = vld [vmem:[%s6324_s9 + $0xb0] sm:$0xff] }
 0x602   : > { %v3415_v8 = vmul.f32 %v3410_v55, %v6107_v1  ;;  %v3440_v27 = vmul.f32 %v3799_v10, %v6082_v57  ;;  %v3491_v46 = vmul.f32 %v3808_v63, %v6084_v5  ;;  %v3466_v20 = vmul.f32 %v3804_v59, %v6082_v57  ;;  %v3830_v10 = vld [vmem:[%s6324_s9 + $0x128] sm:$0xff]  ;;  %v6221_v59 = vpop.xlane.xlu1 %3535 }
 0x603   : > { %v3421_v24 = vsel %vm2048_vm9, %v3414_v16, 0.0  ;;  %v3418_v36 = vsel %vm2048_vm9, %v3413_v15, 0.0  ;;  %v3470_v48 = vsel %vm2048_vm9, %v3465_v40, 0.0  ;;  %v3444_v11 = vsel %vm2048_vm9, %v3439_v56, 0.0  ;;  %v3824_v16 = vld [vmem:[%s6324_s9 + $0xf8] sm:$0xff]  ;;  %v3829_v40 = vld [vmem:[%s6324_s9 + $0x120] sm:$0xff] }
 0x604   : > { %3480 = vadd.xlane.f32.xlu1 %v3479_v7  ;;  %3532 = vadd.xlane.f32.xlu0 %v3531_v31  ;;  %v3424_v30 = vsel %vm2048_vm9, %v3415_v8, 0.0  ;;  %v3447_v60 = vsel %vm2048_vm9, %v3440_v27, 0.0  ;;  %v3496_v25 = vsel %vm2048_vm9, %v3491_v46, 0.0  ;;  %v3473_v3 = vsel %vm2048_vm9, %v3466_v20, 0.0 }
 0x605   : > { %v3467_v0 = vmul.f32 %v3805_v23, %v6107_v1  ;;  %v3441_v38 = vmul.f32 %v3800_v45, %v6107_v1  ;;  %v3518_v12 = vmul.f32 %v3814_v49, %v6082_v57  ;;  %v3492_v33 = vmul.f32 %v3809_v47, %v6082_v57 }
 0x606   : > { %v3543_v18 = vmul.f32 %v3818_v37, %v6084_v5  ;;  %v3517_v22 = vmul.f32 %v3813_v26, %v6084_v5  ;;  %v3569_v31 = vmul.f32 %v3823_v35, %v6084_v5  ;;  %v3493_v19 = vmul.f32 %v3810_v42, %v6107_v1 }
 0x607   : > { %v3476_v17 = vsel %vm2048_vm9, %v3467_v0, 0.0  ;;  %v3450_v43 = vsel %vm2048_vm9, %v3441_v38, 0.0  ;;  %v3525_v4 = vsel %vm2048_vm9, %v3518_v12, 0.0  ;;  %v3499_v41 = vsel %vm2048_vm9, %v3492_v33, 0.0 }
 0x608   : > { %3506 = vadd.xlane.f32.xlu1 %v3505_v6  ;;  %3584 = vadd.xlane.f32.xlu0 %v3583_v29  ;;  %v3548_v9 = vsel %vm2048_vm9, %v3543_v18, 0.0  ;;  %v3522_v7 = vsel %vm2048_vm9, %v3517_v22, 0.0  ;;  %v3574_v32 = vsel %vm2048_vm9, %v3569_v31, 0.0  ;;  %v3502_v6 = vsel %vm2048_vm9, %v3493_v19, 0.0 }
 0x609   : > { %v3595_v29 = vmul.f32 %v3828_v52, %v6084_v5  ;;  %v3544_v39 = vmul.f32 %v3819_v28, %v6082_v57  ;;  %v3573_v15 = vmul.f32 %v3827_v62, %v5993_v13  ;;  %v3570_v21 = vmul.f32 %v3824_v16, %v6082_v57 }
 0x60a   : > { %v3596_v55 = vmul.f32 %v3829_v40, %v6082_v57  ;;  %v3597_v8 = vmul.f32 %v3830_v10, %v6107_v1 }
 0x60b   : > { %v3600_v34 = vsel %vm2048_vm9, %v3595_v29, 0.0  ;;  %v3551_v5 = vsel %vm2048_vm9, %v3544_v39, 0.0  ;;  %v3586_v53 = vsel %vm3396_vm4, %v3573_v15, 0.0 }
 0x60c   : > { %3558 = vadd.xlane.f32.xlu1 %v3557_v14  ;;  %3610 = vadd.xlane.f32.xlu0 %v3609_v58  ;;  %v3571_v14 = vmul.f32 %v3825_v50, %v6107_v1  ;;  %v3519_v58 = vmul.f32 %v3815_v2, %v6107_v1  ;;  %v3606_v63 = vsel %vm2048_vm9, %v3597_v8, 0.0 }
 0x60e   : > { %v3580_v51 = vsel %vm2048_vm9, %v3571_v14, 0.0  ;;  %v3528_v54 = vsel %vm2048_vm9, %v3519_v58, 0.0 }
 0x610   : > { %3422 = vadd.xlane.f32.xlu1 %v3421_v24  ;;  %3419 = vadd.xlane.f32.xlu0 %v3418_v36  ;;  %v3577_v24 = vsel %vm2048_vm9, %v3570_v21, 0.0  ;;  %v3545_v36 = vmul.f32 %v3820_v61, %v6107_v1 }
 0x612   : > { %v3554_v56 = vsel %vm2048_vm9, %v3545_v36, 0.0 }
 0x614   : > { %3471 = vadd.xlane.f32.xlu1 %v3470_v48  ;;  %3445 = vadd.xlane.f32.xlu0 %v3444_v11  ;;  %v3832_v48 = vld [vmem:[%s6324_s9 + $0x138] sm:$0xf]  ;;  %v3603_v11 = vsel %vm2048_vm9, %v3596_v55, 0.0  ;;  %vm3638_vm9 = vcmask 39936  }
 0x615   : > { %v3599_v27 = vmul.f32 %v3832_v48, %v5993_v13 }
 0x617   : > { %v3612_v57 = vsel %vm3396_vm4, %v3599_v27, 0.0 }
 0x618   : > { %3425 = vadd.xlane.f32.xlu1 %v3424_v30  ;;  %3448 = vadd.xlane.f32.xlu0 %v3447_v60  ;;  %v6223_v30 = vpop.xlane.xlu1 %3561  ;;  %v3510_v60 = vpop.xlane.xlu0 %3509 }
 0x619   : > { %v3632_v55 = vsel %vm3627_vm8, %v6101_v44, %v3510_v60 }
 0x61c   : > { %3497 = vadd.xlane.f32.xlu1 %v3496_v25  ;;  %3474 = vadd.xlane.f32.xlu0 %v3473_v3 }
 0x620   : > { %3477 = vadd.xlane.f32.xlu1 %v3476_v17  ;;  %3451 = vadd.xlane.f32.xlu0 %v3450_v43 }
 0x624   : > { %3526 = vadd.xlane.f32.xlu1 %v3525_v4  ;;  %3500 = vadd.xlane.f32.xlu0 %v3499_v41 }
 0x628   : > { %3549 = vadd.xlane.f32.xlu1 %v3548_v9  ;;  %3523 = vadd.xlane.f32.xlu0 %v3522_v7 }
 0x62c   : > { %3575 = vadd.xlane.f32.xlu1 %v3574_v32  ;;  %3503 = vadd.xlane.f32.xlu0 %v3502_v6 }
 0x630   : > { %3601 = vadd.xlane.f32.xlu1 %v3600_v34  ;;  %3552 = vadd.xlane.f32.xlu0 %v3551_v5 }
 0x634   : > { %3581 = vadd.xlane.f32.xlu1 %v3580_v51  ;;  %3529 = vadd.xlane.f32.xlu0 %v3528_v54 }
 0x638   : > { %3587 = vadd.xlane.f32.xlu1 %v3586_v53  ;;  %3578 = vadd.xlane.f32.xlu0 %v3577_v24 }
 0x63c   : > { %3555 = vadd.xlane.f32.xlu0 %v3554_v56 }
 0x640   : > { %3604 = vadd.xlane.f32.xlu0 %v3603_v11 }
 0x644   : > { %3607 = vadd.xlane.f32.xlu0 %v3606_v63  ;;  %v3637_v63 = vsel %vm384_vm0, %v3632_v55, %v6221_v59 }
 0x648   : > { %3613 = vadd.xlane.f32.xlu0 %v3612_v57 }
 0x68d   : > { %v3455_v46 = vpop.xlane.xlu1 %3454  ;;  %v3429_v20 = vpop.xlane.xlu0 %3428 }
 0x68e   : > { %v3619_v52 = vsel %vm3615_vm6, %v3429_v20, %v3455_v46 }
 0x691   : > { %v3481_v23 = vpop.xlane.xlu1 %3480  ;;  %v3533_v45 = vpop.xlane.xlu0 %3532 }
 0x692   : > { %v3625_v6 = vsel %vm3621_vm7, %v3619_v52, %v3481_v23 }
 0x695   : > { %v3507_v25 = vpop.xlane.xlu1 %3506  ;;  %v3585_v1 = vpop.xlane.xlu0 %3584 }
 0x696   : > { %v3631_v50 = vsel %vm3627_vm8, %v3625_v6, %v3507_v25 }
 0x697   : > { %v3636_v58 = vsel %vm384_vm0, %v3631_v50, %v3533_v45 }
 0x699   : > { %v3559_v3 = vpop.xlane.xlu1 %3558  ;;  %v3611_v0 = vpop.xlane.xlu0 %3610 }
 0x69a   : > { %v3642_v51 = vsel %vm3638_vm9, %v3636_v58, %v3559_v3 }
 0x69b   : > { %v3648_v8 = vsel %vm3644_vm10, %v3642_v51, %v3585_v1  ;;  %v3643_v1 = vsel %vm3638_vm9, %v3637_v63, %v6223_v30 }
 0x69c   : > { %v3654_v44 = vsel %vm3650_vm11, %v3648_v8, %v3611_v0 }
 0x69d   : > { %v3423_v13 = vpop.xlane.xlu1 %3422  ;;  %v3420_v38 = vpop.xlane.xlu0 %3419  ;;  %v3661_v59 = vsel %vm1850_vm2, %v3654_v44, 0.0 }
 0x6a1   : > { %v3472_v49 = vpop.xlane.xlu1 %3471  ;;  %v3446_v47 = vpop.xlane.xlu0 %3445 }
 0x6a2   : > { %v3616_v31 = vsel %vm3615_vm6, %v3420_v38, %v3446_v47 }
 0x6a3   : > { %v3622_v29 = vsel %vm3621_vm7, %v3616_v31, %v3472_v49 }
 0x6a5   : > { %v3426_v17 = vpop.xlane.xlu1 %3425  ;;  %v3449_v43 = vpop.xlane.xlu0 %3448 }
 0x6a6   : > { %v3617_v28 = vsel %vm3615_vm6, %v3423_v13, %v3449_v43 }
 0x6a9   : > { %v3498_v12 = vpop.xlane.xlu1 %3497  ;;  %v3475_v33 = vpop.xlane.xlu0 %3474 }
 0x6aa   : > { %v3623_v39 = vsel %vm3621_vm7, %v3617_v28, %v3475_v33  ;;  %v3628_v2 = vsel %vm3627_vm8, %v3622_v29, %v3498_v12 }
 0x6ad   : > { %v3452_v37 = vpop.xlane.xlu0 %3451  ;;  %v3478_v26 = vpop.xlane.xlu1 %3477 }
 0x6ae   : > { %v3618_v62 = vsel %vm3615_vm6, %v3426_v17, %v3452_v37 }
 0x6af   : > { %v3624_v16 = vsel %vm3621_vm7, %v3618_v62, %v3478_v26  ;;  %v3672_v26 = vld [vmem:[%s6325_s10] sm:$0x1] }
 0x6b1   : > { %v3501_v4 = vpop.xlane.xlu0 %3500  ;;  %v3527_v41 = vpop.xlane.xlu1 %3526 }
 0x6b2   : > { %v3629_v34 = vsel %vm3627_vm8, %v3623_v39, %v3501_v4 }
 0x6b3   : > { %v3634_v15 = vsel %vm384_vm0, %v3629_v34, %v3527_v41 }
 0x6b5   : > { %v3524_v18 = vpop.xlane.xlu0 %3523  ;;  %v3550_v35 = vpop.xlane.xlu1 %3549 }
 0x6b6   : > { %v3633_v5 = vsel %vm384_vm0, %v3628_v2, %v3524_v18 }
 0x6b7   : > { %v3639_v54 = vsel %vm3638_vm9, %v3633_v5, %v3550_v35 }
 0x6b9   : > { %v3504_v22 = vpop.xlane.xlu0 %3503  ;;  %v3576_v9 = vpop.xlane.xlu1 %3575 }
 0x6ba   : > { %v3630_v21 = vsel %vm3627_vm8, %v3624_v16, %v3504_v22  ;;  %v3645_v24 = vsel %vm3644_vm10, %v3639_v54, %v3576_v9 }
 0x6bd   : > { %v3553_v42 = vpop.xlane.xlu0 %3552  ;;  %v3602_v32 = vpop.xlane.xlu1 %3601 }
 0x6be   : > { %v3640_v61 = vsel %vm3638_vm9, %v3634_v15, %v3553_v42  ;;  %v3651_v10 = vsel %vm3650_vm11, %v3645_v24, %v3602_v32 }
 0x6bf   : > { %v3656_v57 = vsel %vm1850_vm2, %v3651_v10, 0.0 }
 0x6c1   : > { %v3530_v7 = vpop.xlane.xlu0 %3529  ;;  %v3582_v53 = vpop.xlane.xlu1 %3581 }
 0x6c2   : > { %v3635_v36 = vsel %vm384_vm0, %v3630_v21, %v3530_v7  ;;  %vm3663_vm0 = vcmask 60416  }
 0x6c5   : > { %v3579_v19 = vpop.xlane.xlu0 %3578  ;;  %v3588_v60 = vpop.xlane.xlu1 %3587 }
 0x6c6   : > { %v3646_v40 = vsel %vm3644_vm10, %v3640_v61, %v3579_v19  ;;  %v3649_v13 = vsel %vm3644_vm10, %v3643_v1, %v3588_v60 }
 0x6c9   : > { %v3556_v14 = vpop.xlane.xlu0 %3555 }
 0x6ca   : > { %v3641_v48 = vsel %vm3638_vm9, %v3635_v36, %v3556_v14 }
 0x6cb   : > { %v3647_v46 = vsel %vm3644_vm10, %v3641_v48, %v3582_v53 }
 0x6cd   : > { %v3605_v56 = vpop.xlane.xlu0 %3604 }
 0x6ce   : > { %v3652_v11 = vsel %vm3650_vm11, %v3646_v40, %v3605_v56 }
 0x6cf   : > { %v3657_v27 = vsel %vm1850_vm2, %v3652_v11, 0.0 }
 0x6d0   : > { %v3658_v23 = vadd.f32 %v3657_v27, %v3656_v57 }
 0x6d1   : > { %v3608_v20 = vpop.xlane.xlu0 %3607 }
 0x6d2   : > { %v3653_v45 = vsel %vm3650_vm11, %v3647_v46, %v3608_v20 }
 0x6d3   : > { %v3659_v25 = vsel %vm1850_vm2, %v3653_v45, 0.0  ;;  %vm3674_vm2 = vcmask 57344  }
 0x6d4   : > { %v3660_v3 = vadd.f32 %v3659_v25, %v3658_v23 }
 0x6d5   : > { %v3614_v38 = vpop.xlane.xlu0 %3613 }
 0x6d6   : > { %v3662_v49 = vadd.f32 %v3661_v59, %v3660_v3  ;;  %v3655_v0 = vsel %vm3650_vm11, %v3649_v13, %v3614_v38 }
 0x6d7   : > { %v3664_v47 = vsel %vm3663_vm0, %v3655_v0, 0.0 }
 0x6d8   : > { %v3665_v17 = vadd.f32 %v3664_v47, %v3662_v49 }
 0x6da   : > { %v3666_v43 = vrot.slane %v3665_v17, 4 }
 0x6dc   : > { %v3667_v12 = vadd.f32 %v3666_v43, %v3665_v17 }
 0x6de   : > { %v3668_v33 = vrot.slane %v3667_v12, 2 }
 0x6e0   : > { %v3669_v37 = vadd.f32 %v3668_v33, %v3667_v12 }
 0x6e2   : > { %v3670_v30 = vrot.slane %v3669_v37, 1 }
 0x6e4   : > { %v3671_v4 = vadd.f32 %v3670_v30, %v3669_v37 }
 0x6e6   : > { %v3673_v41 = vadd.f32 %v3672_v26, %v3671_v4 }
 0x6e8   : > { %3675 = vst.msk [vmem:[%s378_s24] sm:$0x1] %vm3674_vm2, %v3673_v41 }
 0x6e9   : > { %4099 = shalt.err (!%p4096_p3)
}
 0x6ea   : > { %s4100_s29 = scalar_lea.hbm %s6273_s14, 16  ;;  %s4104_s25 = scalar_lea.hbm %s6326_s11, 32 }
 0x6eb   : > { %p4101_p4 = scmp.ne.s32.totalorder %s6273_s14, %s4100_s29  ;;  %p4105_p9 = scmp.lt.u32.totalorder %s6273_s14, %s6326_s11 }
 0x6ec   : > { %p4106_p10 = scmp.lt.u32.totalorder %s4104_s25, %s4100_s29  ;;  %p4108_p12 = scmp.lt.u32.totalorder %s4100_s29, %s6273_s14 }
 0x6ed   : > { %p4102_p7 = pnand %p4101_p4, %p4262_p5 }
 0x6ee   : > { %p4107_p11 = por %p4106_p10, %p4105_p9 }
 0x6ef   : > { %p4103_p8 = pneg %p4102_p7 }
 0x6f0   : > { %p4109_p13 = por %p4108_p12, %p4107_p11 }
 0x6f2   : > { %p4110_p0 = pnand %p4109_p13, %p4103_p8 }
 0x6f4   : > { %4113 = shalt.err (!%p4110_p0)
}
 0x6f5   : > { %4024 = dma.vmem_to_hbm [thread:$0]  (%p4262_p5), %s6275_s16, 16, %s6273_s14, %s3677_s13  }
 0x6f6 PF: > { %p4030_p1 = scmp.ge.s32.totalorder %s4148_s20, 2  ;;  %s3701_s0 = sand.u32 1, %s4136_s17  }
 0x6f7   : > { %s3702_s12 = scalar_lea.sflag [#allocation9], %s3701_s0 }
 0x6f8   : > { %p4027_p2 = pnand %p4030_p1, %p4266_p6 }
 0x6fa   : > { %4131 = dma.done.wait (!%p4027_p2), %s3702_s12, 16  }
 0x6fb   : > { %4133 = vsyncadd (!%p4027_p2), %s3702_s12, 4294967280  ;;  %p21_p3 = scmp.ge.s32.totalorder %s4249_s23, 4   ;;  %s6367_s17 = smov %s4140_s18 }
 0x6fc   : > { %s6368_s18 = smov %s4144_s19  ;;  %s6369_s19 = smov %s4260_s26 }
 0x6fd   : > { %s6370_s20 = smov %s4249_s23  ;;  %23 = sbr.rel (!%p21_p3) target bundleno = 5 (0x5), region = 154 }
 0x704   :  { %3706 = vsyncpa [#allocation9], 1 }
 0x705   :  { %3708 = vsyncpa [#allocation9 + $0x1], 1 }

</bundles_post_ra>
